<compile_context>
chip_gen: v5e
topology: v5e:2x2
jax: 0.10.0
libtpu: 0.0.40
codegen_flags: <defaults>
</compile_context>

<pallas_src>
import functools

import jax
import jax.numpy as jnp
from jax.experimental import pallas as pl
from jax.experimental.pallas import tpu as pltpu

_HIGHEST = jax.lax.Precision.HIGHEST

TILE_BUDGET_BYTES = 8 << 20     # f32 bytes per (C, TN) feature tile
_MAX_TN = 32768
_VMEM_MARGIN = 8 << 20          # headroom for compiler scratch / semaphores
_VMEM_CAP = 60 << 20            # stay below v7x's 64 MiB physical VMEM


def _round_up(x, m):
    return ((x + m - 1) // m) * m


def _choose_tn(c, n, budget_bytes):
    """Lane tile: multiple of 128, sized so C*TN*4B ≈ budget, clamped to N."""
    tn = (budget_bytes // (4 * c)) // 128 * 128
    tn = max(tn, 128)
    return min(tn, _round_up(n, 128), _MAX_TN)


def _vmem_limit(working_set_bytes):
    return int(min(working_set_bytes + _VMEM_MARGIN, _VMEM_CAP))


# ----------------------------------------------------------------------------
# Kernel 1: streaming per-feature raw sums Σx, Σxxᵀ.
#   grid = (num_splits, tiles_per_split); leading axis "parallel" (one partial
#   sum per TensorCore on v7x), trailing axis "arbitrary" (reduction).
#   Accumulation happens directly in the resident output blocks (no scratch).
# ----------------------------------------------------------------------------
def _wct_stats_kernel(feat_ref, s1_ref, s2_ref, *, n_true, tn, t_split,
                      mask_cols):
    j = pl.program_id(1)

    @pl.when(j == 0)
    def _():
        s1_ref[...] = jnp.zeros_like(s1_ref)
        s2_ref[...] = jnp.zeros_like(s2_ref)

    x = feat_ref[...]                                        # (C, TN) f32
    if mask_cols:
        # Partial last tile and duplicate (clamped) tiles: zero columns >= N.
        tile = pl.program_id(0) * t_split + j                # global tile id
        col = jax.lax.broadcasted_iota(jnp.int32, x.shape, 1) + tile * tn
        x = jnp.where(col < n_true, x, 0.0)

    s1_ref[...] += jnp.sum(x, axis=1, keepdims=True)         # Σ x
    # f32 gram on the MXU (intentionally not bf16: cov feeds an SVD with an
    # absolute 1e-5 eigenvalue threshold — see header note).
    s2_ref[...] += jax.lax.dot_general(
        x, x, dimension_numbers=(((1,), (1,)), ((), ())),
        preferred_element_type=jnp.float32)


def wct_stats(feat, *, tile_budget_bytes=TILE_BUDGET_BYTES):
    """Returns (mean (C,1), cov (C,C)) of feat (C,N), cov = two-sided centered."""
    c, n = feat.shape
    feat = feat.astype(jnp.float32)
    tn = _choose_tn(c, n, tile_budget_bytes)
    tiles = pl.cdiv(n, tn)
    num_splits = 2 if tiles >= 2 else 1        # v7x: one partial sum per TC
    t_split = pl.cdiv(tiles, num_splits)
    mask_cols = (num_splits * t_split * tn) != n

    def feat_map(ci, j):
        # Clamp so an over-hanging split re-reads the last tile (fully masked
        # in-kernel) instead of issuing an out-of-bounds block read.
        return (0, jnp.minimum(ci * t_split + j, tiles - 1))

    working = 2 * c * tn * 4 + 2 * c * c * 4 + 2 * c * 128 * 4
    s1, s2 = pl.pallas_call(
        functools.partial(_wct_stats_kernel, n_true=n, tn=tn,
                          t_split=t_split, mask_cols=mask_cols),
        out_shape=(
            jax.ShapeDtypeStruct((num_splits, c, 1), jnp.float32),
            jax.ShapeDtypeStruct((num_splits, c, c), jnp.float32),
        ),
        grid=(num_splits, t_split),
        in_specs=[pl.BlockSpec((c, tn), feat_map)],
        out_specs=(
            pl.BlockSpec((None, c, 1), lambda ci, j: (ci, 0, 0)),
            pl.BlockSpec((None, c, c), lambda ci, j: (ci, 0, 0)),
        ),
        compiler_params=pltpu.CompilerParams(
            dimension_semantics=("parallel", "arbitrary"),
            vmem_limit_bytes=_vmem_limit(working)),
        cost_estimate=pl.CostEstimate(
            flops=2 * c * c * n + c * n,
            transcendentals=0,
            bytes_accessed=4 * c * n + num_splits * (4 * c * c + 4 * c)),
    )(feat)

    s1 = jnp.sum(s1, axis=0)                    # (C, 1)  Σ x
    s2 = jnp.sum(s2, axis=0)                    # (C, C)  Σ x xᵀ
    nf = jnp.float32(n)
    mean = s1 / nf
    # One-pass cov; accumulators were kept in f32 throughout.
    cov = (s2 - nf * jnp.matmul(mean, mean.T, precision=_HIGHEST)) / (nf - 1.0)
    return mean, cov


# ----------------------------------------------------------------------------
# Kernel 2: fused whitening+coloring apply (grid over N tiles).
#   out_tile = combined_bf16 @ feat_tile_bf16 + bias      (f32 accumulation)
# combined = (s_v diag(s_d) s_vᵀ)(c_v diag(c_d) c_vᵀ), bias = s_mean − op@c_mean
# are precomputed once in plain JAX (tiny C×C work, hoisted out of the N loop).
# ----------------------------------------------------------------------------
def _wct_apply_kernel(op_ref, bias_ref, feat_ref, out_ref):
    x = feat_ref[...].astype(jnp.bfloat16)                  # VPU cast, free slot
    out_ref[...] = (
        jnp.dot(op_ref[...], x, preferred_element_type=jnp.float32)
        + bias_ref[...])                                    # broadcast (C,1)


def wct_apply(op_bf16, bias, feat, *, tile_budget_bytes=TILE_BUDGET_BYTES):
    c, n = feat.shape
    feat = feat.astype(jnp.float32)
    tn = _choose_tn(c, n, tile_budget_bytes)
    tiles = pl.cdiv(n, tn)
    working = 4 * c * tn * 4 + 2 * c * c * 2 + 2 * c * 128 * 4
    return pl.pallas_call(
        _wct_apply_kernel,
        out_shape=jax.ShapeDtypeStruct((c, n), jnp.float32),
        grid=(tiles,),
        in_specs=[
            pl.BlockSpec((c, c), lambda i: (0, 0)),         # combined op (bf16)
            pl.BlockSpec((c, 1), lambda i: (0, 0)),         # folded bias
            pl.BlockSpec((c, tn), lambda i: (0, i)),        # feat tile
        ],
        out_specs=pl.BlockSpec((c, tn), lambda i: (0, i)),
        compiler_params=pltpu.CompilerParams(
            dimension_semantics=("parallel",),
            vmem_limit_bytes=_vmem_limit(working)),
        cost_estimate=pl.CostEstimate(
            flops=2 * c * c * n,
            transcendentals=0,
            bytes_accessed=8 * c * n + 2 * c * c + 4 * c),
    )(op_bf16, bias, feat)


# ----------------------------------------------------------------------------
# __wct_core  (glue: finalize stats, SVD + eigenvalue masking, operator fold)
# ----------------------------------------------------------------------------
@functools.partial(jax.jit, static_argnames=("tile_budget_bytes",))
def wct_core(cont_feat, styl_feat, tile_budget_bytes=TILE_BUDGET_BYTES):
    cont_feat = cont_feat.astype(jnp.float32)
    styl_feat = styl_feat.astype(jnp.float32)
    c = cont_feat.shape[0]

    c_mean, c_cov = wct_stats(cont_feat, tile_budget_bytes=tile_budget_bytes)
    s_mean, s_cov = wct_stats(styl_feat, tile_budget_bytes=tile_budget_bytes)
    c_cov = c_cov + jnp.eye(c, dtype=jnp.float32)           # torch: + iden

    _, c_e, c_vt = jnp.linalg.svd(c_cov, full_matrices=True)
    _, s_e, s_vt = jnp.linalg.svd(s_cov, full_matrices=True)
    c_v, s_v = c_vt.T, s_vt.T

    # torch picks k = 1 + last index with eigval >= 1e-5; singular values are
    # sorted descending, so column truncation == zero-masking the scaled
    # eigenvalues below the threshold.
    c_d = jnp.where(c_e >= 1e-5, jnp.maximum(c_e, 1e-12) ** -0.5, 0.0)
    s_d = jnp.where(s_e >= 1e-5, jnp.maximum(s_e, 1e-12) ** 0.5, 0.0)

    # Tiny C×C operator products (f32, highest precision), hoisted out of the
    # N-tiled kernel; content mean folded into a single bias vector.
    w_op = jnp.matmul(c_v * c_d[None, :], c_v.T, precision=_HIGHEST)
    col_op = jnp.matmul(s_v * s_d[None, :], s_v.T, precision=_HIGHEST)
    combined = jnp.matmul(col_op, w_op, precision=_HIGHEST)
    bias = s_mean - jnp.matmul(combined, c_mean, precision=_HIGHEST)

    return wct_apply(combined.astype(jnp.bfloat16), bias, cont_feat,
                     tile_budget_bytes=tile_budget_bytes)


# ----------------------------------------------------------------------------
# __feature_wct  (empty-segmentation branch)
# ----------------------------------------------------------------------------
def feature_wct(cont_feat, styl_feat):
    # cont_feat: (C, Hc, Wc), styl_feat: (C, Hs, Ws) — torch squeezes batch dim.
    c, h, w = cont_feat.shape
    target = wct_core(cont_feat.reshape(c, -1),
                      styl_feat.reshape(styl_feat.shape[0], -1))
    # torch: .view_as(cont_feat).float().unsqueeze(0) -> (1, C, H, W)
    return target.reshape(c, h, w).astype(jnp.float32)[None]


# ----------------------------------------------------------------------------
# PhotoWCT.transform analogue over synthetic per-level encoder features
# (mirroring e4/d4 ... e1/d1), without the undefined VGG stages.
# ----------------------------------------------------------------------------
def photo_wct_transform(cont_levels, styl_levels):
    return [feature_wct(cF, sF) for cF, sF in zip(cont_levels, styl_levels)]


# ----------------------------------------------------------------------------
# Pure-JAX reference (mirrors torch's two-pass centered computation, f32).
# ----------------------------------------------------------------------------
def _wct_core_ref(cont_feat, styl_feat):
    c, n = cont_feat.shape
    c_mean = jnp.mean(cont_feat, axis=1, keepdims=True)
    c_cent = cont_feat - c_mean
    c_cov = (jnp.matmul(c_cent, c_cent.T, precision=_HIGHEST) / (n - 1)
             + jnp.eye(c, dtype=jnp.float32))
    sc, sn = styl_feat.shape
    s_mean = jnp.mean(styl_feat, axis=1, keepdims=True)
    s_cent = styl_feat - s_mean
    s_cov = jnp.matmul(s_cent, s_cent.T, precision=_HIGHEST) / (sn - 1)
    _, c_e, c_vt = jnp.linalg.svd(c_cov, full_matrices=True)
    _, s_e, s_vt = jnp.linalg.svd(s_cov, full_matrices=True)
    c_v, s_v = c_vt.T, s_vt.T
    c_d = jnp.where(c_e >= 1e-5, jnp.maximum(c_e, 1e-12) ** -0.5, 0.0)
    s_d = jnp.where(s_e >= 1e-5, jnp.maximum(s_e, 1e-12) ** 0.5, 0.0)
    w_op = jnp.matmul(c_v * c_d[None, :], c_v.T, precision=_HIGHEST)
    col_op = jnp.matmul(s_v * s_d[None, :], s_v.T, precision=_HIGHEST)
    whiten = jnp.matmul(w_op, c_cent, precision=_HIGHEST)
    return jnp.matmul(col_op, whiten, precision=_HIGHEST) + s_mean


if __name__ == "__main__":
    key = jax.random.PRNGKey(0)
    # Small, deterministic synthetic encoder features (C, H, W); includes a
    # level whose flattened N (=144) is not a multiple of 128 to exercise the
    # partial-block / masking paths.
    level_shapes_content = [(32, 16, 16), (32, 16, 16), (16, 16, 16),
                            (8, 16, 16), (8, 12, 12)]
    level_shapes_style = [(32, 12, 12), (32, 12, 12), (16, 12, 12),
                          (8, 12, 12), (8, 10, 10)]

    cont_levels, styl_levels = [], []
    for cs, ss in zip(level_shapes_content, level_shapes_style):
        kc, ks, key = jax.random.split(key, 3)
        cont_levels.append(jax.random.normal(kc, cs, dtype=jnp.float32))
        styl_levels.append(jax.random.normal(ks, ss, dtype=jnp.float32))

    outs = photo_wct_transform(cont_levels, styl_levels)
    outs = [jax.block_until_ready(o) for o in outs]

    for o, cF, sF, cs in zip(outs, cont_levels, styl_levels,
                             level_shapes_content):
        assert o.shape == (1,) + cs, (o.shape, cs)
        assert bool(jnp.all(jnp.isfinite(o)))
        c = cs[0]
        cflat = cF.reshape(c, -1)
        sflat = sF.reshape(sF.shape[0], -1)

        # (1) streaming stats kernel vs two-pass jnp reference (f32, tight).
        mean_k, cov_k = wct_stats(cflat)
        mean_r = jnp.mean(cflat, axis=1, keepdims=True)
        cent = cflat - mean_r
        cov_r = (jnp.matmul(cent, cent.T, precision=_HIGHEST)
                 / (cflat.shape[1] - 1))
        assert float(jnp.max(jnp.abs(mean_k - mean_r))) < 1e-4
        assert float(jnp.max(jnp.abs(cov_k - cov_r))) < 1e-3

        # (1b) multi-tile + dual-partial-sum path (forced tiny tile budget).
        mean_s, cov_s = wct_stats(cflat, tile_budget_bytes=4096)
        assert float(jnp.max(jnp.abs(mean_s - mean_r))) < 1e-4
        assert float(jnp.max(jnp.abs(cov_s - cov_r))) < 1e-3

        # (2) end-to-end vs torch-mirroring f32 reference (bf16 MXU apply =>
        # loose tolerance).
        ref = _wct_core_ref(cflat, sflat).reshape(cs)[None]
        abs_err = float(jnp.max(jnp.abs(o - ref)))
        rel_err = float(jnp.linalg.norm(o - ref) / jnp.linalg.norm(ref))
        assert abs_err < 0.3, f"max abs err {abs_err} vs reference"
        assert rel_err < 0.05, f"rel Frobenius err {rel_err} vs reference"

    # (3) multi-tile apply path (tiny tile budget) stays consistent with the
    # default-tiling result.
    cflat = cont_levels[-1].reshape(level_shapes_content[-1][0], -1)
    sflat = styl_levels[-1].reshape(level_shapes_style[-1][0], -1)
    out_small = wct_core(cflat, sflat, tile_budget_bytes=4096)
    out_big = wct_core(cflat, sflat)
    assert float(jnp.max(jnp.abs(out_small - out_big))) < 5e-2

    print("KERNEL_OK")
</pallas_src>

<mosaic_0001>
module attributes {stable_mosaic.version = 11 : i64} {
  func.func @_wct_stats_kernel(%arg0: i32, %arg1: i32, %arg2: memref<32x256xf32, #tpu.memory_space<vmem>>, %arg3: memref<1x32x1xf32, #tpu.memory_space<vmem>>, %arg4: memref<1x32x32xf32, #tpu.memory_space<vmem>>) attributes {dimension_semantics = [#tpu.dimension_semantics<parallel>, #tpu.dimension_semantics<arbitrary>], iteration_bounds = array<i64: 1, 1>, scalar_prefetch = 0 : i64, scratch_operands = 0 : i64, tpu.core_type = #tpu.core_type<tc>, window_params = [{transform_indices = @transform_0, window_bounds = array<i64: 32, 256>}, {transform_indices = @transform_1, window_bounds = array<i64: 1, 32, 1>}, {transform_indices = @transform_2, window_bounds = array<i64: 1, 32, 32>}]} {
    %c0_i32 = arith.constant 0 : i32
    %0 = arith.cmpi eq, %arg1, %c0_i32 : i32
    %1 = arith.extui %0 : i1 to i32
    %c0_i32_0 = arith.constant 0 : i32
    %2 = arith.cmpi ne, %1, %c0_i32_0 : i32
    scf.if %2 {
      %cst_15 = arith.constant 0.000000e+00 : f32
      %19 = vector.broadcast %cst_15 : f32 to vector<32x1xf32>
      %c0_16 = arith.constant 0 : index
      %c0_17 = arith.constant 0 : index
      %c0_18 = arith.constant 0 : index
      %20 = vector.load %arg3[%c0_16, %c0_17, %c0_18] : memref<1x32x1xf32, #tpu.memory_space<vmem>>, vector<1x32x1xf32>
      %21 = vector.shape_cast %20 : vector<1x32x1xf32> to vector<32x1xf32>
      %22 = vector.shape_cast %19 : vector<32x1xf32> to vector<1x32x1xf32>
      tpu.vector_store %arg3[%c0_16, %c0_17, %c0_18], %22 {strides = array<i32>} : memref<1x32x1xf32, #tpu.memory_space<vmem>>, vector<1x32x1xf32>,
      %cst_19 = arith.constant 0.000000e+00 : f32
      %23 = vector.broadcast %cst_19 : f32 to vector<32x32xf32>
      %c0_20 = arith.constant 0 : index
      %c0_21 = arith.constant 0 : index
      %c0_22 = arith.constant 0 : index
      %24 = vector.load %arg4[%c0_20, %c0_21, %c0_22] : memref<1x32x32xf32, #tpu.memory_space<vmem>>, vector<1x32x32xf32>
      %25 = vector.shape_cast %24 : vector<1x32x32xf32> to vector<32x32xf32>
      %26 = vector.shape_cast %23 : vector<32x32xf32> to vector<1x32x32xf32>
      tpu.vector_store %arg4[%c0_20, %c0_21, %c0_22], %26 {strides = array<i32>} : memref<1x32x32xf32, #tpu.memory_space<vmem>>, vector<1x32x32xf32>,
    } else {
    }
    %c0 = arith.constant 0 : index
    %c0_1 = arith.constant 0 : index
    %3 = vector.load %arg2[%c0, %c0_1] : memref<32x256xf32, #tpu.memory_space<vmem>>, vector<32x256xf32>
    %c0_2 = arith.constant 0 : index
    %c0_3 = arith.constant 0 : index
    %c0_4 = arith.constant 0 : index
    %4 = vector.load %arg3[%c0_2, %c0_3, %c0_4] : memref<1x32x1xf32, #tpu.memory_space<vmem>>, vector<1x32x1xf32>
    %5 = vector.shape_cast %4 : vector<1x32x1xf32> to vector<32x1xf32>
    %cst = arith.constant dense<0.000000e+00> : vector<32xf32>
    %6 = vector.multi_reduction <add>, %3, %cst [1] : vector<32x256xf32> to vector<32xf32>
    %7 = vector.shape_cast %6 : vector<32xf32> to vector<32x1xf32>
    %8 = arith.addf %5, %7 : vector<32x1xf32>
    %c0_5 = arith.constant 0 : index
    %c0_6 = arith.constant 0 : index
    %c0_7 = arith.constant 0 : index
    %9 = vector.load %arg3[%c0_5, %c0_6, %c0_7] : memref<1x32x1xf32, #tpu.memory_space<vmem>>, vector<1x32x1xf32>
    %10 = vector.shape_cast %9 : vector<1x32x1xf32> to vector<32x1xf32>
    %11 = vector.shape_cast %8 : vector<32x1xf32> to vector<1x32x1xf32>
    tpu.vector_store %arg3[%c0_5, %c0_6, %c0_7], %11 {strides = array<i32>} : memref<1x32x1xf32, #tpu.memory_space<vmem>>, vector<1x32x1xf32>,
    %c0_8 = arith.constant 0 : index
    %c0_9 = arith.constant 0 : index
    %c0_10 = arith.constant 0 : index
    %12 = vector.load %arg4[%c0_8, %c0_9, %c0_10] : memref<1x32x32xf32, #tpu.memory_space<vmem>>, vector<1x32x32xf32>
    %13 = vector.shape_cast %12 : vector<1x32x32xf32> to vector<32x32xf32>
    %cst_11 = arith.constant dense<0.000000e+00> : vector<32x32xf32>
    %14 = tpu.matmul %3, %3, %cst_11 {dimension_numbers = #tpu.dot_dimension_numbers<[1], [1], [0], [0], [0, 0, 1, 0], [], []>} : vector<32x256xf32>, vector<32x256xf32>, vector<32x32xf32> -> vector<32x32xf32>
    %15 = arith.addf %13, %14 : vector<32x32xf32>
    %c0_12 = arith.constant 0 : index
    %c0_13 = arith.constant 0 : index
    %c0_14 = arith.constant 0 : index
    %16 = vector.load %arg4[%c0_12, %c0_13, %c0_14] : memref<1x32x32xf32, #tpu.memory_space<vmem>>, vector<1x32x32xf32>
    %17 = vector.shape_cast %16 : vector<1x32x32xf32> to vector<32x32xf32>
    %18 = vector.shape_cast %15 : vector<32x32xf32> to vector<1x32x32xf32>
    tpu.vector_store %arg4[%c0_12, %c0_13, %c0_14], %18 {strides = array<i32>} : memref<1x32x32xf32, #tpu.memory_space<vmem>>, vector<1x32x32xf32>,
    return
  }
  func.func @transform_0(%arg0: i32, %arg1: i32) -> (i32, i32) {
    %c1_i32 = arith.constant 1 : i32
    %0 = arith.muli %arg0, %c1_i32 : i32
    %1 = arith.addi %0, %arg1 : i32
    %c0_i32 = arith.constant 0 : i32
    %2 = arith.minsi %1, %c0_i32 : i32
    %c0_i32_0 = arith.constant 0 : i32
    %c0_i32_1 = arith.constant 0 : i32
    return %c0_i32_0, %2 : i32, i32
  }
  func.func @transform_1(%arg0: i32, %arg1: i32) -> (i32, i32, i32) {
    %c0_i32 = arith.constant 0 : i32
    %c0_i32_0 = arith.constant 0 : i32
    %c0_i32_1 = arith.constant 0 : i32
    return %arg0, %c0_i32, %c0_i32_0 : i32, i32, i32
  }
  func.func @transform_2(%arg0: i32, %arg1: i32) -> (i32, i32, i32) {
    %c0_i32 = arith.constant 0 : i32
    %c0_i32_0 = arith.constant 0 : i32
    %c0_i32_1 = arith.constant 0 : i32
    return %arg0, %c0_i32, %c0_i32_0 : i32, i32, i32
  }
}

module attributes {stable_mosaic.version = 11 : i64} {
  func.func @_wct_stats_kernel(%arg0: i32, %arg1: i32, %arg2: memref<32x256xf32, #tpu.memory_space<vmem>>, %arg3: memref<1x32x1xf32, #tpu.memory_space<vmem>>, %arg4: memref<1x32x32xf32, #tpu.memory_space<vmem>>) attributes {dimension_semantics = [#tpu.dimension_semantics<parallel>, #tpu.dimension_semantics<arbitrary>], iteration_bounds = array<i64: 1, 1>, scalar_prefetch = 0 : i64, scratch_operands = 0 : i64, tpu.core_type = #tpu.core_type<tc>, window_params = [{transform_indices = @transform_0, window_bounds = array<i64: 32, 256>}, {transform_indices = @transform_1, window_bounds = array<i64: 1, 32, 1>}, {transform_indices = @transform_2, window_bounds = array<i64: 1, 32, 32>}]} {
    %c0_i32 = arith.constant 0 : i32
    %0 = arith.cmpi eq, %arg1, %c0_i32 : i32
    %1 = arith.extui %0 : i1 to i32
    %c0_i32_0 = arith.constant 0 : i32
    %2 = arith.cmpi ne, %1, %c0_i32_0 : i32
    scf.if %2 {
      %cst_16 = arith.constant 0.000000e+00 : f32
      %29 = vector.broadcast %cst_16 : f32 to vector<32x1xf32>
      %c0_17 = arith.constant 0 : index
      %c0_18 = arith.constant 0 : index
      %c0_19 = arith.constant 0 : index
      %30 = vector.load %arg3[%c0_17, %c0_18, %c0_19] : memref<1x32x1xf32, #tpu.memory_space<vmem>>, vector<1x32x1xf32>
      %31 = vector.shape_cast %30 : vector<1x32x1xf32> to vector<32x1xf32>
      %32 = vector.shape_cast %29 : vector<32x1xf32> to vector<1x32x1xf32>
      tpu.vector_store %arg3[%c0_17, %c0_18, %c0_19], %32 {strides = array<i32>} : memref<1x32x1xf32, #tpu.memory_space<vmem>>, vector<1x32x1xf32>,
      %cst_20 = arith.constant 0.000000e+00 : f32
      %33 = vector.broadcast %cst_20 : f32 to vector<32x32xf32>
      %c0_21 = arith.constant 0 : index
      %c0_22 = arith.constant 0 : index
      %c0_23 = arith.constant 0 : index
      %34 = vector.load %arg4[%c0_21, %c0_22, %c0_23] : memref<1x32x32xf32, #tpu.memory_space<vmem>>, vector<1x32x32xf32>
      %35 = vector.shape_cast %34 : vector<1x32x32xf32> to vector<32x32xf32>
      %36 = vector.shape_cast %33 : vector<32x32xf32> to vector<1x32x32xf32>
      tpu.vector_store %arg4[%c0_21, %c0_22, %c0_23], %36 {strides = array<i32>} : memref<1x32x32xf32, #tpu.memory_space<vmem>>, vector<1x32x32xf32>,
    } else {
    }
    %c0 = arith.constant 0 : index
    %c0_1 = arith.constant 0 : index
    %3 = vector.load %arg2[%c0, %c0_1] : memref<32x256xf32, #tpu.memory_space<vmem>>, vector<32x256xf32>
    %c1_i32 = arith.constant 1 : i32
    %4 = arith.muli %arg0, %c1_i32 : i32
    %5 = arith.addi %4, %arg1 : i32
    %6 = tpu.iota {dimensions = array<i32: 1>} : vector<32x256xi32>
    %c256_i32 = arith.constant 256 : i32
    %7 = arith.muli %5, %c256_i32 : i32
    %8 = vector.broadcast %7 : i32 to vector<32x256xi32>
    %9 = arith.addi %6, %8 : vector<32x256xi32>
    %c144_i32 = arith.constant 144 : i32
    %10 = vector.broadcast %c144_i32 : i32 to vector<32x256xi32>
    %11 = arith.cmpi slt, %9, %10 : vector<32x256xi32>
    %cst = arith.constant 0.000000e+00 : f32
    %12 = vector.broadcast %cst : f32 to vector<32x256xf32>
    %13 = arith.select %11, %3, %12 : vector<32x256xi1>, vector<32x256xf32>
    %c0_2 = arith.constant 0 : index
    %c0_3 = arith.constant 0 : index
    %c0_4 = arith.constant 0 : index
    %14 = vector.load %arg3[%c0_2, %c0_3, %c0_4] : memref<1x32x1xf32, #tpu.memory_space<vmem>>, vector<1x32x1xf32>
    %15 = vector.shape_cast %14 : vector<1x32x1xf32> to vector<32x1xf32>
    %cst_5 = arith.constant dense<0.000000e+00> : vector<32xf32>
    %16 = vector.multi_reduction <add>, %13, %cst_5 [1] : vector<32x256xf32> to vector<32xf32>
    %17 = vector.shape_cast %16 : vector<32xf32> to vector<32x1xf32>
    %18 = arith.addf %15, %17 : vector<32x1xf32>
    %c0_6 = arith.constant 0 : index
    %c0_7 = arith.constant 0 : index
    %c0_8 = arith.constant 0 : index
    %19 = vector.load %arg3[%c0_6, %c0_7, %c0_8] : memref<1x32x1xf32, #tpu.memory_space<vmem>>, vector<1x32x1xf32>
    %20 = vector.shape_cast %19 : vector<1x32x1xf32> to vector<32x1xf32>
    %21 = vector.shape_cast %18 : vector<32x1xf32> to vector<1x32x1xf32>
    tpu.vector_store %arg3[%c0_6, %c0_7, %c0_8], %21 {strides = array<i32>} : memref<1x32x1xf32, #tpu.memory_space<vmem>>, vector<1x32x1xf32>,
    %c0_9 = arith.constant 0 : index
    %c0_10 = arith.constant 0 : index
    %c0_11 = arith.constant 0 : index
    %22 = vector.load %arg4[%c0_9, %c0_10, %c0_11] : memref<1x32x32xf32, #tpu.memory_space<vmem>>, vector<1x32x32xf32>
    %23 = vector.shape_cast %22 : vector<1x32x32xf32> to vector<32x32xf32>
    %cst_12 = arith.constant dense<0.000000e+00> : vector<32x32xf32>
    %24 = tpu.matmul %13, %13, %cst_12 {dimension_numbers = #tpu.dot_dimension_numbers<[1], [1], [0], [0], [0, 0, 1, 0], [], []>} : vector<32x256xf32>, vector<32x256xf32>, vector<32x32xf32> -> vector<32x32xf32>
    %25 = arith.addf %23, %24 : vector<32x32xf32>
    %c0_13 = arith.constant 0 : index
    %c0_14 = arith.constant 0 : index
    %c0_15 = arith.constant 0 : index
    %26 = vector.load %arg4[%c0_13, %c0_14, %c0_15] : memref<1x32x32xf32, #tpu.memory_space<vmem>>, vector<1x32x32xf32>
    %27 = vector.shape_cast %26 : vector<1x32x32xf32> to vector<32x32xf32>
    %28 = vector.shape_cast %25 : vector<32x32xf32> to vector<1x32x32xf32>
    tpu.vector_store %arg4[%c0_13, %c0_14, %c0_15], %28 {strides = array<i32>} : memref<1x32x32xf32, #tpu.memory_space<vmem>>, vector<1x32x32xf32>,
    return
  }
  func.func @transform_0(%arg0: i32, %arg1: i32) -> (i32, i32) {
    %c1_i32 = arith.constant 1 : i32
    %0 = arith.muli %arg0, %c1_i32 : i32
    %1 = arith.addi %0, %arg1 : i32
    %c0_i32 = arith.constant 0 : i32
    %2 = arith.minsi %1, %c0_i32 : i32
    %c0_i32_0 = arith.constant 0 : i32
    %c0_i32_1 = arith.constant 0 : i32
    return %c0_i32_0, %2 : i32, i32
  }
  func.func @transform_1(%arg0: i32, %arg1: i32) -> (i32, i32, i32) {
    %c0_i32 = arith.constant 0 : i32
    %c0_i32_0 = arith.constant 0 : i32
    %c0_i32_1 = arith.constant 0 : i32
    return %arg0, %c0_i32, %c0_i32_0 : i32, i32, i32
  }
  func.func @transform_2(%arg0: i32, %arg1: i32) -> (i32, i32, i32) {
    %c0_i32 = arith.constant 0 : i32
    %c0_i32_0 = arith.constant 0 : i32
    %c0_i32_1 = arith.constant 0 : i32
    return %arg0, %c0_i32, %c0_i32_0 : i32, i32, i32
  }
}

module attributes {stable_mosaic.version = 11 : i64} {
  func.func @_wct_apply_kernel(%arg0: i32, %arg1: memref<32x32xbf16, #tpu.memory_space<vmem>>, %arg2: memref<32x1xf32, #tpu.memory_space<vmem>>, %arg3: memref<32x256xf32, #tpu.memory_space<vmem>>, %arg4: memref<32x256xf32, #tpu.memory_space<vmem>>) attributes {dimension_semantics = [#tpu.dimension_semantics<parallel>], iteration_bounds = array<i64: 1>, scalar_prefetch = 0 : i64, scratch_operands = 0 : i64, tpu.core_type = #tpu.core_type<tc>, window_params = [{pipeline_mode = #tpu.pipeline_mode<synchronous>, transform_indices = @transform_0, window_bounds = array<i64: 32, 32>}, {pipeline_mode = #tpu.pipeline_mode<synchronous>, transform_indices = @transform_1, window_bounds = array<i64: 32, 1>}, {transform_indices = @transform_2, window_bounds = array<i64: 32, 256>}, {transform_indices = @transform_3, window_bounds = array<i64: 32, 256>}]} {
    %c0 = arith.constant 0 : index
    %c0_0 = arith.constant 0 : index
    %0 = vector.load %arg3[%c0, %c0_0] : memref<32x256xf32, #tpu.memory_space<vmem>>, vector<32x256xf32>
    %1 = arith.truncf %0 : vector<32x256xf32> to vector<32x256xbf16>
    %c0_1 = arith.constant 0 : index
    %c0_2 = arith.constant 0 : index
    %2 = vector.load %arg1[%c0_1, %c0_2] : memref<32x32xbf16, #tpu.memory_space<vmem>>, vector<32x32xbf16>
    %cst = arith.constant dense<0.000000e+00> : vector<32x256xf32>
    %3 = tpu.matmul %2, %1, %cst {dimension_numbers = #tpu.dot_dimension_numbers<[1], [0], [0], [1], [0, 0, 1, 1], [], []>} : vector<32x32xbf16>, vector<32x256xbf16>, vector<32x256xf32> -> vector<32x256xf32>
    %c0_3 = arith.constant 0 : index
    %c0_4 = arith.constant 0 : index
    %4 = vector.load %arg2[%c0_3, %c0_4] : memref<32x1xf32, #tpu.memory_space<vmem>>, vector<32x1xf32>
    %5 = vector.broadcast %4 : vector<32x1xf32> to vector<32x256xf32>
    %6 = arith.addf %3, %5 : vector<32x256xf32>
    %c0_5 = arith.constant 0 : index
    %c0_6 = arith.constant 0 : index
    %7 = vector.load %arg4[%c0_5, %c0_6] : memref<32x256xf32, #tpu.memory_space<vmem>>, vector<32x256xf32>
    tpu.vector_store %arg4[%c0_5, %c0_6], %6 {strides = array<i32>} : memref<32x256xf32, #tpu.memory_space<vmem>>, vector<32x256xf32>,
    return
  }
  func.func @transform_0(%arg0: i32) -> (i32, i32) {
    %c0_i32 = arith.constant 0 : i32
    %c0_i32_0 = arith.constant 0 : i32
    %c0_i32_1 = arith.constant 0 : i32
    return %c0_i32, %c0_i32_0 : i32, i32
  }
  func.func @transform_1(%arg0: i32) -> (i32, i32) {
    %c0_i32 = arith.constant 0 : i32
    %c0_i32_0 = arith.constant 0 : i32
    %c0_i32_1 = arith.constant 0 : i32
    return %c0_i32, %c0_i32_0 : i32, i32
  }
  func.func @transform_2(%arg0: i32) -> (i32, i32) {
    %c0_i32 = arith.constant 0 : i32
    %c0_i32_0 = arith.constant 0 : i32
    return %c0_i32, %arg0 : i32, i32
  }
  func.func @transform_3(%arg0: i32) -> (i32, i32) {
    %c0_i32 = arith.constant 0 : i32
    %c0_i32_0 = arith.constant 0 : i32
    return %c0_i32, %arg0 : i32, i32
  }
}

</mosaic_0001>

<bundles_post_ra>
// kernel: custom-call.86
= control target key start
LH: loop header
LB: loop body
LE: loop exit
PB: predicated region body
PF: predicated region fallthrough
CT: control target
= control target key end

     0   :  { %v1009_v8 = vmov 0.0   ;;  %s1050_s25 = smov 0   ;;  %s1398_s0 = inlined_call_operand.vmem [shape: f32[64,32], index: 0, kind: input, shape index: {}]   ;;  %s1399_s1 = inlined_call_operand.vmem [shape: f32[64,32], index: 1, kind: output, shape index: {0}]   ;;  %s1400_s2 = inlined_call_operand.vmem [shape: f32[32], index: 2, kind: output, shape index: {1}]  }
   0x1   :  { %v46_v0 = vld [vmem:[%s1398_s0] sm:$0xff]  ;;  %v48_v1 = vld [vmem:[%s1398_s0 + $0x8] sm:$0xff]  ;;  %v50_v2 = vld [vmem:[%s1398_s0 + $0x10] sm:$0xff]  ;;  %95 = vst [vmem:[#allocation2] sm:$0x1] %v1009_v8 }
   0x2   :  { %v52_v3 = vld [vmem:[%s1398_s0 + $0x18] sm:$0xff]  ;;  %66 = vst [vmem:[#allocation1] sm:$0xff] %v46_v0  ;;  %v54_v4 = vld [vmem:[%s1398_s0 + $0x20] sm:$0xff]  ;;  %v56_v5 = vld [vmem:[%s1398_s0 + $0x28] sm:$0xff] }
   0x3   :  { %70 = vst [vmem:[#allocation1 + $0x8] sm:$0xff] %v48_v1  ;;  %v58_v6 = vld [vmem:[%s1398_s0 + $0x30] sm:$0xff]  ;;  %v60_v7 = vld [vmem:[%s1398_s0 + $0x38] sm:$0xff] }
   0x4   :  { %74 = vst [vmem:[#allocation1 + $0x10] sm:$0xff] %v50_v2 }
   0x5   :  { %78 = vst [vmem:[#allocation1 + $0x18] sm:$0xff] %v52_v3 }
   0x6   :  { %82 = vst [vmem:[#allocation1 + $0x20] sm:$0xff] %v54_v4 }
   0x7   :  { %86 = vst [vmem:[#allocation1 + $0x28] sm:$0xff] %v56_v5 }
   0x8   :  { %90 = vst [vmem:[#allocation1 + $0x30] sm:$0xff] %v58_v6 }
   0x9   :  { %94 = vst [vmem:[#allocation1 + $0x38] sm:$0xff] %v60_v7 }
   0xa LB: > { %v103_v9 = vlaneseq  ;;  %v102_v10 = vld [vmem:[#allocation1] sm:$0xff]  ;;  %v1059_v12 = vstv %s1007_s25  ;;  %v111_v13 = vld [vmem:[#allocation1 + $0x8] sm:$0xff]  ;;  %s205_s0 = scalar_lea.vmem [#allocation1], %s1007_s25  ;;  %s1105_s26 = smov [#allocation1]  ;;  %s1007_s25 = sphi %s1050_s25, %s101_s25  }
   0xb   : > { %v121_v15 = vld [vmem:[#allocation1 + $0x10] sm:$0xff]  ;;  %s550_s27 = scalar_lea.vmem [#allocation4], %s1007_s25  ;;  %s1207_s28 = smov [#allocation1] }
   0xc   : > { %v1056_v11 = vshrl.u32 %v103_v9, 7  ;;  %v131_v17 = vld [vmem:[#allocation1 + $0x18] sm:$0xff]  ;;  %s1211_s29 = smov [#allocation4] }
   0xd   : > { %v141_v24 = vld [vmem:[#allocation1 + $0x20] sm:$0xff] }
   0xe   : > { %vm107_vm0 = vcmp.gt.s32.totalorder %v1056_v11, %v1059_v12  ;;  %v114_v14 = vadd.s32 8, %v1056_v11  ;;  %v124_v16 = vadd.s32 16, %v1056_v11  ;;  %v134_v18 = vadd.s32 24, %v1056_v11  ;;  %v151_v30 = vld [vmem:[#allocation1 + $0x28] sm:$0xff] }
   0xf   : > { %v108_v19 = vsel %vm107_vm0, %v102_v10, 0.0  ;;  %v144_v20 = vadd.s32 32, %v1056_v11  ;;  %v154_v21 = vadd.s32 40, %v1056_v11  ;;  %v164_v22 = vadd.s32 48, %v1056_v11  ;;  %v161_v35 = vld [vmem:[#allocation1 + $0x30] sm:$0xff] }
  0x10   : > { %v109_v23 = vmul.f32 %v108_v19, %v108_v19  ;;  %vm116_vm1 = vcmp.gt.s32.totalorder %v114_v14, %v1059_v12  ;;  %vm126_vm2 = vcmp.gt.s32.totalorder %v124_v16, %v1059_v12  ;;  %vm136_vm3 = vcmp.gt.s32.totalorder %v134_v18, %v1059_v12  ;;  %v171_v39 = vld [vmem:[#allocation1 + $0x38] sm:$0xff]  ;;  %v1082_v60 = vld [vmem:[%s205_s0] ss:$0 sm:$0xff] }
  0x11   : > { %v117_v25 = vsel %vm116_vm1, %v111_v13, 0.0  ;;  %v127_v26 = vsel %vm126_vm2, %v121_v15, 0.0  ;;  %v137_v27 = vsel %vm136_vm3, %v131_v17, 0.0  ;;  %vm146_vm4 = vcmp.gt.s32.totalorder %v144_v20, %v1059_v12 }
  0x12   : > { %v118_v28 = vmul.f32 %v117_v25, %v117_v25  ;;  %v128_v29 = vmul.f32 %v127_v26, %v127_v26  ;;  %v147_v31 = vsel %vm146_vm4, %v141_v24, 0.0  ;;  %vm156_vm5 = vcmp.gt.s32.totalorder %v154_v21, %v1059_v12 }
  0x13   : > { %v174_v32 = vadd.s32 56, %v1056_v11  ;;  %v138_v34 = vmul.f32 %v137_v27, %v137_v27  ;;  %vm166_vm6 = vcmp.gt.s32.totalorder %v164_v22, %v1059_v12  ;;  %v157_v36 = vsel %vm156_vm5, %v151_v30, 0.0 }
  0x14   : > { %v119_v33 = vadd.f32 %v118_v28, %v109_v23  ;;  %v148_v38 = vmul.f32 %v147_v31, %v147_v31  ;;  %v167_v40 = vsel %vm166_vm6, %v161_v35, 0.0  ;;  %v158_v42 = vmul.f32 %v157_v36, %v157_v36 }
  0x15   : > { %vm176_vm7 = vcmp.gt.s32.totalorder %v174_v32, %v1059_v12  ;;  %v168_v45 = vmul.f32 %v167_v40, %v167_v40  ;;  %v207_v63 = vand.u32 2147483647, %v1082_v60  ;;  %vm276_vm1 = vcmp.lt.f32.partialorder %v1082_v60, 0.0 }
  0x16   : > { %v129_v37 = vadd.f32 %v128_v29, %v119_v33  ;;  %v179_v43 = vsel %vm176_vm7, %v171_v39, 0.0  ;;  %v301_v11 = vmov %v1056_v11 }
  0x17   : > { %v180_v47 = vmul.f32 %v179_v43, %v179_v43  ;;  %v208_v3 = vmax.f32 %v207_v63, 0.0  ;;  %vm305_vm5 = vcmp.gt.s32.totalorder %v301_v11, %v1059_v12 }
  0x18   : > { %v139_v41 = vadd.f32 %v138_v34, %v129_v37 }
  0x1a   : > { %v149_v44 = vadd.f32 %v148_v38, %v139_v41 }
  0x1c   : > { %v159_v46 = vadd.f32 %v158_v42, %v149_v44  ;;  %v364_v44 = vadd.s32 16, %v301_v11 }
  0x1e   : > { %v169_v48 = vadd.f32 %v168_v45, %v159_v46  ;;  %vm366_vm2 = vcmp.gt.s32.totalorder %v364_v44, %v1059_v12 }
  0x20   : > { %v181_v49 = vadd.f32 %v180_v47, %v169_v48  ;;  %v426_v47 = vadd.s32 32, %v301_v11  ;;  %v395_v48 = vadd.s32 24, %v301_v11 }
  0x22   : > { %v182_v50 = vrot.slane %v181_v49, 4  ;;  %vm428_vm6 = vcmp.gt.s32.totalorder %v426_v47, %v1059_v12  ;;  %vm397_vm7 = vcmp.gt.s32.totalorder %v395_v48, %v1059_v12 }
  0x24   : > { %v183_v51 = vadd.f32 %v182_v50, %v181_v49  ;;  %v333_v50 = vadd.s32 8, %v301_v11 }
  0x26   : > { %v184_v52 = vrot.slane %v183_v51, 2 }
  0x28   : > { %v185_v53 = vadd.f32 %v184_v52, %v183_v51  ;;  %v457_v51 = vadd.s32 40, %v301_v11 }
  0x2a   : > { %v186_v54 = vrot.slane %v185_v53, 1 }
  0x2c   : > { %v1077_v55 = vadd.f32 %v186_v54, %v185_v53  ;;  %v940_v54 = vld [vmem:[%s1105_s26 + $0x10] sm:$0xff] }
  0x2e   : > { %991 = vrsqrt.f32 %v1077_v55  ;;  %vm195_vm8 = vcmp.eq.f32.partialorder %v1077_v55, inf  ;;  %v198_v0 = vand.u32 2147483648, %v1077_v55  ;;  %vm197_vm9 = vcmp.eq.f32.partialorder %v1077_v55, 0.0 }
  0x34   : > { %v992_v56 = vpop.eup %991 }
  0x35   : > { %v189_v57 = vmul.f32 %v992_v56, %v1077_v55 }
  0x37   : > { %v190_v58 = vmul.f32 %v992_v56, %v189_v57  ;;  %v302_v57 = vld [vmem:[%s1105_s26] sm:$0xff] }
  0x39   : > { %v191_v59 = vmul.f32 0.5, %v190_v58 }
  0x3b   : > { %v192_v61 = vsub.f32 1.5, %v191_v59 }
  0x3d   : > { %v193_v62 = vmul.f32 %v992_v56, %v192_v61  ;;  %v1110_v56 = vand.u32 127, %v103_v9  ;;  %v942_v61 = vld [vmem:[%s1105_s26 + $0x20] sm:$0xff] }
  0x3f   : > { %v194_v1 = vmul.f32 %v193_v62, %v1077_v55  ;;  %v941_v62 = vld [vmem:[%s1105_s26 + $0x18] sm:$0xff] }
  0x41   : > { %v196_v2 = vsel %vm195_vm8, %v1077_v55, %v194_v1  ;;  %v367_v1 = vsel %vm366_vm2, %v940_v54, 0.0 }
  0x42   : > { %v199_v4 = vsel %vm197_vm9, %v198_v0, %v196_v2  ;;  %v939_v2 = vld [vmem:[%s1105_s26 + $0x8] sm:$0xff] }
  0x43   : > { %v209_v5 = vand.u32 2147483647, %v199_v4 }
  0x45   : > { %v210_v6 = vmax.f32 %v208_v3, %v209_v5 }
  0x47   : > { %993 = vrcp.f32 %v210_v6  ;;  %v222_v10 = vand.u32 2147483648, %v210_v6  ;;  %vm216_vm10 = vweird.f32 %v210_v6  ;;  %v220_v14 = vand.u32 2147483647, %v210_v6 }
  0x48   : > { %vm261_vm0 = vcmp.eq.f32.partialorder %v210_v6, 0.0 }
  0x49   : > { %v223_v16 = vor.u32 1.1754944e-38, %v222_v10  ;;  %vm221_vm13 = vcmp.eq.f32.partialorder %v220_v14, 8.507059e+37  ;;  %v398_v10 = vsel %vm397_vm7, %v941_v62, 0.0 }
  0x4d   : > { %v994_v7 = vpop.eup %993 }
  0x4e   : > { %v212_v8 = vmul.f32 %v994_v7, %v210_v6  ;;  %vm217_vm11 = vweird.f32 %v994_v7 }
  0x4f   : > { %vm218_vm12 = vmor %vm216_vm10, %vm217_vm11  ;;  %vm335_vm10 = vcmp.gt.s32.totalorder %v333_v50, %v1059_v12 }
  0x50   : > { %v213_v13 = vsub.f32 1.0, %v212_v8  ;;  %v429_v8 = vsel %vm428_vm6, %v942_v61, 0.0  ;;  %vm1243_vm6 = vcmp.gt.s32.totalorder %v1110_v56, %v1059_v12 }
  0x52   : > { %v214_v15 = vmul.f32 %v994_v7, %v213_v13 }
  0x54   : > { %v215_v17 = vadd.f32 %v994_v7, %v214_v15  ;;  %v336_v15 = vsel %vm335_vm10, %v939_v2, 0.0 }
  0x56   : > { %v219_v18 = vsel %vm218_vm12, %v994_v7, %v215_v17  ;;  %vm459_vm12 = vcmp.gt.s32.totalorder %v457_v51, %v1059_v12 }
  0x57   : > { %v224_v19 = vsel %vm221_vm13, %v223_v16, %v219_v18  ;;  %vm1136_vm13 = vcmp.eq.s32.totalorder %v1110_v56, %v1059_v12  ;;  %v488_v16 = vadd.s32 48, %v301_v11 }
  0x58   : > { %v225_v20 = vmul.f32 %v224_v19, %v207_v63  ;;  %v241_v21 = vmul.f32 0.0, %v224_v19  ;;  %v258_v22 = vmul.f32 %v224_v19, %v209_v5  ;;  %v519_v63 = vadd.s32 56, %v301_v11 }
  0x59   : > { %v306_v5 = vsel %vm305_vm5, %v302_v57, 0.0  ;;  %v570_v11 = vmov %v1056_v11 }
  0x5a   : > { %v226_v23 = vmul.f32 %v225_v20, %v225_v20  ;;  %v242_v24 = vmul.f32 %v241_v21, %v241_v21  ;;  %v259_v25 = vmul.f32 %v258_v22, %v258_v22 }
  0x5c   : > { %v243_v26 = vadd.f32 %v242_v24, %v226_v23 }
  0x5e   : > { %v260_v27 = vadd.f32 %v259_v25, %v243_v26 }
  0x60   : > { %995 = vrsqrt.f32 %v260_v27  ;;  %vm269_vm14 = vcmp.eq.f32.partialorder %v260_v27, inf  ;;  %v272_v34 = vand.u32 2147483648, %v260_v27  ;;  %vm271_vm15 = vcmp.eq.f32.partialorder %v260_v27, 0.0 }
  0x66   : > { %v996_v28 = vpop.eup %995 }
  0x67   : > { %v263_v29 = vmul.f32 %v996_v28, %v260_v27 }
  0x69   : > { %v264_v30 = vmul.f32 %v996_v28, %v263_v29 }
  0x6b   : > { %v265_v31 = vmul.f32 0.5, %v264_v30 }
  0x6d   : > { %v266_v32 = vsub.f32 1.5, %v265_v31 }
  0x6f   : > { %v267_v33 = vmul.f32 %v996_v28, %v266_v32 }
  0x71   : > { %v268_v35 = vmul.f32 %v267_v33, %v260_v27 }
  0x73   : > { %v270_v36 = vsel %vm269_vm14, %v260_v27, %v268_v35  ;;  %vm521_vm14 = vcmp.gt.s32.totalorder %v519_v63, %v1059_v12 }
  0x74   : > { %v273_v37 = vsel %vm271_vm15, %v272_v34, %v270_v36  ;;  %vm522_vm15 = vcmp.lt.s32.totalorder %v519_v63, 64  ;;  %v945_v34 = vld [vmem:[%s1105_s26 + $0x38] sm:$0xff]  ;;  %v944_v36 = vld [vmem:[%s1105_s26 + $0x30] sm:$0xff] }
  0x75   : > { %v274_v38 = vmul.f32 %v273_v37, %v210_v6  ;;  %v943_v6 = vld [vmem:[%s1105_s26 + $0x28] sm:$0xff]  ;;  %vm1166_vm2 = vmand %vm521_vm14, %vm522_vm15 }
  0x76   : > { %v460_v18 = vsel %vm459_vm12, %v943_v6, 0.0  ;;  %v524_v44 = vsel %vm1166_vm2, %v945_v34, 0.0  ;;  %v959_v34 = vld [vmem:[%s1207_s28 + $0x38] sm:$0xff] }
  0x77   : > { %v275_v39 = vsel %vm261_vm0, 0.0, %v274_v38 }
  0x78   : > { %v277_v40 = vxor.u32 2147483648, %v275_v39 }
  0x7a   : > { %v1093_v41 = vsel %vm276_vm1, %v275_v39, %v277_v40 }
  0x7b   : > { %v1099_v42 = vsel %vm197_vm9, %v1082_v60, %v1093_v41  ;;  %vm285_vm0 = vweird.f32 %v1093_v41  ;;  %v289_v22 = vand.u32 2147483647, %v1093_v41  ;;  %v291_v25 = vand.u32 2147483648, %v1093_v41 }
  0x7c   : > { %v297_v43 = vsub.f32 %v1082_v60, %v1099_v42 }
  0x7d   : > { %v292_v37 = vor.u32 1.1754944e-38, %v291_v25  ;;  %vm290_vm5 = vcmp.eq.f32.partialorder %v289_v22, 8.507059e+37  ;;  %v953_v25 = vld [vmem:[%s1207_s28 + $0x20] sm:$0xff] }
  0x7e   : > { %997 = vrcp.f32 %v297_v43  ;;  %v318_v49 = vand.u32 2147483648, %v297_v43  ;;  %vm312_vm3 = vweird.f32 %v297_v43  ;;  %v316_v53 = vand.u32 2147483647, %v297_v43 }
  0x7f   : > { %999 = vrcp.f32 %v1093_v41 }
  0x80   : > { %v319_v9 = vor.u32 1.1754944e-38, %v318_v49  ;;  %vm317_vm11 = vcmp.eq.f32.partialorder %v316_v53, 8.507059e+37 }
  0x84   : > { %v998_v45 = vpop.eup %997 }
  0x85   : > { %v308_v46 = vmul.f32 %v998_v45, %v297_v43  ;;  %vm313_vm4 = vweird.f32 %v998_v45  ;;  %v1114_v58 = vpop.eup %999 }
  0x86   : > { %vm1120_vm8 = vmor %vm312_vm3, %vm313_vm4  ;;  %v281_v3 = vmul.f32 %v1114_v58, %v1093_v41  ;;  %vm286_vm1 = vweird.f32 %v1114_v58  ;;  %vm490_vm3 = vcmp.gt.s32.totalorder %v488_v16, %v1059_v12 }
  0x87   : > { %v309_v52 = vsub.f32 1.0, %v308_v46  ;;  %vm287_vm4 = vmor %vm285_vm0, %vm286_vm1  ;;  %v279_v46 = vsub.f32 %v1093_v41, %v1082_v60 }
  0x88   : > { %v282_v13 = vsub.f32 1.0, %v281_v3 }
  0x89   : > { %v310_v59 = vmul.f32 %v998_v45, %v309_v52 }
  0x8a   : > { %v283_v24 = vmul.f32 %v1114_v58, %v282_v13  ;;  %v947_v13 = vld [vmem:[%s1207_s28 + $0x8] sm:$0xff] }
  0x8b   : > { %v311_v4 = vadd.f32 %v998_v45, %v310_v59 }
  0x8c   : > { %v284_v40 = vadd.f32 %v1114_v58, %v283_v24 }
  0x8d   : > { %v315_v14 = vsel %vm1120_vm8, %v998_v45, %v311_v4  ;;  %v491_v45 = vsel %vm490_vm3, %v944_v36, 0.0  ;;  %v1010_v4 = vmov 1.0   ;;  %v957_v36 = vld [vmem:[%s1207_s28 + $0x30] sm:$0xff] }
  0x8e   : > { %v320_v17 = vsel %vm317_vm11, %v319_v9, %v315_v14  ;;  %v288_v47 = vsel %vm287_vm4, %v1114_v58, %v284_v40 }
  0x8f   : > { %v382_v19 = vmul.f32 %v367_v1, %v320_v17  ;;  %v321_v20 = vmul.f32 %v320_v17, %v306_v5  ;;  %v444_v21 = vmul.f32 %v429_v8, %v320_v17  ;;  %v413_v23 = vmul.f32 %v398_v10, %v320_v17  ;;  %v563_v5 = vld [vmem:[#allocation2] ss:$0 sm:$0xff] }
  0x90   : > { %v351_v29 = vmul.f32 %v336_v15, %v320_v17  ;;  %v475_v33 = vmul.f32 %v460_v18, %v320_v17  ;;  %v293_v50 = vsel %vm290_vm5, %v292_v37, %v288_v47  ;;  %v539_v52 = vmul.f32 %v524_v44, %v320_v17  ;;  %v573_v8 = vld [vmem:[%s1207_s28] sm:$0xff]  ;;  %v949_v18 = vld [vmem:[%s1207_s28 + $0x10] sm:$0xff] }
  0x91   : > { %v383_v26 = vsel %vm197_vm9, 0.0, %v382_v19  ;;  %v322_v27 = vsel %vm197_vm9, 0.0, %v321_v20  ;;  %v445_v28 = vsel %vm197_vm9, 0.0, %v444_v21  ;;  %v414_v38 = vsel %vm197_vm9, 0.0, %v413_v23  ;;  %v951_v21 = vld [vmem:[%s1207_s28 + $0x18] sm:$0xff] }
  0x92   : > { %v388_v30 = vsel %vm1136_vm13, %v383_v26, 0.0  ;;  %v327_v31 = vsel %vm1136_vm13, %v322_v27, 0.0  ;;  %v450_v32 = vsel %vm1136_vm13, %v445_v28, 0.0  ;;  %v352_v39 = vsel %vm197_vm9, 0.0, %v351_v29  ;;  %v955_v29 = vld [vmem:[%s1207_s28 + $0x28] sm:$0xff]  ;;  %s1236_s28 = smov %s1207_s28 }
  0x93   : > { %389 = vadd.xlane.f32.xlu1 %v388_v30  ;;  %328 = vadd.xlane.f32.xlu0 %v327_v31  ;;  %v476_v43 = vsel %vm197_vm9, 0.0, %v475_v33  ;;  %v419_v48 = vsel %vm1136_vm13, %v414_v38, 0.0  ;;  %v357_v49 = vsel %vm1136_vm13, %v352_v39, 0.0  ;;  %v506_v53 = vmul.f32 %v491_v45, %v320_v17  ;;  %v970_v56 = vld [vmem:[%s1236_s28 + $0x20] sm:$0xff]  ;;  %s804_s30 = scalar_lea.vmem %s1236_s28, %s1007_s25  ;;  %s101_s25 = sadd.s32 1, %s1007_s25  }
  0x94   : > { %451 = vadd.xlane.f32.xlu2 %v450_v32  ;;  %v481_v51 = vsel %vm1136_vm13, %v476_v43, 0.0  ;;  %v294_v54 = vmul.f32 %v293_v50, %v279_v46  ;;  %v540_v60 = vsel %vm197_vm9, 0.0, %v539_v52  ;;  %v617_v32 = vadd.s32 56, %v570_v11  ;;  %p98_p0 = scmp.ge.s32.totalorder %s101_s25, 32  }
  0x95   : > { %v507_v41 = vsel %vm197_vm9, 0.0, %v506_v53  ;;  %v545_v58 = vsel %vm1136_vm13, %v540_v60, 0.0  ;;  %v636_v11 = vmov %v1056_v11 }
  0x96   : > { %v296_v57 = vsel %vm197_vm9, 0.0, %v294_v54  ;;  %v512_v59 = vsel %vm1136_vm13, %v507_v41, 0.0  ;;  %vm623_vm9 = vcmp.lt.s32.totalorder %v617_v32, 64  ;;  %v657_v52 = vadd.s32 8, %v636_v11 }
  0x97   : > { %v556_v61 = vsel %vm1136_vm13, %v296_v57, 0.0  ;;  %v678_v53 = vadd.s32 16, %v636_v11  ;;  %v699_v54 = vadd.s32 24, %v636_v11  ;;  %v720_v60 = vadd.s32 32, %v636_v11 }
  0x98   : > { %v741_v41 = vadd.s32 40, %v636_v11  ;;  %v762_v57 = vadd.s32 48, %v636_v11  ;;  %vm653_vm7 = vcmp.ge.s32.totalorder %v636_v11, %v1059_v12  ;;  %vm674_vm8 = vcmp.ge.s32.totalorder %v657_v52, %v1059_v12 }
  0x99   : > { %vm695_vm10 = vcmp.ge.s32.totalorder %v678_v53, %v1059_v12  ;;  %vm716_vm11 = vcmp.ge.s32.totalorder %v699_v54, %v1059_v12  ;;  %vm737_vm12 = vcmp.ge.s32.totalorder %v720_v60, %v1059_v12  ;;  %vm1266_vm1 = vmand %vm1136_vm13, %vm653_vm7 }
  0x9a   : > { %vm758_vm14 = vcmp.ge.s32.totalorder %v741_v41, %v1059_v12  ;;  %vm779_vm15 = vcmp.ge.s32.totalorder %v762_v57, %v1059_v12  ;;  %vm1276_vm2 = vmand %vm1136_vm13, %vm674_vm8 }
  0x9b   : > { %420 = vadd.xlane.f32.xlu1 %v419_v48  ;;  %358 = vadd.xlane.f32.xlu0 %v357_v49  ;;  %vm1284_vm3 = vmand %vm1136_vm13, %vm695_vm10 }
  0x9c   : > { %482 = vadd.xlane.f32.xlu2 %v481_v51  ;;  %vm1292_vm4 = vmand %vm1136_vm13, %vm716_vm11 }
  0x9d   : > { %vm1300_vm5 = vmand %vm1136_vm13, %vm737_vm12 }
  0x9e   : > { %vm1330_vm7 = vmand %vm1136_vm13, %vm779_vm15 }
  0xa3   : > { %546 = vadd.xlane.f32.xlu1 %v545_v58  ;;  %513 = vadd.xlane.f32.xlu0 %v512_v59  ;;  %v1238_v58 = vadd.s32 56, %v636_v11 }
  0xa4   : > { %557 = vadd.xlane.f32.xlu2 %v556_v61 }
  0xa5   : > { %vm800_vm0 = vcmp.ge.s32.totalorder %v1238_v58, %v1059_v12 }
  0xa6   : > { %vm801_vm8 = vmand %vm1136_vm13, %vm800_vm0 }
 0x106   : > { %v390_v62 = vpop.xlane.xlu1 %389  ;;  %v329_v63 = vpop.xlane.xlu0 %328 }
 0x107   : > { %392 = vst [vmem:[#allocation4 + $0x10] sm:$0xff] %v390_v62  ;;  %v452_v0 = vpop.xlane.xlu2 %451 }
 0x108   : > { %330 = vst [vmem:[#allocation4] sm:$0xff] %v329_v63  ;;  %v643_v63 = vld [vmem:[%s1236_s28] sm:$0xff] }
 0x109   : > { %454 = vst [vmem:[#allocation4 + $0x20] sm:$0xff] %v452_v0 }
 0x10e   : > { %v421_v55 = vpop.xlane.xlu1 %420  ;;  %v359_v9 = vpop.xlane.xlu0 %358 }
 0x10f   : > { %423 = vst [vmem:[#allocation4 + $0x18] sm:$0xff] %v421_v55  ;;  %v483_v1 = vpop.xlane.xlu2 %482  ;;  %v961_v55 = vld [vmem:[%s1236_s28 + $0x8] sm:$0xff] }
 0x110   : > { %361 = vst [vmem:[#allocation4 + $0x8] sm:$0xff] %v359_v9  ;;  %v964_v9 = vld [vmem:[%s1236_s28 + $0x10] sm:$0xff] }
 0x111   : > { %485 = vst [vmem:[#allocation4 + $0x28] sm:$0xff] %v483_v1  ;;  %v967_v1 = vld [vmem:[%s1236_s28 + $0x18] sm:$0xff] }
 0x116   : > { %v547_v2 = vpop.xlane.xlu1 %546  ;;  %v514_v3 = vpop.xlane.xlu0 %513 }
 0x117   : > { %549 = vst [vmem:[#allocation4 + $0x38] sm:$0xff] %v547_v2  ;;  %v1209_v6 = vpop.xlane.xlu2 %557 }
 0x118   : > { %516 = vst [vmem:[#allocation4 + $0x30] sm:$0xff] %v514_v3  ;;  %v564_v10 = vsel %vm1136_vm13, %v1209_v6, %v563_v5  ;;  %v973_v5 = vld [vmem:[%s1236_s28 + $0x28] sm:$0xff] }
 0x119   : > { %551 = vst [vmem:[%s550_s27] sm:$0x1] %v1010_v4 }
 0x11a   : > { %565 = vst [vmem:[#allocation2] sm:$0x1] %v564_v10 }
 0x120   : > { %v572_v14 = vld [vmem:[%s1211_s29] sm:$0xff]  ;;  %v946_v16 = vld [vmem:[%s1211_s29 + $0x8] sm:$0xff]  ;;  %v948_v17 = vld [vmem:[%s1211_s29 + $0x10] sm:$0xff] }
 0x121   : > { %v574_v15 = vmul.f32 %v573_v8, %v572_v14  ;;  %v580_v19 = vmul.f32 %v947_v13, %v946_v16  ;;  %v950_v20 = vld [vmem:[%s1211_s29 + $0x18] sm:$0xff]  ;;  %v587_v23 = vmul.f32 %v949_v18, %v948_v17  ;;  %v952_v24 = vld [vmem:[%s1211_s29 + $0x20] sm:$0xff]  ;;  %v954_v28 = vld [vmem:[%s1211_s29 + $0x28] sm:$0xff] }
 0x122   : > { %v594_v27 = vmul.f32 %v951_v21, %v950_v20  ;;  %v601_v31 = vmul.f32 %v953_v25, %v952_v24  ;;  %v958_v33 = vld [vmem:[%s1211_s29 + $0x38] sm:$0xff]  ;;  %v956_v35 = vld [vmem:[%s1211_s29 + $0x30] sm:$0xff]  ;;  %v608_v38 = vmul.f32 %v955_v29, %v954_v28  ;;  %s633_s29 = smov %s1211_s29  ;;  %v814_v57 = vld [vmem:[#allocation2] sm:$0x1] (%p98_p0) }
 0x123   : > { %v581_v22 = vadd.f32 %v580_v19, %v574_v15  ;;  %v622_v39 = vmul.f32 %v959_v34, %v958_v33  ;;  %v615_v43 = vmul.f32 %v957_v36, %v956_v35  ;;  %v641_v61 = vld [vmem:[%s633_s29] sm:$0xff]  ;;  %v960_v62 = vld [vmem:[%s633_s29 + $0x8] sm:$0xff]  ;;  %v963_v2 = vld [vmem:[%s633_s29 + $0x10] sm:$0xff]  ;;  %817 = vst [vmem:[#allocation3] sm:$0x1] (%p98_p0), %v814_v57 }
 0x124   : > { %v966_v3 = vld [vmem:[%s633_s29 + $0x18] sm:$0xff]  ;;  %v969_v4 = vld [vmem:[%s633_s29 + $0x20] sm:$0xff]  ;;  %v972_v10 = vld [vmem:[%s633_s29 + $0x28] sm:$0xff] }
 0x125   : > { %v588_v26 = vadd.f32 %v587_v23, %v581_v22  ;;  %v624_v45 = vsel %vm623_vm9, %v622_v39, 0.0  ;;  %v975_v13 = vld [vmem:[%s633_s29 + $0x30] sm:$0xff]  ;;  %v978_v14 = vld [vmem:[%s633_s29 + $0x38] sm:$0xff]  ;;  %vm1316_vm9 = vmand %vm1136_vm13, %vm758_vm14 }
 0x126   : > { %v979_v16 = vld [vmem:[%s1236_s28 + $0x38] sm:$0xff] }
 0x127   : > { %v595_v30 = vadd.f32 %v594_v27, %v588_v26 }
 0x129   : > { %v602_v37 = vadd.f32 %v601_v31, %v595_v30 }
 0x12b   : > { %v609_v40 = vadd.f32 %v608_v38, %v602_v37 }
 0x12d   : > { %v616_v44 = vadd.f32 %v615_v43, %v609_v40 }
 0x12f   : > { %v625_v46 = vadd.f32 %v624_v45, %v616_v44 }
 0x131   : > { %v626_v47 = vrot.slane %v625_v46, 4 }
 0x133   : > { %v627_v48 = vadd.f32 %v626_v47, %v625_v46 }
 0x135   : > { %v628_v49 = vrot.slane %v627_v48, 2 }
 0x137   : > { %v629_v50 = vadd.f32 %v628_v49, %v627_v48 }
 0x139   : > { %v630_v51 = vrot.slane %v629_v50, 1 }
 0x13b   : > { %v631_v59 = vadd.f32 %v630_v51, %v629_v50 }
 0x13d   : > { %v637_v8 = vmul.f32 %v631_v59, %v1209_v6  ;;  %v976_v6 = vld [vmem:[%s1236_s28 + $0x30] sm:$0xff] }
 0x13f   : > { %v642_v17 = vmul.f32 %v641_v61, %v637_v8  ;;  %v662_v18 = vmul.f32 %v960_v62, %v637_v8  ;;  %v683_v19 = vmul.f32 %v963_v2, %v637_v8  ;;  %v704_v20 = vmul.f32 %v966_v3, %v637_v8 }
 0x140   : > { %v725_v11 = vmul.f32 %v969_v4, %v637_v8  ;;  %v746_v22 = vmul.f32 %v972_v10, %v637_v8  ;;  %v767_v23 = vmul.f32 %v975_v13, %v637_v8  ;;  %v788_v24 = vmul.f32 %v978_v14, %v637_v8 }
 0x141   : > { %v646_v26 = vsub.f32 %v643_v63, %v642_v17  ;;  %v667_v27 = vsub.f32 %v961_v55, %v662_v18  ;;  %v688_v28 = vsub.f32 %v964_v9, %v683_v19  ;;  %v709_v29 = vsub.f32 %v967_v1, %v704_v20 }
 0x142   : > { %v730_v31 = vsub.f32 %v970_v56, %v725_v11  ;;  %v751_v32 = vsub.f32 %v973_v5, %v746_v22  ;;  %v772_v33 = vsub.f32 %v976_v6, %v767_v23  ;;  %v793_v34 = vsub.f32 %v979_v16, %v788_v24 }
 0x143   : > { %v647_v36 = vsel %vm1243_vm6, %v646_v26, %v643_v63  ;;  %v668_v37 = vsel %vm1243_vm6, %v667_v27, %v961_v55  ;;  %v689_v38 = vsel %vm1243_vm6, %v688_v28, %v964_v9  ;;  %v710_v39 = vsel %vm1243_vm6, %v709_v29, %v967_v1  ;;  %v897_v55 = vld [vmem:[#allocation3] sm:$0x1] (%p98_p0) }
 0x144   : > { %v655_v43 = vsel %vm1266_vm1, %v641_v61, %v647_v36  ;;  %v676_v44 = vsel %vm1276_vm2, %v960_v62, %v668_v37  ;;  %v697_v45 = vsel %vm1284_vm3, %v963_v2, %v689_v38  ;;  %v718_v47 = vsel %vm1292_vm4, %v966_v3, %v710_v39  ;;  %898 = vst [vmem:[%s1400_s2] sm:$0x1] (%p98_p0), %v897_v55 }
 0x145   : > { %656 = vst [vmem:[%s1236_s28] sm:$0xff] %v655_v43  ;;  %v731_v48 = vsel %vm1243_vm6, %v730_v31, %v970_v56  ;;  %v752_v49 = vsel %vm1243_vm6, %v751_v32, %v973_v5  ;;  %v773_v50 = vsel %vm1243_vm6, %v772_v33, %v976_v6  ;;  %v794_v52 = vsel %vm1243_vm6, %v793_v34, %v979_v16 }
 0x146   : > { %962 = vst [vmem:[%s1236_s28 + $0x8] sm:$0xff] %v676_v44  ;;  %v739_v51 = vsel %vm1300_vm5, %v969_v4, %v731_v48  ;;  %v760_v53 = vsel %vm1316_vm9, %v972_v10, %v752_v49  ;;  %v781_v54 = vsel %vm1330_vm7, %v975_v13, %v773_v50  ;;  %v802_v12 = vsel %vm801_vm8, %v978_v14, %v794_v52 }
 0x147   : > { %965 = vst [vmem:[%s1236_s28 + $0x10] sm:$0xff] %v697_v45 }
 0x148   : > { %968 = vst [vmem:[%s1236_s28 + $0x18] sm:$0xff] %v718_v47 }
 0x149   : > { %971 = vst [vmem:[%s1236_s28 + $0x20] sm:$0xff] %v739_v51 }
 0x14a   : > { %974 = vst [vmem:[%s1236_s28 + $0x28] sm:$0xff] %v760_v53 }
 0x14b   : > { %977 = vst [vmem:[%s1236_s28 + $0x30] sm:$0xff] %v781_v54 }
 0x14c   : > { %980 = vst [vmem:[%s1236_s28 + $0x38] sm:$0xff] %v802_v12 }
 0x151   :  { %100 = sbr.rel (!%p98_p0) target bundleno = 10 (0xa), region = 202 }
 0x153   : > { %v805_v60 = vld [vmem:[%s804_s30] ss:$0 sm:$0xff] }
 0x154   : > { %v810_v41 = vsel %vm1136_vm13, %v1099_v42, %v805_v60 }
 0x155   : > { %811 = vst [vmem:[%s804_s30] sm:$0x1] %v810_v41 }
 0x15c   :  { %v860_v58 = vld [vmem:[#allocation1] sm:$0xff]  ;;  %v862_v59 = vld [vmem:[#allocation1 + $0x8] sm:$0xff]  ;;  %v864_v61 = vld [vmem:[#allocation1 + $0x10] sm:$0xff] }
 0x15d   :  { %861 = vst [vmem:[%s1399_s1] sm:$0xff] %v860_v58  ;;  %v866_v62 = vld [vmem:[#allocation1 + $0x18] sm:$0xff]  ;;  %v868_v42 = vld [vmem:[#allocation1 + $0x20] sm:$0xff]  ;;  %v870_v7 = vld [vmem:[#allocation1 + $0x28] sm:$0xff] }
 0x15e   :  { %863 = vst [vmem:[%s1399_s1 + $0x8] sm:$0xff] %v862_v59  ;;  %v872_v63 = vld [vmem:[#allocation1 + $0x30] sm:$0xff]  ;;  %v874_v0 = vld [vmem:[#allocation1 + $0x38] sm:$0xff] }
 0x15f   :  { %865 = vst [vmem:[%s1399_s1 + $0x10] sm:$0xff] %v864_v61 }
 0x160   :  { %867 = vst [vmem:[%s1399_s1 + $0x18] sm:$0xff] %v866_v62 }
 0x161   :  { %869 = vst [vmem:[%s1399_s1 + $0x20] sm:$0xff] %v868_v42 }
 0x162   :  { %871 = vst [vmem:[%s1399_s1 + $0x28] sm:$0xff] %v870_v7 }
 0x163   :  { %873 = vst [vmem:[%s1399_s1 + $0x30] sm:$0xff] %v872_v63 }
 0x164   :  { %875 = vst [vmem:[%s1399_s1 + $0x38] sm:$0xff] %v874_v0 }

// kernel: custom-call.87
= control target key start
LH: loop header
LB: loop body
LE: loop exit
PB: predicated region body
PF: predicated region fallthrough
CT: control target
= control target key end

     0   :  { %s1132_s0 = inlined_call_operand.vmem [shape: f32[32,32], index: 0, kind: input, shape index: {}]   ;;  %s1133_s1 = inlined_call_operand.vmem [shape: f32[32,32], index: 1, kind: output, shape index: {}]  }
   0x1   :  { %s11_s8 = scalar_lea.vmem %s1132_s0, 24 }
   0x2   :  { %p709_p0 = scmp.gt.s32.totalorder %s1132_s0, %s11_s8 }
   0x3   :  { %s911_s11 = smov (!%p709_p0), [#allocation0]   ;;  %s915_s14 = smov (!%p709_p0), %s1132_s0  }
   0x4   :  { %710 = sbr.rel (%p709_p0) target bundleno = 17 (0x11), region = 108 }
   0x9 LB: > { %v45_v0 = vld [vmem:[%s917_s14] sm:$0xff]  ;;  %s47_s14 = scalar_lea.vmem %s917_s14, 8   ;;  %s917_s14 = sphi %s915_s14, %s47_s14   ;;  %s913_s11 = sphi %s911_s11, %s48_s11  }
   0xa   : > { %46 = vst [vmem:[%s913_s11] sm:$0xff] %v45_v0  ;;  %s48_s11 = scalar_lea.vmem %s913_s11, 8   ;;  %p42_p1 = scmp.gt.s32.totalorder %s47_s14, %s11_s8 }
   0xc   :  { %44 = sbr.rel (!%p42_p1) target bundleno = 9 (0x9), region = 114 }
  0x11 PF:  { %v58_v1 = vlaneseq  ;;  %v92_v2 = vld [vmem:[#allocation0 + $0x1] ss:$0 sm:$0xff]  ;;  %vm93_vm0 = vcmask 261120   ;;  %v103_v10 = vld [vmem:[#allocation0 + $0x2] ss:$0 sm:$0xff]  ;;  %v927_v38 = vmov 0.0   ;;  %s919_s16 = smov %s1133_s1  }
  0x12   :  { %v64_v5 = vld [vmem:[#allocation0] sm:$0xff]  ;;  %v94_v6 = vsel %vm93_vm0, %v92_v2, 0.0  ;;  %v105_v11 = vsel %vm93_vm0, %v103_v10, 0.0  ;;  %v169_v36 = vld [vmem:[#allocation0 + $0x8] ss:$0 sm:$0xff]  ;;  %s923_s17 = smov [#allocation1]  }
  0x13   :  { %v947_v3 = vand.u32 127, %v58_v1  ;;  %v949_v4 = vshrl.u32 %v58_v1, 7  ;;  %v114_v15 = vld [vmem:[#allocation0 + $0x3] ss:$0 sm:$0xff]  ;;  %v125_v20 = vld [vmem:[#allocation0 + $0x4] ss:$0 sm:$0xff] }
  0x14   :  { %v116_v16 = vsel %vm93_vm0, %v114_v15, 0.0  ;;  %v127_v21 = vsel %vm93_vm0, %v125_v20, 0.0  ;;  %v136_v25 = vld [vmem:[#allocation0 + $0x5] ss:$0 sm:$0xff]  ;;  %v147_v30 = vld [vmem:[#allocation0 + $0x6] ss:$0 sm:$0xff] }
  0x15   :  { %vm63_vm1 = vcmp.eq.s32.totalorder %v947_v3, %v949_v4  ;;  %vm67_vm2 = vcmp.eq.s32.totalorder %v947_v3, 0  ;;  %vm97_vm3 = vcmp.eq.s32.totalorder %v947_v3, 1  ;;  %vm108_vm4 = vcmp.eq.s32.totalorder %v947_v3, 2  ;;  %v158_v41 = vld [vmem:[#allocation0 + $0x7] ss:$0 sm:$0xff] }
  0x16   :  { %v68_v7 = vsel %vm67_vm2, %v64_v5, 1.0  ;;  %vm119_vm5 = vcmp.eq.s32.totalorder %v947_v3, 3  ;;  %vm130_vm6 = vcmp.eq.s32.totalorder %v947_v3, 4  ;;  %v138_v26 = vsel %vm93_vm0, %v136_v25, 0.0  ;;  %v184_v50 = vld [vmem:[#allocation0 + $0x9] ss:$0 sm:$0xff] }
  0x17   :  { %v69_v8 = vsel %vm63_vm1, %v68_v7, 0.0  ;;  %vm141_vm7 = vcmp.eq.s32.totalorder %v947_v3, 5  ;;  %v149_v31 = vsel %vm93_vm0, %v147_v30, 0.0  ;;  %v74_v35 = vadd.s32 8, %v949_v4  ;;  %v199_v57 = vld [vmem:[#allocation0 + $0xa] ss:$0 sm:$0xff] }
  0x18   :  { %v98_v9 = vmul.f32 %v94_v6, %v69_v8  ;;  %v171_v37 = vsel %vm93_vm0, %v169_v36, 0.0  ;;  %vm152_vm9 = vcmp.eq.s32.totalorder %v947_v3, 6  ;;  %v160_v42 = vsel %vm93_vm0, %v158_v41, 0.0  ;;  %v214_v1 = vld [vmem:[#allocation0 + $0xb] ss:$0 sm:$0xff] }
  0x19   :  { %vm75_vm8 = vcmp.eq.s32.totalorder %v947_v3, %v74_v35  ;;  %vm163_vm10 = vcmp.eq.s32.totalorder %v947_v3, 7  ;;  %vm174_vm11 = vcmp.eq.s32.totalorder %v947_v3, 8  ;;  %v186_v52 = vsel %vm93_vm0, %v184_v50, 0.0  ;;  %v274_v35 = vld [vmem:[#allocation0 + $0xf] ss:$0 sm:$0xff] }
  0x1a   :  { %99 = vadd.xlane.f32.xlu0 %v98_v9  ;;  %v76_v39 = vsel %vm75_vm8, 1.0, %v927_v38  ;;  %vm189_vm12 = vcmp.eq.s32.totalorder %v947_v3, 9  ;;  %v201_v58 = vsel %vm93_vm0, %v199_v57, 0.0  ;;  %vm204_vm13 = vcmp.eq.s32.totalorder %v947_v3, 10 }
  0x1b   :  { %v179_v40 = vmul.f32 %v171_v37, %v76_v39  ;;  %v216_v2 = vsel %vm93_vm0, %v214_v1, 0.0  ;;  %vm219_vm14 = vcmp.eq.s32.totalorder %v947_v3, 11  ;;  %vm234_vm15 = vcmp.eq.s32.totalorder %v947_v3, 12 }
  0x1c   :  { %vm249_vm1 = vcmp.eq.s32.totalorder %v947_v3, 13  ;;  %vm264_vm2 = vcmp.eq.s32.totalorder %v947_v3, 14  ;;  %v81_v36 = vadd.s32 16, %v949_v4  ;;  %vm351_vm8 = vcmp.eq.s32.totalorder %v947_v3, 19 }
  0x8d   :  { %v100_v12 = vpop.xlane.xlu0 %99 }
  0x8e   :  { %v101_v13 = vsel %vm97_vm3, %v100_v12, %v69_v8  ;;  %vm82_vm3 = vcmp.eq.s32.totalorder %v947_v3, %v81_v36 }
  0x8f   :  { %v109_v14 = vmul.f32 %v105_v11, %v101_v13  ;;  %v229_v11 = vld [vmem:[#allocation0 + $0xc] ss:$0 sm:$0xff] }
  0x90   :  { %v231_v12 = vsel %vm93_vm0, %v229_v11, 0.0 }
  0x91   :  { %110 = vadd.xlane.f32.xlu0 %v109_v14 }
 0x104   :  { %v111_v17 = vpop.xlane.xlu0 %110 }
 0x105   :  { %v112_v18 = vsel %vm108_vm4, %v111_v17, %v101_v13  ;;  %vm279_vm4 = vcmp.eq.s32.totalorder %v947_v3, 15 }
 0x106   :  { %v120_v19 = vmul.f32 %v116_v16, %v112_v18 }
 0x108   :  { %121 = vadd.xlane.f32.xlu1 %v120_v19  ;;  %v244_v19 = vld [vmem:[#allocation0 + $0xd] ss:$0 sm:$0xff] }
 0x109   :  { %v246_v20 = vsel %vm93_vm0, %v244_v19, 0.0 }
 0x17b   :  { %v122_v22 = vpop.xlane.xlu1 %121 }
 0x17c   :  { %v123_v23 = vsel %vm119_vm5, %v122_v22, %v112_v18  ;;  %vm294_vm5 = vcmp.eq.s32.totalorder %v947_v3, 16 }
 0x17d   :  { %v131_v24 = vmul.f32 %v127_v21, %v123_v23 }
 0x17f   :  { %132 = vadd.xlane.f32.xlu1 %v131_v24 }
 0x1f2   :  { %v133_v27 = vpop.xlane.xlu1 %132 }
 0x1f3   :  { %v134_v28 = vsel %vm130_vm6, %v133_v27, %v123_v23  ;;  %v259_v27 = vld [vmem:[#allocation0 + $0xe] ss:$0 sm:$0xff]  ;;  %vm313_vm6 = vcmp.eq.s32.totalorder %v947_v3, 17 }
 0x1f4   :  { %v142_v29 = vmul.f32 %v138_v26, %v134_v28 }
 0x1f6   :  { %143 = vadd.xlane.f32.xlu2 %v142_v29 }
 0x269   :  { %v144_v32 = vpop.xlane.xlu2 %143 }
 0x26a   :  { %v145_v33 = vsel %vm141_vm7, %v144_v32, %v134_v28  ;;  %v261_v28 = vsel %vm93_vm0, %v259_v27, 0.0  ;;  %vm332_vm7 = vcmp.eq.s32.totalorder %v947_v3, 18 }
 0x26b   :  { %v153_v34 = vmul.f32 %v149_v31, %v145_v33 }
 0x26d   :  { %154 = vadd.xlane.f32.xlu2 %v153_v34 }
 0x275   :  { %180 = vadd.xlane.f32.xlu2 %v179_v40 }
 0x2e0   :  { %v155_v43 = vpop.xlane.xlu2 %154 }
 0x2e1   :  { %v156_v44 = vsel %vm152_vm9, %v155_v43, %v145_v33  ;;  %v83_v43 = vsel %vm82_vm3, 1.0, %v927_v38  ;;  %vm370_vm9 = vcmp.eq.s32.totalorder %v947_v3, 20  ;;  %vm538_vm3 = vcmp.eq.s32.totalorder %v947_v3, 28 }
 0x2e2   :  { %v164_v45 = vmul.f32 %v160_v42, %v156_v44  ;;  %v289_v42 = vld [vmem:[#allocation0 + $0x10] ss:$0 sm:$0xff] }
 0x2e4   :  { %165 = vadd.xlane.f32.xlu0 %v164_v45 }
 0x2e8   :  { %v181_v49 = vpop.xlane.xlu2 %180 }
 0x2e9   :  { %v182_v51 = vsel %vm174_vm11, %v181_v49, %v76_v39 }
 0x2ea   :  { %v194_v53 = vmul.f32 %v186_v52, %v182_v51 }
 0x357   :  { %v166_v46 = vpop.xlane.xlu0 %165 }
 0x358   :  { %v167_v47 = vsel %vm163_vm10, %v166_v46, %v156_v44  ;;  %v291_v44 = vsel %vm93_vm0, %v289_v42, 0.0  ;;  %vm389_vm10 = vcmp.eq.s32.totalorder %v947_v3, 21 }
 0x359   :  { %v175_v48 = vmul.f32 %v171_v37, %v167_v47  ;;  %v276_v37 = vsel %vm93_vm0, %v274_v35, 0.0  ;;  %v303_v45 = vmul.f32 %v291_v44, %v83_v43 }
 0x35b   :  { %176 = vadd.xlane.f32.xlu1 %v175_v48 }
 0x363   :  { %195 = vadd.xlane.f32.xlu1 %v194_v53 }
 0x3ce   :  { %v177_v54 = vpop.xlane.xlu1 %176 }
 0x3cf   :  { %v178_v55 = vsel %vm174_vm11, %v177_v54, %v167_v47  ;;  %vm408_vm11 = vcmp.eq.s32.totalorder %v947_v3, 22 }
 0x3d0   :  { %v190_v56 = vmul.f32 %v186_v52, %v178_v55  ;;  %v308_v52 = vld [vmem:[#allocation0 + $0x11] ss:$0 sm:$0xff] }
 0x3d1   :  { %v310_v53 = vsel %vm93_vm0, %v308_v52, 0.0 }
 0x3d2   :  { %191 = vadd.xlane.f32.xlu0 %v190_v56 }
 0x3d6   :  { %v196_v59 = vpop.xlane.xlu1 %195 }
 0x3d7   :  { %v197_v60 = vsel %vm189_vm12, %v196_v59, %v182_v51 }
 0x3d8   :  { %v209_v61 = vmul.f32 %v201_v58, %v197_v60 }
 0x3da   :  { %210 = vadd.xlane.f32.xlu0 %v209_v61 }
 0x445   :  { %v192_v62 = vpop.xlane.xlu0 %191 }
 0x446   :  { %v193_v63 = vsel %vm189_vm12, %v192_v62, %v178_v55  ;;  %vm427_vm12 = vcmp.eq.s32.totalorder %v947_v3, 23 }
 0x447   :  { %v205_v0 = vmul.f32 %v201_v58, %v193_v63 }
 0x449   :  { %206 = vadd.xlane.f32.xlu2 %v205_v0 }
 0x44d   :  { %v211_v5 = vpop.xlane.xlu0 %210 }
 0x44e   :  { %v212_v6 = vsel %vm204_vm13, %v211_v5, %v197_v60 }
 0x44f   :  { %v224_v7 = vmul.f32 %v216_v2, %v212_v6 }
 0x451   :  { %225 = vadd.xlane.f32.xlu2 %v224_v7 }
 0x4bc   :  { %v207_v8 = vpop.xlane.xlu2 %206 }
 0x4bd   :  { %v208_v9 = vsel %vm204_vm13, %v207_v8, %v193_v63  ;;  %v327_v63 = vld [vmem:[#allocation0 + $0x12] ss:$0 sm:$0xff] }
 0x4be   :  { %v220_v10 = vmul.f32 %v216_v2, %v208_v9  ;;  %v329_v0 = vsel %vm93_vm0, %v327_v63, 0.0 }
 0x4c0   :  { %221 = vadd.xlane.f32.xlu1 %v220_v10 }
 0x4c4   :  { %v226_v13 = vpop.xlane.xlu2 %225 }
 0x4c5   :  { %v227_v14 = vsel %vm219_vm14, %v226_v13, %v212_v6 }
 0x4c6   :  { %v239_v15 = vmul.f32 %v231_v12, %v227_v14 }
 0x4c8   :  { %240 = vadd.xlane.f32.xlu1 %v239_v15 }
 0x533   :  { %v222_v16 = vpop.xlane.xlu1 %221 }
 0x534   :  { %v223_v17 = vsel %vm219_vm14, %v222_v16, %v208_v9  ;;  %vm446_vm14 = vcmp.eq.s32.totalorder %v947_v3, 24 }
 0x535   :  { %v235_v18 = vmul.f32 %v231_v12, %v223_v17  ;;  %v346_v12 = vld [vmem:[#allocation0 + $0x13] ss:$0 sm:$0xff] }
 0x536   :  { %v348_v13 = vsel %vm93_vm0, %v346_v12, 0.0 }
 0x537   :  { %236 = vadd.xlane.f32.xlu0 %v235_v18 }
 0x53b   :  { %v241_v21 = vpop.xlane.xlu1 %240 }
 0x53c   :  { %v242_v22 = vsel %vm234_vm15, %v241_v21, %v227_v14 }
 0x53d   :  { %v254_v23 = vmul.f32 %v246_v20, %v242_v22 }
 0x53f   :  { %255 = vadd.xlane.f32.xlu0 %v254_v23  ;;  %v365_v23 = vld [vmem:[#allocation0 + $0x14] ss:$0 sm:$0xff] }
 0x5aa   :  { %v237_v24 = vpop.xlane.xlu0 %236 }
 0x5ab   :  { %v238_v25 = vsel %vm234_vm15, %v237_v24, %v223_v17  ;;  %v367_v24 = vsel %vm93_vm0, %v365_v23, 0.0  ;;  %vm469_vm15 = vcmp.eq.s32.totalorder %v947_v3, 25 }
 0x5ac   :  { %v250_v26 = vmul.f32 %v246_v20, %v238_v25 }
 0x5ae   :  { %251 = vadd.xlane.f32.xlu2 %v250_v26 }
 0x5b2   :  { %v256_v29 = vpop.xlane.xlu0 %255 }
 0x5b3   :  { %v257_v30 = vsel %vm249_vm1, %v256_v29, %v242_v22 }
 0x5b4   :  { %v269_v31 = vmul.f32 %v261_v28, %v257_v30 }
 0x5b6   :  { %270 = vadd.xlane.f32.xlu2 %v269_v31 }
 0x621   :  { %v252_v32 = vpop.xlane.xlu2 %251 }
 0x622   :  { %v253_v33 = vsel %vm249_vm1, %v252_v32, %v238_v25  ;;  %vm492_vm1 = vcmp.eq.s32.totalorder %v947_v3, 26 }
 0x623   :  { %v265_v34 = vmul.f32 %v261_v28, %v253_v33 }
 0x625   :  { %266 = vadd.xlane.f32.xlu1 %v265_v34  ;;  %v384_v34 = vld [vmem:[#allocation0 + $0x15] ss:$0 sm:$0xff] }
 0x626   :  { %v386_v35 = vsel %vm93_vm0, %v384_v34, 0.0 }
 0x629   :  { %v271_v39 = vpop.xlane.xlu2 %270 }
 0x62a   :  { %v272_v40 = vsel %vm264_vm2, %v271_v39, %v257_v30 }
 0x62b   :  { %v284_v41 = vmul.f32 %v276_v37, %v272_v40 }
 0x62d   :  { %285 = vadd.xlane.f32.xlu1 %v284_v41 }
 0x635   :  { %304 = vadd.xlane.f32.xlu1 %v303_v45 }
 0x698   :  { %v267_v46 = vpop.xlane.xlu1 %266 }
 0x699   :  { %v268_v47 = vsel %vm264_vm2, %v267_v46, %v253_v33  ;;  %v403_v46 = vld [vmem:[#allocation0 + $0x16] ss:$0 sm:$0xff]  ;;  %vm515_vm2 = vcmp.eq.s32.totalorder %v947_v3, 27 }
 0x69a   :  { %v280_v48 = vmul.f32 %v276_v37, %v268_v47 }
 0x69c   :  { %281 = vadd.xlane.f32.xlu0 %v280_v48 }
 0x6a0   :  { %v286_v49 = vpop.xlane.xlu1 %285 }
 0x6a1   :  { %v287_v50 = vsel %vm279_vm4, %v286_v49, %v272_v40 }
 0x6a2   :  { %v299_v51 = vmul.f32 %v291_v44, %v287_v50 }
 0x6a4   :  { %300 = vadd.xlane.f32.xlu0 %v299_v51 }
 0x6a8   :  { %v305_v54 = vpop.xlane.xlu1 %304 }
 0x6a9   :  { %v306_v55 = vsel %vm294_vm5, %v305_v54, %v83_v43 }
 0x6aa   :  { %v322_v56 = vmul.f32 %v310_v53, %v306_v55 }
 0x6ac   :  { %323 = vadd.xlane.f32.xlu1 %v322_v56 }
 0x70f   :  { %v282_v57 = vpop.xlane.xlu0 %281 }
 0x710   :  { %v283_v58 = vsel %vm279_vm4, %v282_v57, %v268_v47  ;;  %v405_v47 = vsel %vm93_vm0, %v403_v46, 0.0  ;;  %v422_v57 = vld [vmem:[#allocation0 + $0x17] ss:$0 sm:$0xff]  ;;  %vm561_vm4 = vcmp.eq.s32.totalorder %v947_v3, 29 }
 0x711   :  { %v295_v59 = vmul.f32 %v291_v44, %v283_v58 }
 0x713   :  { %296 = vadd.xlane.f32.xlu2 %v295_v59 }
 0x717   :  { %v301_v60 = vpop.xlane.xlu0 %300 }
 0x718   :  { %v302_v61 = vsel %vm294_vm5, %v301_v60, %v287_v50 }
 0x719   :  { %v318_v62 = vmul.f32 %v310_v53, %v302_v61 }
 0x71b   :  { %319 = vadd.xlane.f32.xlu0 %v318_v62 }
 0x71f   :  { %v324_v1 = vpop.xlane.xlu1 %323 }
 0x720   :  { %v325_v2 = vsel %vm313_vm6, %v324_v1, %v306_v55 }
 0x721   :  { %v341_v5 = vmul.f32 %v329_v0, %v325_v2 }
 0x723   :  { %342 = vadd.xlane.f32.xlu1 %v341_v5 }
 0x786   :  { %v297_v6 = vpop.xlane.xlu2 %296 }
 0x787   :  { %v298_v7 = vsel %vm294_vm5, %v297_v6, %v283_v58  ;;  %v424_v58 = vsel %vm93_vm0, %v422_v57, 0.0  ;;  %v441_v6 = vld [vmem:[#allocation0 + $0x18] ss:$0 sm:$0xff]  ;;  %vm584_vm5 = vcmp.eq.s32.totalorder %v947_v3, 30 }
 0x788   :  { %v314_v8 = vmul.f32 %v310_v53, %v298_v7 }
 0x78a   :  { %315 = vadd.xlane.f32.xlu2 %v314_v8 }
 0x78e   :  { %v320_v9 = vpop.xlane.xlu0 %319 }
 0x78f   :  { %v321_v10 = vsel %vm313_vm6, %v320_v9, %v302_v61 }
 0x790   :  { %v337_v11 = vmul.f32 %v329_v0, %v321_v10 }
 0x792   :  { %338 = vadd.xlane.f32.xlu0 %v337_v11 }
 0x796   :  { %v343_v14 = vpop.xlane.xlu1 %342 }
 0x797   :  { %v344_v15 = vsel %vm332_vm7, %v343_v14, %v325_v2 }
 0x798   :  { %v360_v16 = vmul.f32 %v348_v13, %v344_v15 }
 0x79a   :  { %361 = vadd.xlane.f32.xlu1 %v360_v16 }
 0x7fd   :  { %v316_v17 = vpop.xlane.xlu2 %315 }
 0x7fe   :  { %v317_v18 = vsel %vm313_vm6, %v316_v17, %v298_v7  ;;  %v443_v7 = vsel %vm93_vm0, %v441_v6, 0.0  ;;  %v88_v17 = vadd.s32 24, %v949_v4 }
 0x7ff   :  { %v333_v19 = vmul.f32 %v329_v0, %v317_v18 }
 0x800   :  { %vm89_vm13 = vcmp.eq.s32.totalorder %v947_v3, %v88_v17 }
 0x801   :  { %334 = vadd.xlane.f32.xlu2 %v333_v19 }
 0x805   :  { %v339_v20 = vpop.xlane.xlu0 %338 }
 0x806   :  { %v340_v21 = vsel %vm332_vm7, %v339_v20, %v321_v10 }
 0x807   :  { %v356_v22 = vmul.f32 %v348_v13, %v340_v21 }
 0x809   :  { %357 = vadd.xlane.f32.xlu0 %v356_v22  ;;  %v464_v22 = vld [vmem:[#allocation0 + $0x19] ss:$0 sm:$0xff] }
 0x80a   :  { %v466_v4 = vsel %vm93_vm0, %v464_v22, 0.0 }
 0x80d   :  { %v362_v25 = vpop.xlane.xlu1 %361 }
 0x80e   :  { %v363_v26 = vsel %vm351_vm8, %v362_v25, %v344_v15 }
 0x80f   :  { %v379_v27 = vmul.f32 %v367_v24, %v363_v26 }
 0x811   :  { %380 = vadd.xlane.f32.xlu1 %v379_v27 }
 0x874   :  { %v335_v28 = vpop.xlane.xlu2 %334 }
 0x875   :  { %v336_v29 = vsel %vm332_vm7, %v335_v28, %v317_v18 }
 0x876   :  { %v352_v30 = vmul.f32 %v348_v13, %v336_v29 }
 0x878   :  { %353 = vadd.xlane.f32.xlu2 %v352_v30 }
 0x87c   :  { %v358_v31 = vpop.xlane.xlu0 %357 }
 0x87d   :  { %v359_v32 = vsel %vm351_vm8, %v358_v31, %v340_v21  ;;  %v90_v21 = vsel %vm89_vm13, 1.0, %v927_v38 }
 0x87e   :  { %v375_v33 = vmul.f32 %v367_v24, %v359_v32 }
 0x880   :  { %376 = vadd.xlane.f32.xlu0 %v375_v33 }
 0x884   :  { %v381_v36 = vpop.xlane.xlu1 %380 }
 0x885   :  { %v382_v37 = vsel %vm370_vm9, %v381_v36, %v363_v26 }
 0x886   :  { %v398_v39 = vmul.f32 %v386_v35, %v382_v37 }
 0x888   :  { %399 = vadd.xlane.f32.xlu1 %v398_v39 }
 0x8eb   :  { %v354_v40 = vpop.xlane.xlu2 %353 }
 0x8ec   :  { %v355_v41 = vsel %vm351_vm8, %v354_v40, %v336_v29 }
 0x8ed   :  { %v371_v42 = vmul.f32 %v367_v24, %v355_v41  ;;  %v459_v24 = vmul.f32 %v443_v7, %v90_v21 }
 0x8ef   :  { %372 = vadd.xlane.f32.xlu2 %v371_v42 }
 0x8f3   :  { %v377_v43 = vpop.xlane.xlu0 %376 }
 0x8f4   :  { %v378_v44 = vsel %vm370_vm9, %v377_v43, %v359_v32  ;;  %v487_v32 = vld [vmem:[#allocation0 + $0x1a] ss:$0 sm:$0xff] }
 0x8f5   :  { %v394_v45 = vmul.f32 %v386_v35, %v378_v44  ;;  %v489_v33 = vsel %vm93_vm0, %v487_v32, 0.0 }
 0x8f7   :  { %395 = vadd.xlane.f32.xlu0 %v394_v45 }
 0x8fb   :  { %v400_v48 = vpop.xlane.xlu1 %399 }
 0x8fc   :  { %v401_v49 = vsel %vm389_vm10, %v400_v48, %v382_v37 }
 0x8fd   :  { %v417_v50 = vmul.f32 %v405_v47, %v401_v49 }
 0x8ff   :  { %418 = vadd.xlane.f32.xlu1 %v417_v50 }
 0x962   :  { %v373_v51 = vpop.xlane.xlu2 %372 }
 0x963   :  { %v374_v52 = vsel %vm370_vm9, %v373_v51, %v355_v41 }
 0x964   :  { %v390_v53 = vmul.f32 %v386_v35, %v374_v52 }
 0x966   :  { %391 = vadd.xlane.f32.xlu2 %v390_v53 }
 0x96a   :  { %v396_v54 = vpop.xlane.xlu0 %395 }
 0x96b   :  { %v397_v55 = vsel %vm389_vm10, %v396_v54, %v378_v44 }
 0x96c   :  { %v413_v56 = vmul.f32 %v405_v47, %v397_v55 }
 0x96e   :  { %414 = vadd.xlane.f32.xlu0 %v413_v56 }
 0x972   :  { %v419_v59 = vpop.xlane.xlu1 %418 }
 0x973   :  { %v420_v60 = vsel %vm408_vm11, %v419_v59, %v401_v49 }
 0x974   :  { %v436_v61 = vmul.f32 %v424_v58, %v420_v60 }
 0x976   :  { %437 = vadd.xlane.f32.xlu1 %v436_v61  ;;  %v533_v61 = vld [vmem:[#allocation0 + $0x1c] ss:$0 sm:$0xff] }
 0x9d9   :  { %v392_v62 = vpop.xlane.xlu2 %391 }
 0x9da   :  { %v393_v63 = vsel %vm389_vm10, %v392_v62, %v374_v52  ;;  %v535_v62 = vsel %vm93_vm0, %v533_v61, 0.0 }
 0x9db   :  { %v409_v0 = vmul.f32 %v405_v47, %v393_v63  ;;  %v510_v47 = vld [vmem:[#allocation0 + $0x1b] ss:$0 sm:$0xff] }
 0x9dc   :  { %v512_v48 = vsel %vm93_vm0, %v510_v47, 0.0 }
 0x9dd   :  { %410 = vadd.xlane.f32.xlu2 %v409_v0 }
 0x9e1   :  { %v415_v1 = vpop.xlane.xlu0 %414 }
 0x9e2   :  { %v416_v2 = vsel %vm408_vm11, %v415_v1, %v397_v55 }
 0x9e3   :  { %v432_v5 = vmul.f32 %v424_v58, %v416_v2 }
 0x9e5   :  { %433 = vadd.xlane.f32.xlu0 %v432_v5 }
 0x9e9   :  { %v438_v8 = vpop.xlane.xlu1 %437 }
 0x9ea   :  { %v439_v9 = vsel %vm427_vm12, %v438_v8, %v420_v60 }
 0x9eb   :  { %v455_v10 = vmul.f32 %v443_v7, %v439_v9 }
 0x9ed   :  { %456 = vadd.xlane.f32.xlu1 %v455_v10 }
 0xa50   :  { %v411_v11 = vpop.xlane.xlu2 %410 }
 0xa51   :  { %v412_v12 = vsel %vm408_vm11, %v411_v11, %v393_v63 }
 0xa52   :  { %v428_v13 = vmul.f32 %v424_v58, %v412_v12 }
 0xa54   :  { %429 = vadd.xlane.f32.xlu2 %v428_v13  ;;  %v556_v13 = vld [vmem:[#allocation0 + $0x1d] ss:$0 sm:$0xff] }
 0xa58   :  { %v434_v14 = vpop.xlane.xlu0 %433 }
 0xa59   :  { %v435_v15 = vsel %vm427_vm12, %v434_v14, %v416_v2  ;;  %v558_v14 = vsel %vm93_vm0, %v556_v13, 0.0 }
 0xa5a   :  { %v451_v16 = vmul.f32 %v443_v7, %v435_v15 }
 0xa5c   :  { %452 = vadd.xlane.f32.xlu0 %v451_v16 }
 0xa60   :  { %v457_v27 = vpop.xlane.xlu1 %456 }
 0xa61   :  { %v458_v28 = vsel %vm446_vm14, %v457_v27, %v439_v9 }
 0xa62   :  { %v478_v29 = vmul.f32 %v466_v4, %v458_v28 }
 0xac7   :  { %v430_v18 = vpop.xlane.xlu2 %429 }
 0xac8   :  { %v431_v19 = vsel %vm427_vm12, %v430_v18, %v412_v12 }
 0xac9   :  { %v447_v20 = vmul.f32 %v443_v7, %v431_v19 }
 0xacb   :  { %448 = vadd.xlane.f32.xlu2 %v447_v20 }
 0xacf   :  { %v453_v23 = vpop.xlane.xlu0 %452 }
 0xad0   :  { %v454_v25 = vsel %vm446_vm14, %v453_v23, %v435_v15 }
 0xad1   :  { %v474_v26 = vmul.f32 %v466_v4, %v454_v25 }
 0xad3   :  { %475 = vadd.xlane.f32.xlu1 %v474_v26  ;;  %460 = vadd.xlane.f32.xlu2 %v459_v24  ;;  %v579_v26 = vld [vmem:[#allocation0 + $0x1e] ss:$0 sm:$0xff] }
 0xad4   :  { %v581_v27 = vsel %vm93_vm0, %v579_v26, 0.0 }
 0xadb   :  { %479 = vadd.xlane.f32.xlu2 %v478_v29 }
 0xb3e   :  { %v449_v38 = vpop.xlane.xlu2 %448 }
 0xb3f   :  { %v450_v30 = vsel %vm446_vm14, %v449_v38, %v431_v19 }
 0xb40   :  { %v470_v31 = vmul.f32 %v466_v4, %v450_v30 }
 0xb42   :  { %471 = vadd.xlane.f32.xlu0 %v470_v31 }
 0xb46   :  { %v476_v34 = vpop.xlane.xlu1 %475  ;;  %v461_v35 = vpop.xlane.xlu2 %460 }
 0xb47   :  { %v477_v36 = vsel %vm469_vm15, %v476_v34, %v454_v25  ;;  %v462_v37 = vsel %vm446_vm14, %v461_v35, %v90_v21 }
 0xb48   :  { %v497_v39 = vmul.f32 %v489_v33, %v477_v36  ;;  %v482_v40 = vmul.f32 %v466_v4, %v462_v37 }
 0xb4a   :  { %498 = vadd.xlane.f32.xlu2 %v497_v39  ;;  %483 = vadd.xlane.f32.xlu0 %v482_v40  ;;  %v602_v40 = vld [vmem:[#allocation0 + $0x1f] ss:$0 sm:$0xff] }
 0xb4e   :  { %v480_v41 = vpop.xlane.xlu2 %479 }
 0xb4f   :  { %v481_v42 = vsel %vm469_vm15, %v480_v41, %v458_v28  ;;  %v604_v41 = vsel %vm93_vm0, %v602_v40, 0.0  ;;  %vm607_vm0 = vcmp.eq.s32.totalorder %v947_v3, 31 }
 0xb50   :  { %v501_v43 = vmul.f32 %v489_v33, %v481_v42 }
 0xb52   :  { %502 = vadd.xlane.f32.xlu0 %v501_v43 }
 0xbb5   :  { %v472_v44 = vpop.xlane.xlu0 %471 }
 0xbb6   :  { %v473_v45 = vsel %vm469_vm15, %v472_v44, %v450_v30 }
 0xbb7   :  { %v493_v46 = vmul.f32 %v489_v33, %v473_v45 }
 0xbb9   :  { %494 = vadd.xlane.f32.xlu1 %v493_v46 }
 0xbbd   :  { %v484_v49 = vpop.xlane.xlu0 %483  ;;  %v499_v50 = vpop.xlane.xlu2 %498 }
 0xbbe   :  { %v485_v51 = vsel %vm469_vm15, %v484_v49, %v462_v37  ;;  %v500_v52 = vsel %vm492_vm1, %v499_v50, %v477_v36 }
 0xbbf   :  { %v505_v53 = vmul.f32 %v489_v33, %v485_v51  ;;  %v520_v54 = vmul.f32 %v512_v48, %v500_v52 }
 0xbc1   :  { %506 = vadd.xlane.f32.xlu1 %v505_v53  ;;  %521 = vadd.xlane.f32.xlu0 %v520_v54 }
 0xbc5   :  { %v503_v55 = vpop.xlane.xlu0 %502 }
 0xbc6   :  { %v504_v56 = vsel %vm492_vm1, %v503_v55, %v481_v42 }
 0xbc7   :  { %v524_v57 = vmul.f32 %v512_v48, %v504_v56 }
 0xbc9   :  { %525 = vadd.xlane.f32.xlu1 %v524_v57 }
 0xc2c   :  { %v495_v58 = vpop.xlane.xlu1 %494 }
 0xc2d   :  { %v496_v59 = vsel %vm492_vm1, %v495_v58, %v473_v45 }
 0xc2e   :  { %v516_v60 = vmul.f32 %v512_v48, %v496_v59 }
 0xc30   :  { %517 = vadd.xlane.f32.xlu2 %v516_v60 }
 0xc34   :  { %v507_v63 = vpop.xlane.xlu1 %506  ;;  %v522_v0 = vpop.xlane.xlu0 %521 }
 0xc35   :  { %v508_v1 = vsel %vm492_vm1, %v507_v63, %v485_v51  ;;  %v523_v2 = vsel %vm515_vm2, %v522_v0, %v500_v52 }
 0xc36   :  { %v528_v5 = vmul.f32 %v512_v48, %v508_v1  ;;  %v543_v6 = vmul.f32 %v535_v62, %v523_v2 }
 0xc38   :  { %529 = vadd.xlane.f32.xlu2 %v528_v5  ;;  %544 = vadd.xlane.f32.xlu1 %v543_v6 }
 0xc3c   :  { %v526_v7 = vpop.xlane.xlu1 %525 }
 0xc3d   :  { %v527_v8 = vsel %vm515_vm2, %v526_v7, %v504_v56 }
 0xc3e   :  { %v547_v9 = vmul.f32 %v535_v62, %v527_v8 }
 0xc40   :  { %548 = vadd.xlane.f32.xlu2 %v547_v9 }
 0xca3   :  { %v518_v10 = vpop.xlane.xlu2 %517 }
 0xca4   :  { %v519_v11 = vsel %vm515_vm2, %v518_v10, %v496_v59 }
 0xca5   :  { %v539_v12 = vmul.f32 %v535_v62, %v519_v11 }
 0xca7   :  { %540 = vadd.xlane.f32.xlu0 %v539_v12 }
 0xcab   :  { %v545_v15 = vpop.xlane.xlu1 %544  ;;  %v530_v16 = vpop.xlane.xlu2 %529 }
 0xcac   :  { %v546_v17 = vsel %vm538_vm3, %v545_v15, %v523_v2  ;;  %v531_v18 = vsel %vm515_vm2, %v530_v16, %v508_v1 }
 0xcad   :  { %v566_v19 = vmul.f32 %v558_v14, %v546_v17  ;;  %v551_v20 = vmul.f32 %v535_v62, %v531_v18 }
 0xcaf   :  { %567 = vadd.xlane.f32.xlu2 %v566_v19  ;;  %552 = vadd.xlane.f32.xlu0 %v551_v20 }
 0xcb3   :  { %v549_v21 = vpop.xlane.xlu2 %548 }
 0xcb4   :  { %v550_v22 = vsel %vm538_vm3, %v549_v21, %v527_v8 }
 0xcb5   :  { %v570_v23 = vmul.f32 %v558_v14, %v550_v22 }
 0xcb7   :  { %571 = vadd.xlane.f32.xlu0 %v570_v23 }
 0xd1a   :  { %v541_v24 = vpop.xlane.xlu0 %540 }
 0xd1b   :  { %v542_v25 = vsel %vm538_vm3, %v541_v24, %v519_v11 }
 0xd1c   :  { %v562_v4 = vmul.f32 %v558_v14, %v542_v25 }
 0xd1e   :  { %563 = vadd.xlane.f32.xlu1 %v562_v4 }
 0xd22   :  { %v553_v28 = vpop.xlane.xlu0 %552  ;;  %v568_v29 = vpop.xlane.xlu2 %567 }
 0xd23   :  { %v554_v38 = vsel %vm538_vm3, %v553_v28, %v531_v18  ;;  %v569_v30 = vsel %vm561_vm4, %v568_v29, %v546_v17 }
 0xd24   :  { %v574_v31 = vmul.f32 %v558_v14, %v554_v38  ;;  %v589_v32 = vmul.f32 %v581_v27, %v569_v30 }
 0xd26   :  { %575 = vadd.xlane.f32.xlu1 %v574_v31  ;;  %590 = vadd.xlane.f32.xlu0 %v589_v32 }
 0xd2a   :  { %v572_v33 = vpop.xlane.xlu0 %571 }
 0xd2b   :  { %v573_v34 = vsel %vm561_vm4, %v572_v33, %v550_v22 }
 0xd2c   :  { %v593_v35 = vmul.f32 %v581_v27, %v573_v34 }
 0xd2e   :  { %594 = vadd.xlane.f32.xlu1 %v593_v35 }
 0xd91   :  { %v564_v36 = vpop.xlane.xlu1 %563 }
 0xd92   :  { %v565_v37 = vsel %vm561_vm4, %v564_v36, %v542_v25 }
 0xd93   :  { %v585_v39 = vmul.f32 %v581_v27, %v565_v37 }
 0xd95   :  { %586 = vadd.xlane.f32.xlu2 %v585_v39 }
 0xd99   :  { %v576_v42 = vpop.xlane.xlu1 %575  ;;  %v591_v43 = vpop.xlane.xlu0 %590 }
 0xd9a   :  { %v577_v44 = vsel %vm561_vm4, %v576_v42, %v554_v38  ;;  %v592_v45 = vsel %vm584_vm5, %v591_v43, %v569_v30 }
 0xd9b   :  { %v597_v46 = vmul.f32 %v581_v27, %v577_v44  ;;  %v612_v47 = vmul.f32 %v604_v41, %v592_v45 }
 0xd9d   :  { %598 = vadd.xlane.f32.xlu2 %v597_v46  ;;  %613 = vadd.xlane.f32.xlu1 %v612_v47 }
 0xda1   :  { %v595_v48 = vpop.xlane.xlu1 %594 }
 0xda2   :  { %v596_v49 = vsel %vm584_vm5, %v595_v48, %v573_v34 }
 0xda3   :  { %v616_v50 = vmul.f32 %v604_v41, %v596_v49 }
 0xda5   :  { %617 = vadd.xlane.f32.xlu2 %v616_v50 }
 0xe08   :  { %v587_v51 = vpop.xlane.xlu2 %586 }
 0xe09   :  { %v588_v52 = vsel %vm584_vm5, %v587_v51, %v565_v37 }
 0xe0a   :  { %v608_v53 = vmul.f32 %v604_v41, %v588_v52 }
 0xe0c   :  { %609 = vadd.xlane.f32.xlu0 %v608_v53 }
 0xe10   :  { %v614_v54 = vpop.xlane.xlu1 %613  ;;  %v599_v55 = vpop.xlane.xlu2 %598 }
 0xe11   :  { %v615_v56 = vsel %vm607_vm0, %v614_v54, %v592_v45  ;;  %v600_v57 = vsel %vm584_vm5, %v599_v55, %v577_v44 }
 0xe12   :  { %626 = vst [vmem:[#allocation1 + $0x8] sm:$0xff] %v615_v56  ;;  %v620_v58 = vmul.f32 %v604_v41, %v600_v57 }
 0xe14   :  { %621 = vadd.xlane.f32.xlu0 %v620_v58 }
 0xe18   :  { %v618_v59 = vpop.xlane.xlu2 %617 }
 0xe19   :  { %v619_v60 = vsel %vm607_vm0, %v618_v59, %v596_v49 }
 0xe1a   :  { %628 = vst [vmem:[#allocation1 + $0x10] sm:$0xff] %v619_v60 }
 0xe7f   :  { %v610_v61 = vpop.xlane.xlu0 %609 }
 0xe80   :  { %v611_v62 = vsel %vm607_vm0, %v610_v61, %v588_v52  }
 0xe81   :  { %624 = vst [vmem:[#allocation1] sm:$0xff] %v611_v62 }
 0xe87   :  { %v622_v63 = vpop.xlane.xlu0 %621 }
 0xe88   :  { %v623_v0 = vsel %vm607_vm0, %v622_v63, %v600_v57 }
 0xe89   :  { %630 = vst [vmem:[#allocation1 + $0x18] sm:$0xff] %v623_v0 }
 0xe8a LB:  { %s925_s17 = sphi %s923_s17, %s676_s17   ;;  %s921_s16 = sphi %s919_s16, %s677_s16  }
 0xe90   : > { %v674_v3 = vld [vmem:[%s925_s17] sm:$0xff]  ;;  %s676_s17 = scalar_lea.vmem %s925_s17, 8  }
 0xe91   : > { %675 = vst [vmem:[%s921_s16] sm:$0xff] %v674_v3  ;;  %s677_s16 = scalar_lea.vmem %s921_s16, 8   ;;  %p671_p2 = scmp.gt.s32.totalorder %s676_s17, [#allocation1 + $0x18] }
 0xe93   :  { %673 = sbr.rel (!%p671_p2) target bundleno = 3722 (0xe8a), region = 136 }

// kernel: wct_core.3
= control target key start
LH: loop header
LB: loop body
LE: loop exit
PB: predicated region body
PF: predicated region fallthrough
CT: control target
= control target key end

     0   :  { %8 = vsyncpa [#allocation3], 0  ;;  %s203_s12 = smov [#allocation2]   ;;  %s204_s14 = smov 256   ;;  %s313_s0 = inlined_call_operand.hbm [shape: f32[32,256], index: 0, kind: input, shape index: {}]   ;;  %s314_s1 = inlined_call_operand.vmem [shape: f32[1,32,1], index: 1, kind: output, shape index: {0}]   ;;  %s315_s2 = inlined_call_operand.vmem [shape: f32[1,32,32], index: 2, kind: output, shape index: {1}]  }
   0x1   :  { %s19_s11 = sshll.u32 %s313_s0, 4  ;;  %s21_s13 = sshll.u32 %s203_s12, 4  ;;  %s20_s11 = int_to_ptr.hbm [resolvable:$true] %s19_s11  ;;  %s22_s13 = int_to_ptr.vmem [resolvable:$true] %s21_s13 }
   0x2   :  { %s205_s15 = smov 16  }
   0x3   :  { %27 = dma.hbm_to_vmem [thread:$0]  %s20_s11, 1024, %s22_s13, [#allocation3], %s204_s14, %s204_s14, %s205_s15  }
   0x4   :  { %201 = dma.done.wait [#allocation3], 1024  }
   0x5   :  { %202 = vsyncadd [#allocation3], 4294966272  ;;  %v56_v0 = vld [vmem:[#allocation2 + $0x30] sm:$0xff]  ;;  %v57_v1 = vld [vmem:[#allocation2 + $0x38] sm:$0xff]  ;;  %vm45_vm0 = vcmask 261120   ;;  %v206_v12 = vmov 0.0  }
   0x6   :  { %165 = vmatpush.xpose.msra.mxu2 %v56_v0  ;;  %169 = vmatpush.xpose.msra.mxu3 %v57_v1  ;;  %v54_v2 = vld [vmem:[#allocation2 + $0x20] sm:$0xff]  ;;  %v55_v3 = vld [vmem:[#allocation2 + $0x28] sm:$0xff]  ;;  %v52_v8 = vld [vmem:[#allocation2 + $0x10] sm:$0xff]  ;;  %v71_v10 = vadd.f32 %v57_v1, %v56_v0  ;;  %46 = vst.msk [vmem:[%s315_s2] sm:$0xff] %vm45_vm0, %v206_v12  ;;  %vm40_vm1 = vcmask 7168  }
   0x7   :  { %99 = vmatpush.xpose.msra.mxu0 %v56_v0  ;;  %128 = vmatpush.xpose.msra.mxu1 %v57_v1  ;;  %v50_v4 = vld [vmem:[#allocation2] sm:$0xff]  ;;  %v51_v5 = vld [vmem:[#allocation2 + $0x8] sm:$0xff]  ;;  %v68_v6 = vadd.f32 %v55_v3, %v54_v2  ;;  %v53_v9 = vld [vmem:[#allocation2 + $0x18] sm:$0xff]  ;;  %47 = vst.msk [vmem:[%s315_s2 + $0x8] sm:$0xff] %vm45_vm0, %v206_v12 }
   0x8   :  { %v62_v7 = vadd.f32 %v51_v5, %v50_v4  ;;  %v65_v11 = vadd.f32 %v53_v9, %v52_v8  ;;  %48 = vst.msk [vmem:[%s315_s2 + $0x10] sm:$0xff] %vm45_vm0, %v206_v12 }
   0x9   :  { %69 = vadd.xlane.f32.xlu1 %v68_v6  ;;  %49 = vst.msk [vmem:[%s315_s2 + $0x18] sm:$0xff] %vm45_vm0, %v206_v12 }
   0xa   :  { %166 = vmatpush.xpose.msra.mxu2 %v54_v2  ;;  %170 = vmatpush.xpose.msra.mxu3 %v55_v3  ;;  %43 = vst.msk [vmem:[%s314_s1 + $0x10] sm:$0xff] %vm40_vm1, %v206_v12 }
   0xb   :  { %100 = vmatpush.xpose.msra.mxu0 %v54_v2  ;;  %129 = vmatpush.xpose.msra.mxu1 %v55_v3  ;;  %41 = vst.msk [vmem:[%s314_s1] sm:$0xff] %vm40_vm1, %v206_v12 }
   0xc   :  { %63 = vadd.xlane.f32.xlu0 %v62_v7  ;;  %42 = vst.msk [vmem:[%s314_s1 + $0x8] sm:$0xff] %vm40_vm1, %v206_v12 }
   0xd   :  { %44 = vst.msk [vmem:[%s314_s1 + $0x18] sm:$0xff] %vm40_vm1, %v206_v12  ;;  %v83_v26 = vld [vmem:[%s315_s2] sm:$0xff] }
   0xe   :  { %167 = vmatpush.xpose.msra.mxu2 %v52_v8  ;;  %171 = vmatpush.xpose.msra.mxu3 %v53_v9  ;;  %v84_v36 = vld [vmem:[%s315_s2 + $0x8] sm:$0xff] }
   0xf   :  { %101 = vmatpush.xpose.msra.mxu0 %v52_v8  ;;  %130 = vmatpush.xpose.msra.mxu1 %v53_v9  ;;  %v85_v31 = vld [vmem:[%s315_s2 + $0x10] sm:$0xff] }
  0x10   :  { %v86_v41 = vld [vmem:[%s315_s2 + $0x18] sm:$0xff] }
  0x11   :  { %72 = vadd.xlane.f32.xlu1 %v71_v10  ;;  %v60_v14 = vld [vmem:[%s314_s1 + $0x10] sm:$0xff] }
  0x12   :  { %168 = vmatpush.xpose.msra.mxu2 %v50_v4  ;;  %172 = vmatpush.xpose.msra.mxu3 %v51_v5  ;;  %v58_v17 = vld [vmem:[%s314_s1] sm:$0xff] }
  0x13   :  { %102 = vmatpush.xpose.msra.mxu0 %v50_v4  ;;  %131 = vmatpush.xpose.msra.mxu1 %v51_v5  ;;  %v59_v22 = vld [vmem:[%s314_s1 + $0x8] sm:$0xff] }
  0x14   :  { %66 = vadd.xlane.f32.xlu0 %v65_v11  ;;  %v61_v19 = vld [vmem:[%s314_s1 + $0x18] sm:$0xff] }
  0x15   :  { %109 = vmatmul.f32.vlgmr.msra.gmra.mxu2 %v54_v2  ;;  %138 = vmatmul.f32.vlgmr.msra.gmra.mxu3 %v55_v3 }
  0x16   :  { %103 = vmatmul.f32.vlgmr.msra.gmra.mxu0 %v50_v4  ;;  %132 = vmatmul.f32.vlgmr.msra.gmra.mxu1 %v51_v5 }
  0x1d   :  { %112 = vmatmul.f32.gmra.mxu2 %v56_v0  ;;  %141 = vmatmul.f32.gmra.mxu3 %v57_v1 }
  0x1e   :  { %106 = vmatmul.f32.gmra.mxu0 %v52_v8  ;;  %135 = vmatmul.f32.gmra.mxu1 %v53_v9 }
  0x7c   :  { %v70_v13 = vpop.xlane.xlu1 %69 }
  0x7d   :  { %v76_v15 = vadd.f32 %v70_v13, %v60_v14 }
  0x7f   :  { %v64_v16 = vpop.xlane.xlu0 %63  ;;  %81 = vst.msk [vmem:[%s314_s1 + $0x10] sm:$0xff] %vm40_vm1, %v76_v15 }
  0x80   :  { %v74_v18 = vadd.f32 %v64_v16, %v58_v17 }
  0x82   :  { %79 = vst.msk [vmem:[%s314_s1] sm:$0xff] %vm40_vm1, %v74_v18 }
  0x84   :  { %v73_v20 = vpop.xlane.xlu1 %72 }
  0x85   :  { %v77_v21 = vadd.f32 %v73_v20, %v61_v19 }
  0x87   :  { %82 = vst.msk [vmem:[%s314_s1 + $0x18] sm:$0xff] %vm40_vm1, %v77_v21  ;;  %v67_v23 = vpop.xlane.xlu0 %66 }
  0x88   :  { %v75_v24 = vadd.f32 %v67_v23, %v59_v22 }
  0x8a   :  { %80 = vst.msk [vmem:[%s314_s1 + $0x8] sm:$0xff] %vm40_vm1, %v75_v24 }
  0x93   :  { %v104_v25 = vpop.f32.mrf.mxu0  ;;  %v133_v27 = vpop.f32.mrf.mxu1 }
  0x94   :  { %v134_v28 = vadd.f32 %v133_v27, %v104_v25 }
  0x96   :  { %v145_v29 = vadd.f32 %v134_v28, %v83_v26 }
  0x98   :  { %v110_v30 = vpop.f32.mrf.mxu2  ;;  %150 = vst.msk [vmem:[%s315_s2] sm:$0xff] %vm45_vm0, %v145_v29  ;;  %v139_v32 = vpop.f32.mrf.mxu3 }
  0x99   :  { %v140_v33 = vadd.f32 %v139_v32, %v110_v30 }
  0x9b   :  { %v147_v34 = vadd.f32 %v140_v33, %v85_v31  ;;  %v107_v35 = vpop.f32.mrf.mxu0  ;;  %v136_v37 = vpop.f32.mrf.mxu1 }
  0x9c   :  { %v137_v38 = vadd.f32 %v136_v37, %v107_v35 }
  0x9d   :  { %152 = vst.msk [vmem:[%s315_s2 + $0x10] sm:$0xff] %vm45_vm0, %v147_v34 }
  0x9e   :  { %v146_v39 = vadd.f32 %v137_v38, %v84_v36 }
  0xa0   :  { %v113_v40 = vpop.f32.mrf.mxu2  ;;  %151 = vst.msk [vmem:[%s315_s2 + $0x8] sm:$0xff] %vm45_vm0, %v146_v39  ;;  %v142_v42 = vpop.f32.mrf.mxu3 }
  0xa1   :  { %v143_v43 = vadd.f32 %v142_v42, %v113_v40 }
  0xa3   :  { %v148_v44 = vadd.f32 %v143_v43, %v86_v41 }
  0xa5   :  { %153 = vst.msk [vmem:[%s315_s2 + $0x18] sm:$0xff] %vm45_vm0, %v148_v44 }
  0xa6   :  { %162 = vsyncpa [#allocation3], 1 }

// kernel: custom-call.88
= control target key start
LH: loop header
LB: loop body
LE: loop exit
PB: predicated region body
PF: predicated region fallthrough
CT: control target
= control target key end

     0   :  { %v1851_v0 = vmov 0.0   ;;  %vm54_vm3 = vcmask 7168   ;;  %vm120_vm5 = vcmask 15368   ;;  %vm146_vm6 = vcmask 1047553   ;;  %s2299_s0 = inlined_call_operand.vmem [shape: f32[32,32], index: 0, kind: input, shape index: {}]   ;;  %s2300_s1 = inlined_call_operand.vmem [shape: f32[32,32], index: 1, kind: output, shape index: {}]  }
   0x1   :  { %47 = vst [vmem:[#allocation1] sm:$0xff] %v1851_v0  ;;  %v1869_v4 = vld [vmem:[%s2299_s0] sm:$0xff]  ;;  %v1875_v5 = vld [vmem:[%s2299_s0 + $0x8] sm:$0xff]  ;;  %vm147_vm9 = vmand %vm120_vm5, %vm146_vm6  ;;  %vm190_vm11 = vcmask 23568   ;;  %vm216_vm12 = vcmask 1047554  }
   0x2   :  { %37 = vst [vmem:[#allocation0] sm:$0xff] %v1869_v4  ;;  %vm217_vm15 = vmand %vm190_vm11, %vm216_vm12 }
   0x3   :  { %39 = vst [vmem:[#allocation0 + $0x8] sm:$0xff] %v1875_v5 }
   0x8   :  { %v55_v1 = vld [vmem:[#allocation1] ss:$0 sm:$0xff] }
   0x9   :  { %v57_v2 = vmul.f32 %v55_v1, %v55_v1  ;;  %v1862_v3 = vmul.f32 0.0, %v55_v1  ;;  %v56_v6 = vld [vmem:[#allocation0] ss:$0 sm:$0xff]  ;;  %v124_v28 = vld [vmem:[#allocation0 + $0x1] ss:$0 sm:$0xff] }
   0xa   :  { %v194_v52 = vld [vmem:[#allocation0 + $0x2] ss:$0 sm:$0xff] }
   0xb   :  { %58 = vadd.xlane.f32.xlu0 %v57_v2  ;;  %86 = vadd.xlane.f32.xlu2 %v1862_v3 }
  0x13   :  { %74 = vadd.xlane.f32.xlu0 %v1862_v3 }
  0x7e   :  { %v59_v7 = vpop.xlane.xlu0 %58  ;;  %v87_v21 = vpop.xlane.xlu2 %86 }
  0x7f   :  { %v60_v8 = vsub.f32 %v56_v6, %v59_v7  ;;  %v88_v23 = vsub.f32 %v1875_v5, %v87_v21 }
  0x81   :  { %1786 = vrsqrt.f32 %v60_v8  ;;  %vm67_vm1 = vweird.f32 %v60_v8 }
  0x86   :  { %v75_v13 = vpop.xlane.xlu0 %74 }
  0x87   :  { %v1787_v9 = vpop.eup %1786  ;;  %v76_v15 = vsub.f32 %v1869_v4, %v75_v13 }
  0x88   :  { %v62_v10 = vmul.f32 %v1787_v9, %v60_v8  ;;  %vm68_vm0 = vweird.f32 %v1787_v9 }
  0x89   :  { %vm69_vm2 = vmor %vm67_vm1, %vm68_vm0  ;;  %vm260_vm1 = vcmask 31768  }
  0x8a   :  { %v63_v11 = vmul.f32 %v1787_v9, %v62_v10 }
  0x8c   :  { %v64_v12 = vmul.f32 0.5, %v63_v11 }
  0x8e   :  { %v65_v14 = vsub.f32 1.5, %v64_v12 }
  0x90   :  { %v66_v16 = vmul.f32 %v1787_v9, %v65_v14 }
  0x92   :  { %v1879_v17 = vsel %vm69_vm2, %v1787_v9, %v66_v16  ;;  %v264_v16 = vld [vmem:[#allocation0 + $0x3] ss:$0 sm:$0xff]  ;;  %vm286_vm2 = vcmask 1047555  }
  0x93   :  { %v77_v18 = vmul.f32 %v76_v15, %v1879_v17  ;;  %v89_v24 = vmul.f32 %v88_v23, %v1879_v17  ;;  %v1926_v15 = vld [vmem:[%s2299_s0 + $0x10] sm:$0xff] }
  0x94   :  { %41 = vst [vmem:[#allocation0 + $0x10] sm:$0xff] %v1926_v15 }
  0x95   :  { %v78_v19 = vsel %vm54_vm3, %v77_v18, 0.0  ;;  %v90_v26 = vsel %vm54_vm3, %v89_v24, 0.0 }
  0x96   :  { %80 = vst [vmem:[#allocation1] sm:$0xff] %v78_v19 }
  0x9d   :  { %v1883_v20 = vld [vmem:[#allocation1 + $0x1] ss:$0 sm:$0xff] }
  0x9e   :  { %v125_v22 = vmul.f32 %v1883_v20, %v1883_v20  ;;  %v141_v25 = vmul.f32 %v1883_v20, %v78_v19  ;;  %v155_v27 = vmul.f32 %v1883_v20, %v90_v26 }
  0xa0   :  { %126 = vadd.xlane.f32.xlu1 %v125_v22 }
  0xa8   :  { %142 = vadd.xlane.f32.xlu1 %v141_v25 }
  0xb0   :  { %156 = vadd.xlane.f32.xlu1 %v155_v27 }
 0x113   :  { %v127_v29 = vpop.xlane.xlu1 %126 }
 0x114   :  { %v128_v30 = vsub.f32 %v124_v28, %v127_v29 }
 0x116   :  { %1788 = vrsqrt.f32 %v128_v30  ;;  %vm135_vm7 = vweird.f32 %v128_v30 }
 0x11b   :  { %v143_v33 = vpop.xlane.xlu1 %142 }
 0x11c   :  { %v1789_v31 = vpop.eup %1788  ;;  %v144_v38 = vsub.f32 %v1869_v4, %v143_v33 }
 0x11d   :  { %v130_v32 = vmul.f32 %v1789_v31, %v128_v30  ;;  %vm136_vm4 = vweird.f32 %v1789_v31 }
 0x11e   :  { %vm137_vm8 = vmor %vm135_vm7, %vm136_vm4 }
 0x11f   :  { %v131_v34 = vmul.f32 %v1789_v31, %v130_v32 }
 0x121   :  { %v132_v35 = vmul.f32 0.5, %v131_v34 }
 0x123   :  { %v133_v36 = vsub.f32 1.5, %v132_v35  ;;  %v157_v40 = vpop.xlane.xlu1 %156 }
 0x124   :  { %v158_v43 = vsub.f32 %v1875_v5, %v157_v40 }
 0x125   :  { %v134_v37 = vmul.f32 %v1789_v31, %v133_v36 }
 0x127   :  { %v1893_v39 = vsel %vm137_vm8, %v1789_v31, %v134_v37  ;;  %vm287_vm8 = vmand %vm260_vm1, %vm286_vm2 }
 0x128   :  { %v145_v41 = vmul.f32 %v144_v38, %v1893_v39  ;;  %v159_v45 = vmul.f32 %v158_v43, %v1893_v39 }
 0x12a   :  { %v148_v42 = vsel %vm147_vm9, %v145_v41, 0.0  ;;  %v160_v46 = vsel %vm120_vm5, %v159_v45, 0.0 }
 0x12b   :  { %v149_v44 = vadd.f32 %v148_v42, %v78_v19  ;;  %v161_v47 = vadd.f32 %v160_v46, %v90_v26 }
 0x12d   :  { %150 = vst [vmem:[#allocation1] sm:$0xff] %v149_v44 }
 0x134   :  { %v1901_v48 = vld [vmem:[#allocation1 + $0x2] ss:$0 sm:$0xff] }
 0x135   :  { %v211_v49 = vmul.f32 %v1901_v48, %v149_v44  ;;  %v195_v50 = vmul.f32 %v1901_v48, %v1901_v48  ;;  %v225_v51 = vmul.f32 %v1901_v48, %v161_v47 }
 0x137   :  { %212 = vadd.xlane.f32.xlu0 %v211_v49  ;;  %196 = vadd.xlane.f32.xlu2 %v195_v50  ;;  %v334_v49 = vld [vmem:[#allocation0 + $0x4] ss:$0 sm:$0xff] }
 0x138   :  { %226 = vadd.xlane.f32.xlu1 %v225_v51 }
 0x1aa   :  { %v197_v53 = vpop.xlane.xlu2 %196  ;;  %v213_v59 = vpop.xlane.xlu0 %212 }
 0x1ab   :  { %v198_v54 = vsub.f32 %v194_v52, %v197_v53  ;;  %v214_v62 = vsub.f32 %v1869_v4, %v213_v59  ;;  %v227_v0 = vpop.xlane.xlu1 %226 }
 0x1ac   :  { %v228_v6 = vsub.f32 %v1875_v5, %v227_v0 }
 0x1ad   :  { %1790 = vrsqrt.f32 %v198_v54  ;;  %vm205_vm13 = vweird.f32 %v198_v54 }
 0x1b3   :  { %v1791_v55 = vpop.eup %1790 }
 0x1b4   :  { %v200_v56 = vmul.f32 %v1791_v55, %v198_v54  ;;  %vm206_vm10 = vweird.f32 %v1791_v55 }
 0x1b5   :  { %vm207_vm14 = vmor %vm205_vm13, %vm206_vm10  ;;  %vm330_vm10 = vcmask 39968   ;;  %vm356_vm13 = vcmask 1047556  }
 0x1b6   :  { %v201_v57 = vmul.f32 %v1791_v55, %v200_v56 }
 0x1b8   :  { %v202_v58 = vmul.f32 0.5, %v201_v57 }
 0x1ba   :  { %v203_v60 = vsub.f32 1.5, %v202_v58 }
 0x1bc   :  { %v204_v61 = vmul.f32 %v1791_v55, %v203_v60 }
 0x1be   :  { %v1908_v63 = vsel %vm207_vm14, %v1791_v55, %v204_v61 }
 0x1bf   :  { %v215_v1 = vmul.f32 %v214_v62, %v1908_v63  ;;  %v229_v8 = vmul.f32 %v228_v6, %v1908_v63 }
 0x1c1   :  { %v218_v2 = vsel %vm217_vm15, %v215_v1, 0.0  ;;  %v230_v9 = vsel %vm190_vm11, %v229_v8, 0.0 }
 0x1c2   :  { %v219_v7 = vadd.f32 %v218_v2, %v149_v44  ;;  %v231_v10 = vadd.f32 %v230_v9, %v161_v47 }
 0x1c4   :  { %220 = vst [vmem:[#allocation1] sm:$0xff] %v219_v7 }
 0x1cb   :  { %v1916_v11 = vld [vmem:[#allocation1 + $0x3] ss:$0 sm:$0xff] }
 0x1cc   :  { %v281_v12 = vmul.f32 %v1916_v11, %v219_v7  ;;  %v265_v13 = vmul.f32 %v1916_v11, %v1916_v11  ;;  %v295_v14 = vmul.f32 %v1916_v11, %v231_v10 }
 0x1ce   :  { %282 = vadd.xlane.f32.xlu0 %v281_v12  ;;  %266 = vadd.xlane.f32.xlu2 %v265_v13 }
 0x1cf   :  { %296 = vadd.xlane.f32.xlu1 %v295_v14 }
 0x1d6   :  { %99 = vadd.xlane.f32.xlu2 %v1862_v3 }
 0x241   :  { %v267_v18 = vpop.xlane.xlu2 %266  ;;  %v283_v25 = vpop.xlane.xlu0 %282 }
 0x242   :  { %v268_v19 = vsub.f32 %v264_v16, %v267_v18  ;;  %v284_v28 = vsub.f32 %v1869_v4, %v283_v25  ;;  %v297_v30 = vpop.xlane.xlu1 %296 }
 0x243   :  { %v298_v33 = vsub.f32 %v1875_v5, %v297_v30 }
 0x244   :  { %1792 = vrsqrt.f32 %v268_v19  ;;  %vm275_vm4 = vweird.f32 %v268_v19 }
 0x249   :  { %v100_v35 = vpop.xlane.xlu2 %99 }
 0x24a   :  { %v1793_v21 = vpop.eup %1792  ;;  %v101_v37 = vsub.f32 %v1926_v15, %v100_v35 }
 0x24b   :  { %v270_v22 = vmul.f32 %v1793_v21, %v268_v19  ;;  %vm276_vm0 = vweird.f32 %v1793_v21 }
 0x24c   :  { %vm277_vm7 = vmor %vm275_vm4, %vm276_vm0  ;;  %v102_v40 = vmul.f32 %v101_v37, %v1879_v17 }
 0x24d   :  { %v271_v23 = vmul.f32 %v1793_v21, %v270_v22  ;;  %vm357_vm0 = vmand %vm330_vm10, %vm356_vm13 }
 0x24e   :  { %v103_v46 = vsel %vm54_vm3, %v102_v40, 0.0 }
 0x24f   :  { %v272_v24 = vmul.f32 0.5, %v271_v23  ;;  %v168_v47 = vmul.f32 %v1883_v20, %v103_v46  ;;  %v1971_v23 = vld [vmem:[%s2299_s0 + $0x18] sm:$0xff] }
 0x250   :  { %43 = vst [vmem:[#allocation0 + $0x18] sm:$0xff] %v1971_v23 }
 0x251   :  { %v273_v26 = vsub.f32 1.5, %v272_v24 }
 0x253   :  { %v274_v27 = vmul.f32 %v1793_v21, %v273_v26 }
 0x255   :  { %v1930_v29 = vsel %vm277_vm7, %v1793_v21, %v274_v27  ;;  %vm400_vm7 = vcmask 48168  }
 0x256   :  { %v285_v31 = vmul.f32 %v284_v28, %v1930_v29  ;;  %v299_v36 = vmul.f32 %v298_v33, %v1930_v29 }
 0x258   :  { %v288_v32 = vsel %vm287_vm8, %v285_v31, 0.0  ;;  %v300_v38 = vsel %vm260_vm1, %v299_v36, 0.0  ;;  %vm426_vm8 = vcmask 1047557  }
 0x259   :  { %v289_v34 = vadd.f32 %v288_v32, %v219_v7  ;;  %v301_v41 = vadd.f32 %v300_v38, %v231_v10 }
 0x25b   :  { %290 = vst [vmem:[#allocation1] sm:$0xff] %v289_v34 }
 0x262   :  { %v1940_v42 = vld [vmem:[#allocation1 + $0x4] ss:$0 sm:$0xff] }
 0x263   :  { %v351_v43 = vmul.f32 %v1940_v42, %v289_v34  ;;  %v335_v44 = vmul.f32 %v1940_v42, %v1940_v42  ;;  %v365_v45 = vmul.f32 %v1940_v42, %v301_v41 }
 0x265   :  { %352 = vadd.xlane.f32.xlu2 %v351_v43  ;;  %336 = vadd.xlane.f32.xlu0 %v335_v44 }
 0x266   :  { %366 = vadd.xlane.f32.xlu1 %v365_v45 }
 0x26d   :  { %169 = vadd.xlane.f32.xlu0 %v168_v47 }
 0x2d8   :  { %v337_v50 = vpop.xlane.xlu0 %336  ;;  %v353_v62 = vpop.xlane.xlu2 %352 }
 0x2d9   :  { %v338_v51 = vsub.f32 %v334_v49, %v337_v50  ;;  %v354_v2 = vsub.f32 %v1869_v4, %v353_v62  ;;  %v367_v10 = vpop.xlane.xlu1 %366 }
 0x2da   :  { %v368_v12 = vsub.f32 %v1875_v5, %v367_v10 }
 0x2db   :  { %1794 = vrsqrt.f32 %v338_v51  ;;  %vm345_vm14 = vweird.f32 %v338_v51 }
 0x2e0   :  { %v170_v52 = vpop.xlane.xlu0 %169 }
 0x2e1   :  { %v1795_v53 = vpop.eup %1794  ;;  %v171_v54 = vsub.f32 %v1926_v15, %v170_v52 }
 0x2e2   :  { %v340_v55 = vmul.f32 %v1795_v53, %v338_v51  ;;  %vm346_vm9 = vweird.f32 %v1795_v53 }
 0x2e3   :  { %v172_v56 = vmul.f32 %v171_v54, %v1893_v39  ;;  %vm347_vm15 = vmor %vm345_vm14, %vm346_vm9 }
 0x2e4   :  { %v341_v57 = vmul.f32 %v1795_v53, %v340_v55 }
 0x2e5   :  { %v173_v58 = vsel %vm120_vm5, %v172_v56, 0.0 }
 0x2e6   :  { %v342_v59 = vmul.f32 0.5, %v341_v57  ;;  %v174_v60 = vadd.f32 %v173_v58, %v103_v46 }
 0x2e8   :  { %v343_v61 = vsub.f32 1.5, %v342_v59  ;;  %v238_v0 = vmul.f32 %v1901_v48, %v174_v60 }
 0x2ea   :  { %v344_v1 = vmul.f32 %v1795_v53, %v343_v61  ;;  %239 = vadd.xlane.f32.xlu1 %v238_v0 }
 0x2ec   :  { %v1953_v6 = vsel %vm347_vm15, %v1795_v53, %v344_v1  ;;  %vm427_vm15 = vmand %vm400_vm7, %vm426_vm8 }
 0x2ed   :  { %v355_v7 = vmul.f32 %v354_v2, %v1953_v6  ;;  %v369_v13 = vmul.f32 %v368_v12, %v1953_v6 }
 0x2ef   :  { %v358_v8 = vsel %vm357_vm0, %v355_v7, 0.0  ;;  %v370_v19 = vsel %vm330_vm10, %v369_v13, 0.0  ;;  %vm470_vm0 = vcmask 56368  }
 0x2f0   :  { %v359_v9 = vadd.f32 %v358_v8, %v289_v34  ;;  %v371_v21 = vadd.f32 %v370_v19, %v301_v41 }
 0x2f2   :  { %360 = vst [vmem:[#allocation1] sm:$0xff] %v359_v9 }
 0x2f9   :  { %v1960_v14 = vld [vmem:[#allocation1 + $0x5] ss:$0 sm:$0xff] }
 0x2fa   :  { %v421_v16 = vmul.f32 %v1960_v14, %v359_v9  ;;  %v405_v18 = vmul.f32 %v1960_v14, %v1960_v14  ;;  %v435_v22 = vmul.f32 %v1960_v14, %v371_v21 }
 0x2fc   :  { %422 = vadd.xlane.f32.xlu0 %v421_v16  ;;  %406 = vadd.xlane.f32.xlu2 %v405_v18  ;;  %v474_v16 = vld [vmem:[#allocation0 + $0x6] ss:$0 sm:$0xff] }
 0x304   :  { %112 = vadd.xlane.f32.xlu0 %v1862_v3  ;;  %436 = vadd.xlane.f32.xlu2 %v435_v22  ;;  %v404_v3 = vld [vmem:[#allocation0 + $0x5] ss:$0 sm:$0xff] }
 0x35d   :  { %v240_v24 = vpop.xlane.xlu1 %239 }
 0x35e   :  { %v241_v25 = vsub.f32 %v1926_v15, %v240_v24 }
 0x360   :  { %v242_v26 = vmul.f32 %v241_v25, %v1908_v63 }
 0x362   :  { %v243_v27 = vsel %vm190_vm11, %v242_v26, 0.0 }
 0x363   :  { %v244_v28 = vadd.f32 %v243_v27, %v174_v60 }
 0x365   :  { %v308_v30 = vmul.f32 %v1916_v11, %v244_v28 }
 0x367   :  { %309 = vadd.xlane.f32.xlu2 %v308_v30 }
 0x36f   :  { %v423_v31 = vpop.xlane.xlu0 %422  ;;  %v407_v32 = vpop.xlane.xlu2 %406 }
 0x370   :  { %v408_v33 = vsub.f32 %v404_v3, %v407_v32  ;;  %v424_v47 = vsub.f32 %v1869_v4, %v423_v31 }
 0x372   :  { %1796 = vrsqrt.f32 %v408_v33  ;;  %vm415_vm9 = vweird.f32 %v408_v33 }
 0x377   :  { %v113_v34 = vpop.xlane.xlu0 %112  ;;  %v437_v52 = vpop.xlane.xlu2 %436 }
 0x378   :  { %v1797_v35 = vpop.eup %1796  ;;  %v114_v36 = vsub.f32 %v1971_v23, %v113_v34 }
 0x379   :  { %v410_v37 = vmul.f32 %v1797_v35, %v408_v33  ;;  %vm416_vm4 = vweird.f32 %v1797_v35 }
 0x37a   :  { %v115_v38 = vmul.f32 %v114_v36, %v1879_v17  ;;  %vm417_vm14 = vmor %vm415_vm9, %vm416_vm4  ;;  %vm496_vm4 = vcmask 1047558  }
 0x37b   :  { %v411_v40 = vmul.f32 %v1797_v35, %v410_v37 }
 0x37c   :  { %v116_v41 = vsel %vm54_vm3, %v115_v38, 0.0 }
 0x37d   :  { %v412_v43 = vmul.f32 0.5, %v411_v40  ;;  %v181_v45 = vmul.f32 %v1883_v20, %v116_v41  ;;  %v438_v20 = vsub.f32 %v1875_v5, %v437_v52 }
 0x37f   :  { %v413_v44 = vsub.f32 1.5, %v412_v43  ;;  %182 = vadd.xlane.f32.xlu2 %v181_v45 }
 0x381   :  { %v414_v46 = vmul.f32 %v1797_v35, %v413_v44 }
 0x383   :  { %v1983_v49 = vsel %vm417_vm14, %v1797_v35, %v414_v46  ;;  %vm497_vm14 = vmand %vm470_vm0, %vm496_vm4 }
 0x384   :  { %v425_v17 = vmul.f32 %v424_v47, %v1983_v49  ;;  %v439_v53 = vmul.f32 %v438_v20, %v1983_v49 }
 0x386   :  { %v428_v50 = vsel %vm427_vm15, %v425_v17, 0.0  ;;  %v440_v57 = vsel %vm400_vm7, %v439_v53, 0.0  ;;  %v544_v53 = vld [vmem:[#allocation0 + $0x7] ss:$0 sm:$0xff] }
 0x387   :  { %v429_v51 = vadd.f32 %v428_v50, %v359_v9  ;;  %v441_v58 = vadd.f32 %v440_v57, %v371_v21 }
 0x389   :  { %430 = vst [vmem:[#allocation1] sm:$0xff] %v429_v51 }
 0x390   :  { %v1990_v54 = vld [vmem:[#allocation1 + $0x6] ss:$0 sm:$0xff] }
 0x391   :  { %v491_v55 = vmul.f32 %v1990_v54, %v429_v51  ;;  %v475_v56 = vmul.f32 %v1990_v54, %v1990_v54  ;;  %v505_v59 = vmul.f32 %v1990_v54, %v441_v58 }
 0x393   :  { %492 = vadd.xlane.f32.xlu0 %v491_v55  ;;  %476 = vadd.xlane.f32.xlu1 %v475_v56 }
 0x39b   :  { %506 = vadd.xlane.f32.xlu1 %v505_v59 }
 0x3da   :  { %v310_v60 = vpop.xlane.xlu2 %309 }
 0x3db   :  { %v311_v61 = vsub.f32 %v1926_v15, %v310_v60 }
 0x3dd   :  { %v312_v62 = vmul.f32 %v311_v61, %v1930_v29 }
 0x3df   :  { %v313_v0 = vsel %vm260_vm1, %v312_v62, 0.0 }
 0x3e0   :  { %v314_v1 = vadd.f32 %v313_v0, %v244_v28 }
 0x3e2   :  { %v378_v2 = vmul.f32 %v1940_v42, %v314_v1 }
 0x3e4   :  { %379 = vadd.xlane.f32.xlu0 %v378_v2 }
 0x3f2   :  { %v183_v7 = vpop.xlane.xlu2 %182 }
 0x3f3   :  { %v184_v8 = vsub.f32 %v1971_v23, %v183_v7 }
 0x3f5   :  { %v185_v9 = vmul.f32 %v184_v8, %v1893_v39 }
 0x3f7   :  { %v186_v10 = vsel %vm120_vm5, %v185_v9, 0.0 }
 0x3f8   :  { %v187_v12 = vadd.f32 %v186_v10, %v116_v41 }
 0x3fa   :  { %v251_v13 = vmul.f32 %v1901_v48, %v187_v12 }
 0x3fc   :  { %252 = vadd.xlane.f32.xlu0 %v251_v13 }
 0x406   :  { %v477_v18 = vpop.xlane.xlu1 %476  ;;  %v493_v26 = vpop.xlane.xlu0 %492 }
 0x407   :  { %v478_v19 = vsub.f32 %v474_v16, %v477_v18  ;;  %v494_v28 = vsub.f32 %v1869_v4, %v493_v26 }
 0x409   :  { %1798 = vrsqrt.f32 %v478_v19  ;;  %vm485_vm9 = vweird.f32 %v478_v19 }
 0x40e   :  { %v507_v30 = vpop.xlane.xlu1 %506 }
 0x40f   :  { %v1799_v21 = vpop.eup %1798  ;;  %v508_v32 = vsub.f32 %v1875_v5, %v507_v30 }
 0x410   :  { %v480_v22 = vmul.f32 %v1799_v21, %v478_v19  ;;  %vm486_vm3 = vweird.f32 %v1799_v21 }
 0x411   :  { %vm487_vm5 = vmor %vm485_vm9, %vm486_vm3  ;;  %vm540_vm9 = vcmask 64568  }
 0x412   :  { %v481_v24 = vmul.f32 %v1799_v21, %v480_v22 }
 0x414   :  { %v482_v25 = vmul.f32 0.5, %v481_v24 }
 0x416   :  { %v483_v27 = vsub.f32 1.5, %v482_v25 }
 0x418   :  { %v484_v39 = vmul.f32 %v1799_v21, %v483_v27 }
 0x41a   :  { %v2006_v48 = vsel %vm487_vm5, %v1799_v21, %v484_v39 }
 0x41b   :  { %v495_v3 = vmul.f32 %v494_v28, %v2006_v48  ;;  %v509_v34 = vmul.f32 %v508_v32, %v2006_v48  ;;  %v614_v28 = vld [vmem:[#allocation0 + $0x8] ss:$0 sm:$0xff] }
 0x41d   :  { %v498_v31 = vsel %vm497_vm14, %v495_v3, 0.0  ;;  %v510_v35 = vsel %vm470_vm0, %v509_v34, 0.0 }
 0x41e   :  { %v499_v33 = vadd.f32 %v498_v31, %v429_v51  ;;  %v511_v36 = vadd.f32 %v510_v35, %v441_v58 }
 0x420   :  { %500 = vst [vmem:[#allocation1] sm:$0xff] %v499_v33 }
 0x427   :  { %v2014_v4 = vld [vmem:[#allocation1 + $0x7] ss:$0 sm:$0xff] }
 0x428   :  { %v545_v37 = vmul.f32 %v2014_v4, %v2014_v4  ;;  %v575_v38 = vmul.f32 %v2014_v4, %v511_v36 }
 0x42a   :  { %546 = vadd.xlane.f32.xlu1 %v545_v37  ;;  %576 = vadd.xlane.f32.xlu2 %v575_v38 }
 0x457   :  { %v380_v40 = vpop.xlane.xlu0 %379 }
 0x458   :  { %v381_v41 = vsub.f32 %v1926_v15, %v380_v40 }
 0x45a   :  { %v382_v43 = vmul.f32 %v381_v41, %v1953_v6 }
 0x45c   :  { %v383_v44 = vsel %vm330_vm10, %v382_v43, 0.0 }
 0x45d   :  { %v384_v45 = vadd.f32 %v383_v44, %v314_v1 }
 0x45f   :  { %v448_v46 = vmul.f32 %v1960_v14, %v384_v45 }
 0x461   :  { %449 = vadd.xlane.f32.xlu1 %v448_v46 }
 0x46f   :  { %v253_v47 = vpop.xlane.xlu0 %252 }
 0x470   :  { %v254_v17 = vsub.f32 %v1971_v23, %v253_v47 }
 0x472   :  { %v255_v50 = vmul.f32 %v254_v17, %v1908_v63 }
 0x474   :  { %v256_v51 = vsel %vm190_vm11, %v255_v50, 0.0 }
 0x475   :  { %v257_v52 = vadd.f32 %v256_v51, %v187_v12 }
 0x477   :  { %v321_v20 = vmul.f32 %v1916_v11, %v257_v52 }
 0x479   :  { %322 = vadd.xlane.f32.xlu0 %v321_v20 }
 0x49d   :  { %v547_v55 = vpop.xlane.xlu1 %546  ;;  %v577_v61 = vpop.xlane.xlu2 %576 }
 0x49e   :  { %v548_v56 = vsub.f32 %v544_v53, %v547_v55  ;;  %v578_v63 = vsub.f32 %v1875_v5, %v577_v61 }
 0x4a0   :  { %1800 = vrsqrt.f32 %v548_v56  ;;  %vm555_vm3 = vweird.f32 %v548_v56 }
 0x4a6   :  { %v1801_v57 = vpop.eup %1800 }
 0x4a7   :  { %v550_v58 = vmul.f32 %v1801_v57, %v548_v56  ;;  %vm556_vm15 = vweird.f32 %v1801_v57 }
 0x4a8   :  { %vm557_vm11 = vmor %vm555_vm3, %vm556_vm15  ;;  %vm668_vm3 = vcmask 80968  }
 0x4a9   :  { %v551_v59 = vmul.f32 %v1801_v57, %v550_v58 }
 0x4ab   :  { %v552_v60 = vmul.f32 0.5, %v551_v59  ;;  %v672_v59 = vld [vmem:[#allocation0 + $0x9] ss:$0 sm:$0xff] }
 0x4ad   :  { %v553_v62 = vsub.f32 1.5, %v552_v60 }
 0x4af   :  { %v554_v0 = vmul.f32 %v1801_v57, %v553_v62 }
 0x4b1   :  { %v2028_v1 = vsel %vm557_vm11, %v1801_v57, %v554_v0 }
 0x4b2   :  { %v579_v11 = vmul.f32 %v578_v63, %v2028_v1 }
 0x4b4   :  { %v580_v2 = vsel %vm540_vm9, %v579_v11, 0.0 }
 0x4b5   :  { %v581_v7 = vadd.f32 %v580_v2, %v511_v36 }
 0x4b7   :  { %583 = vst [vmem:[#allocation1 + $0x8] sm:$0xff] %v581_v7 }
 0x4be   :  { %v2032_v8 = vld [vmem:[#allocation1 + $0x8] ss:$0 sm:$0xff] }
 0x4bf   :  { %v633_v9 = vmul.f32 %v2032_v8, %v581_v7  ;;  %v615_v10 = vmul.f32 %v2032_v8, %v2032_v8 }
 0x4c1   :  { %634 = vadd.xlane.f32.xlu1 %v633_v9  ;;  %616 = vadd.xlane.f32.xlu2 %v615_v10 }
 0x4d4   :  { %v450_v12 = vpop.xlane.xlu1 %449 }
 0x4d5   :  { %v451_v13 = vsub.f32 %v1926_v15, %v450_v12 }
 0x4d7   :  { %v452_v16 = vmul.f32 %v451_v13, %v1983_v49 }
 0x4d9   :  { %v453_v18 = vsel %vm400_vm7, %v452_v16, 0.0 }
 0x4da   :  { %v454_v19 = vadd.f32 %v453_v18, %v384_v45 }
 0x4dc   :  { %v518_v21 = vmul.f32 %v1990_v54, %v454_v19 }
 0x4de   :  { %519 = vadd.xlane.f32.xlu2 %v518_v21 }
 0x4ec   :  { %v323_v22 = vpop.xlane.xlu0 %322 }
 0x4ed   :  { %v324_v24 = vsub.f32 %v1971_v23, %v323_v22 }
 0x4ef   :  { %v325_v25 = vmul.f32 %v324_v24, %v1930_v29 }
 0x4f1   :  { %v326_v26 = vsel %vm260_vm1, %v325_v25, 0.0  ;;  %vm610_vm1 = vcmask 72768  }
 0x4f2   :  { %v327_v27 = vadd.f32 %v326_v26, %v257_v52 }
 0x4f4   :  { %v391_v39 = vmul.f32 %v1940_v42, %v327_v27 }
 0x4f6   :  { %392 = vadd.xlane.f32.xlu0 %v391_v39 }
 0x534   :  { %v617_v30 = vpop.xlane.xlu2 %616  ;;  %v635_v36 = vpop.xlane.xlu1 %634 }
 0x535   :  { %v618_v3 = vsub.f32 %v614_v28, %v617_v30  ;;  %v636_v29 = vsub.f32 %v1875_v5, %v635_v36 }
 0x537   :  { %1802 = vrsqrt.f32 %v618_v3  ;;  %vm625_vm14 = vweird.f32 %v618_v3 }
 0x53d   :  { %v1803_v31 = vpop.eup %1802 }
 0x53e   :  { %v620_v32 = vmul.f32 %v1803_v31, %v618_v3  ;;  %vm626_vm5 = vweird.f32 %v1803_v31 }
 0x53f   :  { %vm627_vm15 = vmor %vm625_vm14, %vm626_vm5 }
 0x540   :  { %v621_v33 = vmul.f32 %v1803_v31, %v620_v32  ;;  %vm697_vm14 = vmand %vm668_vm3, %vm146_vm6 }
 0x542   :  { %v622_v34 = vmul.f32 0.5, %v621_v33 }
 0x544   :  { %v623_v35 = vsub.f32 1.5, %v622_v34 }
 0x546   :  { %v624_v37 = vmul.f32 %v1803_v31, %v623_v35 }
 0x548   :  { %v2046_v38 = vsel %vm627_vm15, %v1803_v31, %v624_v37  ;;  %vm728_vm15 = vcmask 89168  }
 0x549   :  { %v637_v42 = vmul.f32 %v636_v29, %v2046_v38  ;;  %v732_v29 = vld [vmem:[#allocation0 + $0xa] ss:$0 sm:$0xff] }
 0x54b   :  { %v638_v40 = vsel %vm610_vm1, %v637_v42, 0.0 }
 0x54c   :  { %v639_v41 = vadd.f32 %v638_v40, %v581_v7 }
 0x54e   :  { %641 = vst [vmem:[#allocation1 + $0x8] sm:$0xff] %v639_v41 }
 0x551   :  { %v520_v43 = vpop.xlane.xlu2 %519 }
 0x552   :  { %v521_v44 = vsub.f32 %v1926_v15, %v520_v43 }
 0x554   :  { %v522_v45 = vmul.f32 %v521_v44, %v2006_v48 }
 0x555   :  { %v2052_v46 = vld [vmem:[#allocation1 + $0x9] ss:$0 sm:$0xff] }
 0x556   :  { %v691_v47 = vmul.f32 %v2052_v46, %v639_v41  ;;  %v673_v17 = vmul.f32 %v2052_v46, %v2052_v46  ;;  %v523_v50 = vsel %vm470_vm0, %v522_v45, 0.0 }
 0x557   :  { %v524_v51 = vadd.f32 %v523_v50, %v454_v19 }
 0x558   :  { %692 = vadd.xlane.f32.xlu0 %v691_v47  ;;  %674 = vadd.xlane.f32.xlu1 %v673_v17 }
 0x559   :  { %v588_v52 = vmul.f32 %v2014_v4, %v524_v51 }
 0x55b   :  { %589 = vadd.xlane.f32.xlu2 %v588_v52 }
 0x569   :  { %v393_v20 = vpop.xlane.xlu0 %392 }
 0x56a   :  { %v394_v53 = vsub.f32 %v1971_v23, %v393_v20 }
 0x56c   :  { %v395_v55 = vmul.f32 %v394_v53, %v1953_v6 }
 0x56e   :  { %v396_v56 = vsel %vm330_vm10, %v395_v55, 0.0 }
 0x56f   :  { %v397_v57 = vadd.f32 %v396_v56, %v327_v27 }
 0x571   :  { %v461_v58 = vmul.f32 %v1960_v14, %v397_v57 }
 0x573   :  { %462 = vadd.xlane.f32.xlu1 %v461_v58 }
 0x5cb   :  { %v675_v60 = vpop.xlane.xlu1 %674  ;;  %v693_v12 = vpop.xlane.xlu0 %692 }
 0x5cc   :  { %v676_v61 = vsub.f32 %v672_v59, %v675_v60  ;;  %v694_v18 = vsub.f32 %v1875_v5, %v693_v12 }
 0x5ce   :  { %1804 = vrsqrt.f32 %v676_v61  ;;  %v590_v62 = vpop.xlane.xlu2 %589  ;;  %vm683_vm11 = vweird.f32 %v676_v61 }
 0x5cf   :  { %v591_v0 = vsub.f32 %v1926_v15, %v590_v62 }
 0x5d1   :  { %v592_v63 = vmul.f32 %v591_v0, %v2028_v1 }
 0x5d3   :  { %v593_v11 = vsel %vm540_vm9, %v592_v63, 0.0 }
 0x5d4   :  { %v1805_v2 = vpop.eup %1804  ;;  %v594_v7 = vadd.f32 %v593_v11, %v524_v51 }
 0x5d5   :  { %v678_v6 = vmul.f32 %v1805_v2, %v676_v61  ;;  %vm684_vm10 = vweird.f32 %v1805_v2 }
 0x5d6   :  { %v646_v9 = vmul.f32 %v2032_v8, %v594_v7  ;;  %vm685_vm5 = vmor %vm683_vm11, %vm684_vm10 }
 0x5d7   :  { %v679_v10 = vmul.f32 %v1805_v2, %v678_v6 }
 0x5d8   :  { %647 = vadd.xlane.f32.xlu2 %v646_v9 }
 0x5d9   :  { %v680_v14 = vmul.f32 0.5, %v679_v10 }
 0x5db   :  { %v681_v13 = vsub.f32 1.5, %v680_v14 }
 0x5dd   :  { %v682_v16 = vmul.f32 %v1805_v2, %v681_v13  ;;  %v792_v13 = vld [vmem:[#allocation0 + $0xb] ss:$0 sm:$0xff] }
 0x5df   :  { %v2070_v19 = vsel %vm685_vm5, %v1805_v2, %v682_v16 }
 0x5e0   :  { %v695_v21 = vmul.f32 %v694_v18, %v2070_v19 }
 0x5e2   :  { %v698_v22 = vsel %vm697_vm14, %v695_v21, 0.0  ;;  %vm788_vm14 = vcmask 97368  }
 0x5e3   :  { %v699_v24 = vadd.f32 %v698_v22, %v639_v41 }
 0x5e5   :  { %701 = vst [vmem:[#allocation1 + $0x8] sm:$0xff] %v699_v24 }
 0x5e6   :  { %v463_v25 = vpop.xlane.xlu1 %462 }
 0x5e7   :  { %v464_v26 = vsub.f32 %v1971_v23, %v463_v25 }
 0x5e9   :  { %v465_v27 = vmul.f32 %v464_v26, %v1983_v49 }
 0x5eb   :  { %v466_v3 = vsel %vm400_vm7, %v465_v27, 0.0  ;;  %v2109_v27 = vld [vmem:[#allocation0 + $0x8] sm:$0xff] }
 0x5ec   :  { %v2075_v39 = vld [vmem:[#allocation1 + $0xa] ss:$0 sm:$0xff]  ;;  %v467_v31 = vadd.f32 %v466_v3, %v397_v57 }
 0x5ed   :  { %v751_v28 = vmul.f32 %v2075_v39, %v699_v24  ;;  %v733_v30 = vmul.f32 %v2075_v39, %v2075_v39 }
 0x5ee   :  { %v531_v32 = vmul.f32 %v1990_v54, %v467_v31 }
 0x5ef   :  { %752 = vadd.xlane.f32.xlu1 %v751_v28  ;;  %734 = vadd.xlane.f32.xlu0 %v733_v30 }
 0x5f0   :  { %532 = vadd.xlane.f32.xlu2 %v531_v32 }
 0x64b   :  { %v648_v33 = vpop.xlane.xlu2 %647 }
 0x64c   :  { %v649_v34 = vsub.f32 %v1926_v15, %v648_v33 }
 0x64e   :  { %v650_v49 = vmul.f32 %v649_v34, %v2046_v38 }
 0x650   :  { %v651_v35 = vsel %vm610_vm1, %v650_v49, 0.0 }
 0x651   :  { %v652_v36 = vadd.f32 %v651_v35, %v594_v7 }
 0x653   :  { %v706_v37 = vmul.f32 %v2052_v46, %v652_v36 }
 0x655   :  { %707 = vadd.xlane.f32.xlu0 %v706_v37 }
 0x662   :  { %v735_v42 = vpop.xlane.xlu0 %734  ;;  %v753_v53 = vpop.xlane.xlu1 %752 }
 0x663   :  { %v736_v40 = vsub.f32 %v732_v29, %v735_v42  ;;  %v533_v41 = vpop.xlane.xlu2 %532  ;;  %v754_v56 = vsub.f32 %v1875_v5, %v753_v53 }
 0x664   :  { %v534_v43 = vsub.f32 %v1971_v23, %v533_v41 }
 0x665   :  { %1806 = vrsqrt.f32 %v736_v40  ;;  %vm743_vm10 = vweird.f32 %v736_v40 }
 0x666   :  { %v535_v54 = vmul.f32 %v534_v43, %v2006_v48 }
 0x668   :  { %v536_v44 = vsel %vm470_vm0, %v535_v54, 0.0  ;;  %vm757_vm0 = vmand %vm728_vm15, %vm216_vm12 }
 0x669   :  { %v537_v47 = vadd.f32 %v536_v44, %v467_v31 }
 0x66b   :  { %v1807_v45 = vpop.eup %1806  ;;  %v601_v50 = vmul.f32 %v2014_v4, %v537_v47 }
 0x66c   :  { %v738_v17 = vmul.f32 %v1807_v45, %v736_v40  ;;  %vm744_vm7 = vweird.f32 %v1807_v45 }
 0x66d   :  { %602 = vadd.xlane.f32.xlu2 %v601_v50  ;;  %vm745_vm11 = vmor %vm743_vm10, %vm744_vm7  ;;  %v852_v50 = vld [vmem:[#allocation0 + $0xc] ss:$0 sm:$0xff] }
 0x66e   :  { %v739_v51 = vmul.f32 %v1807_v45, %v738_v17 }
 0x670   :  { %v740_v52 = vmul.f32 0.5, %v739_v51 }
 0x672   :  { %v741_v20 = vsub.f32 1.5, %v740_v52 }
 0x674   :  { %v742_v55 = vmul.f32 %v1807_v45, %v741_v20 }
 0x676   :  { %v2091_v48 = vsel %vm745_vm11, %v1807_v45, %v742_v55  ;;  %vm817_vm11 = vmand %vm788_vm14, %vm286_vm2 }
 0x677   :  { %v755_v57 = vmul.f32 %v754_v56, %v2091_v48 }
 0x679   :  { %v758_v4 = vsel %vm757_vm0, %v755_v57, 0.0 }
 0x67a   :  { %v759_v58 = vadd.f32 %v758_v4, %v699_v24 }
 0x67c   :  { %761 = vst [vmem:[#allocation1 + $0x8] sm:$0xff] %v759_v58 }
 0x683   :  { %v2096_v59 = vld [vmem:[#allocation1 + $0xb] ss:$0 sm:$0xff] }
 0x684   :  { %v793_v60 = vmul.f32 %v2096_v59, %v2096_v59  ;;  %v811_v61 = vmul.f32 %v2096_v59, %v759_v58 }
 0x686   :  { %794 = vadd.xlane.f32.xlu1 %v793_v60  ;;  %812 = vadd.xlane.f32.xlu0 %v811_v61 }
 0x6c8   :  { %v708_v5 = vpop.xlane.xlu0 %707 }
 0x6c9   :  { %v709_v62 = vsub.f32 %v1926_v15, %v708_v5 }
 0x6cb   :  { %v710_v0 = vmul.f32 %v709_v62, %v2070_v19 }
 0x6cd   :  { %v711_v63 = vsel %vm668_vm3, %v710_v0, 0.0 }
 0x6ce   :  { %v712_v11 = vadd.f32 %v711_v63, %v652_v36 }
 0x6d0   :  { %v766_v2 = vmul.f32 %v2075_v39, %v712_v11 }
 0x6d2   :  { %767 = vadd.xlane.f32.xlu1 %v766_v2 }
 0x6e0   :  { %v603_v7 = vpop.xlane.xlu2 %602 }
 0x6e1   :  { %v604_v6 = vsub.f32 %v1971_v23, %v603_v7 }
 0x6e3   :  { %v605_v9 = vmul.f32 %v604_v6, %v2028_v1 }
 0x6e5   :  { %v606_v10 = vsel %vm540_vm9, %v605_v9, 0.0 }
 0x6e6   :  { %v607_v14 = vadd.f32 %v606_v10, %v537_v47 }
 0x6e8   :  { %v659_v12 = vmul.f32 %v2032_v8, %v607_v14 }
 0x6ea   :  { %660 = vadd.xlane.f32.xlu2 %v659_v12 }
 0x6f9   :  { %v795_v16 = vpop.xlane.xlu1 %794  ;;  %v813_v28 = vpop.xlane.xlu0 %812 }
 0x6fa   :  { %v796_v18 = vsub.f32 %v792_v13, %v795_v16  ;;  %v814_v8 = vsub.f32 %v2109_v27, %v813_v28 }
 0x6fc   :  { %1808 = vrsqrt.f32 %v796_v18  ;;  %vm803_vm7 = vweird.f32 %v796_v18 }
 0x702   :  { %v1809_v21 = vpop.eup %1808 }
 0x703   :  { %v798_v22 = vmul.f32 %v1809_v21, %v796_v18  ;;  %vm804_vm5 = vweird.f32 %v1809_v21 }
 0x704   :  { %vm805_vm10 = vmor %vm803_vm7, %vm804_vm5  ;;  %vm848_vm5 = vcmask 105568  }
 0x705   :  { %v799_v24 = vmul.f32 %v1809_v21, %v798_v22 }
 0x707   :  { %v800_v25 = vmul.f32 0.5, %v799_v24 }
 0x709   :  { %v801_v26 = vsub.f32 1.5, %v800_v25 }
 0x70b   :  { %v802_v30 = vmul.f32 %v1809_v21, %v801_v26 }
 0x70d   :  { %v2114_v3 = vsel %vm805_vm10, %v1809_v21, %v802_v30 }
 0x70e   :  { %v815_v31 = vmul.f32 %v814_v8, %v2114_v3 }
 0x710   :  { %v818_v32 = vsel %vm817_vm11, %v815_v31, 0.0 }
 0x711   :  { %v819_v33 = vadd.f32 %v818_v32, %v759_v58 }
 0x713   :  { %821 = vst [vmem:[#allocation1 + $0x8] sm:$0xff] %v819_v33 }
 0x71a   :  { %v2117_v34 = vld [vmem:[#allocation1 + $0xc] ss:$0 sm:$0xff] }
 0x71b   :  { %v853_v49 = vmul.f32 %v2117_v34, %v2117_v34  ;;  %v871_v35 = vmul.f32 %v2117_v34, %v819_v33 }
 0x71d   :  { %854 = vadd.xlane.f32.xlu0 %v853_v49  ;;  %872 = vadd.xlane.f32.xlu2 %v871_v35  ;;  %v2155_v49 = vld [vmem:[#allocation0 + $0x10] sm:$0xff] }
 0x745   :  { %v768_v36 = vpop.xlane.xlu1 %767 }
 0x746   :  { %v769_v37 = vsub.f32 %v1926_v15, %v768_v36 }
 0x748   :  { %v770_v29 = vmul.f32 %v769_v37, %v2091_v48 }
 0x74a   :  { %v771_v42 = vsel %vm728_vm15, %v770_v29, 0.0 }
 0x74b   :  { %v772_v40 = vadd.f32 %v771_v42, %v712_v11 }
 0x74d   :  { %v826_v41 = vmul.f32 %v2096_v59, %v772_v40 }
 0x74f   :  { %827 = vadd.xlane.f32.xlu1 %v826_v41 }
 0x75d   :  { %v661_v43 = vpop.xlane.xlu2 %660 }
 0x75e   :  { %v662_v54 = vsub.f32 %v1971_v23, %v661_v43 }
 0x760   :  { %v663_v44 = vmul.f32 %v662_v54, %v2046_v38 }
 0x762   :  { %v664_v45 = vsel %vm610_vm1, %v663_v44, 0.0  ;;  %vm877_vm1 = vmand %vm848_vm5, %vm356_vm13 }
 0x763   :  { %v665_v47 = vadd.f32 %v664_v45, %v607_v14 }
 0x765   :  { %v719_v17 = vmul.f32 %v2052_v46, %v665_v47 }
 0x767   :  { %720 = vadd.xlane.f32.xlu0 %v719_v17 }
 0x790   :  { %v855_v51 = vpop.xlane.xlu0 %854  ;;  %v873_v4 = vpop.xlane.xlu2 %872 }
 0x791   :  { %v856_v52 = vsub.f32 %v852_v50, %v855_v51  ;;  %v874_v58 = vsub.f32 %v2109_v27, %v873_v4 }
 0x793   :  { %1810 = vrsqrt.f32 %v856_v52  ;;  %vm863_vm7 = vweird.f32 %v856_v52 }
 0x799   :  { %v1811_v20 = vpop.eup %1810 }
 0x79a   :  { %v858_v53 = vmul.f32 %v1811_v20, %v856_v52  ;;  %vm864_vm0 = vweird.f32 %v1811_v20 }
 0x79b   :  { %vm865_vm10 = vmor %vm863_vm7, %vm864_vm0  ;;  %vm908_vm0 = vcmask 113768  }
 0x79c   :  { %v859_v55 = vmul.f32 %v1811_v20, %v858_v53  ;;  %v972_v53 = vld [vmem:[#allocation0 + $0xe] ss:$0 sm:$0xff] }
 0x79e   :  { %v860_v56 = vmul.f32 0.5, %v859_v55 }
 0x7a0   :  { %v861_v57 = vsub.f32 1.5, %v860_v56 }
 0x7a2   :  { %v862_v38 = vmul.f32 %v1811_v20, %v861_v57 }
 0x7a4   :  { %v2133_v46 = vsel %vm865_vm10, %v1811_v20, %v862_v38 }
 0x7a5   :  { %v875_v60 = vmul.f32 %v874_v58, %v2133_v46 }
 0x7a7   :  { %v878_v61 = vsel %vm877_vm1, %v875_v60, 0.0  ;;  %vm968_vm1 = vcmask 121968  }
 0x7a8   :  { %v879_v5 = vadd.f32 %v878_v61, %v819_v33 }
 0x7aa   :  { %881 = vst [vmem:[#allocation1 + $0x8] sm:$0xff] %v879_v5 }
 0x7b1   :  { %v2136_v62 = vld [vmem:[#allocation1 + $0xd] ss:$0 sm:$0xff] }
 0x7b2   :  { %v931_v0 = vmul.f32 %v2136_v62, %v879_v5  ;;  %v913_v63 = vmul.f32 %v2136_v62, %v2136_v62 }
 0x7b4   :  { %932 = vadd.xlane.f32.xlu0 %v931_v0  ;;  %914 = vadd.xlane.f32.xlu2 %v913_v63 }
 0x7c2   :  { %v828_v11 = vpop.xlane.xlu1 %827 }
 0x7c3   :  { %v829_v2 = vsub.f32 %v1926_v15, %v828_v11  ;;  %v912_v15 = vld [vmem:[#allocation0 + $0xd] ss:$0 sm:$0xff] }
 0x7c5   :  { %v830_v7 = vmul.f32 %v829_v2, %v2114_v3 }
 0x7c7   :  { %v831_v6 = vsel %vm788_vm14, %v830_v7, 0.0 }
 0x7c8   :  { %v832_v9 = vadd.f32 %v831_v6, %v772_v40 }
 0x7ca   :  { %v886_v10 = vmul.f32 %v2117_v34, %v832_v9 }
 0x7cc   :  { %887 = vadd.xlane.f32.xlu1 %v886_v10 }
 0x7da   :  { %v721_v14 = vpop.xlane.xlu0 %720 }
 0x7db   :  { %v722_v12 = vsub.f32 %v1971_v23, %v721_v14 }
 0x7dd   :  { %v723_v13 = vmul.f32 %v722_v12, %v2070_v19 }
 0x7df   :  { %v724_v16 = vsel %vm668_vm3, %v723_v13, 0.0  ;;  %vm937_vm3 = vmand %vm908_vm0, %vm426_vm8 }
 0x7e0   :  { %v725_v18 = vadd.f32 %v724_v16, %v665_v47 }
 0x7e2   :  { %v779_v21 = vmul.f32 %v2075_v39, %v725_v18 }
 0x7e4   :  { %780 = vadd.xlane.f32.xlu1 %v779_v21 }
 0x827   :  { %v915_v22 = vpop.xlane.xlu2 %914  ;;  %v933_v31 = vpop.xlane.xlu0 %932 }
 0x828   :  { %v916_v24 = vsub.f32 %v912_v15, %v915_v22  ;;  %v934_v32 = vsub.f32 %v2109_v27, %v933_v31 }
 0x82a   :  { %1812 = vrsqrt.f32 %v916_v24  ;;  %vm923_vm7 = vweird.f32 %v916_v24 }
 0x830   :  { %v1813_v25 = vpop.eup %1812 }
 0x831   :  { %v918_v26 = vmul.f32 %v1813_v25, %v916_v24  ;;  %vm924_vm11 = vweird.f32 %v1813_v25 }
 0x832   :  { %vm925_vm10 = vmor %vm923_vm7, %vm924_vm11 }
 0x833   :  { %v919_v28 = vmul.f32 %v1813_v25, %v918_v26 }
 0x835   :  { %v920_v30 = vmul.f32 0.5, %v919_v28 }
 0x837   :  { %v921_v8 = vsub.f32 1.5, %v920_v30  ;;  %v2192_v30 = vld [vmem:[#allocation0 + $0x18] sm:$0xff] }
 0x839   :  { %v922_v19 = vmul.f32 %v1813_v25, %v921_v8 }
 0x83b   :  { %v2150_v33 = vsel %vm925_vm10, %v1813_v25, %v922_v19  ;;  %vm997_vm10 = vmand %vm968_vm1, %vm496_vm4 }
 0x83c   :  { %v935_v39 = vmul.f32 %v934_v32, %v2150_v33 }
 0x83e   :  { %v938_v35 = vsel %vm937_vm3, %v935_v39, 0.0 }
 0x83f   :  { %v939_v36 = vadd.f32 %v938_v35, %v879_v5  ;;  %v888_v37 = vpop.xlane.xlu1 %887  ;;  %v1032_v35 = vld [vmem:[#allocation0 + $0xf] ss:$0 sm:$0xff] }
 0x840   :  { %v889_v29 = vsub.f32 %v2155_v49, %v888_v37 }
 0x841   :  { %941 = vst [vmem:[#allocation1 + $0x8] sm:$0xff] %v939_v36 }
 0x842   :  { %v890_v42 = vmul.f32 %v889_v29, %v2133_v46 }
 0x844   :  { %v891_v40 = vsel %vm848_vm5, %v890_v42, 0.0 }
 0x845   :  { %v892_v41 = vadd.f32 %v891_v40, %v832_v9 }
 0x847   :  { %v946_v43 = vmul.f32 %v2136_v62, %v892_v41 }
 0x848   :  { %v2161_v54 = vld [vmem:[#allocation1 + $0xe] ss:$0 sm:$0xff] }
 0x849   :  { %v973_v44 = vmul.f32 %v2161_v54, %v2161_v54  ;;  %947 = vadd.xlane.f32.xlu2 %v946_v43  ;;  %v991_v45 = vmul.f32 %v2161_v54, %v939_v36 }
 0x84b   :  { %974 = vadd.xlane.f32.xlu0 %v973_v44 }
 0x851   :  { %992 = vadd.xlane.f32.xlu2 %v991_v45 }
 0x857   :  { %v781_v47 = vpop.xlane.xlu1 %780 }
 0x858   :  { %v782_v17 = vsub.f32 %v1971_v23, %v781_v47 }
 0x85a   :  { %v783_v50 = vmul.f32 %v782_v17, %v2091_v48 }
 0x85c   :  { %v784_v51 = vsel %vm728_vm15, %v783_v50, 0.0 }
 0x85d   :  { %v785_v52 = vadd.f32 %v784_v51, %v725_v18 }
 0x85f   :  { %v839_v20 = vmul.f32 %v2096_v59, %v785_v52 }
 0x861   :  { %840 = vadd.xlane.f32.xlu1 %v839_v20 }
 0x8bc   :  { %v948_v55 = vpop.xlane.xlu2 %947 }
 0x8bd   :  { %v949_v56 = vsub.f32 %v2155_v49, %v948_v55 }
 0x8be   :  { %v975_v57 = vpop.xlane.xlu0 %974 }
 0x8bf   :  { %v976_v4 = vsub.f32 %v972_v53, %v975_v57  ;;  %v950_v38 = vmul.f32 %v949_v56, %v2150_v33 }
 0x8c1   :  { %1814 = vrsqrt.f32 %v976_v4  ;;  %v951_v58 = vsel %vm908_vm0, %v950_v38, 0.0  ;;  %vm983_vm11 = vweird.f32 %v976_v4 }
 0x8c2   :  { %v952_v60 = vadd.f32 %v951_v58, %v892_v41  ;;  %v1092_v58 = vld [vmem:[#allocation0 + $0x10] ss:$0 sm:$0xff] }
 0x8c4   :  { %v1006_v48 = vmul.f32 %v2161_v54, %v952_v60  ;;  %v993_v11 = vpop.xlane.xlu2 %992 }
 0x8c5   :  { %v994_v7 = vsub.f32 %v2109_v27, %v993_v11 }
 0x8c6   :  { %1007 = vadd.xlane.f32.xlu0 %v1006_v48 }
 0x8c7   :  { %v1815_v61 = vpop.eup %1814 }
 0x8c8   :  { %v978_v5 = vmul.f32 %v1815_v61, %v976_v4  ;;  %vm984_vm15 = vweird.f32 %v1815_v61 }
 0x8c9   :  { %vm985_vm7 = vmor %vm983_vm11, %vm984_vm15 }
 0x8ca   :  { %v979_v0 = vmul.f32 %v1815_v61, %v978_v5 }
 0x8cc   :  { %v980_v59 = vmul.f32 0.5, %v979_v0 }
 0x8ce   :  { %v981_v63 = vsub.f32 1.5, %v980_v59 }
 0x8d0   :  { %v982_v2 = vmul.f32 %v1815_v61, %v981_v63 }
 0x8d2   :  { %v2175_v6 = vsel %vm985_vm7, %v1815_v61, %v982_v2 }
 0x8d3   :  { %v995_v9 = vmul.f32 %v994_v7, %v2175_v6 }
 0x8d4   :  { %v841_v12 = vpop.xlane.xlu1 %840 }
 0x8d5   :  { %v998_v10 = vsel %vm997_vm10, %v995_v9, 0.0  ;;  %v842_v13 = vsub.f32 %v1971_v23, %v841_v12  ;;  %vm1088_vm10 = vcmask 138368  }
 0x8d6   :  { %v999_v14 = vadd.f32 %v998_v10, %v939_v36 }
 0x8d7   :  { %v843_v16 = vmul.f32 %v842_v13, %v2114_v3 }
 0x8d8   :  { %1001 = vst [vmem:[#allocation1 + $0x8] sm:$0xff] %v999_v14 }
 0x8d9   :  { %v844_v18 = vsel %vm788_vm14, %v843_v16, 0.0 }
 0x8da   :  { %v845_v21 = vadd.f32 %v844_v18, %v785_v52 }
 0x8dc   :  { %v899_v27 = vmul.f32 %v2117_v34, %v845_v21 }
 0x8de   :  { %900 = vadd.xlane.f32.xlu1 %v899_v27 }
 0x8df   :  { %v2184_v15 = vld [vmem:[#allocation1 + $0xf] ss:$0 sm:$0xff] }
 0x8e0   :  { %v1033_v22 = vmul.f32 %v2184_v15, %v2184_v15 }
 0x8e2   :  { %1034 = vadd.xlane.f32.xlu2 %v1033_v22 }
 0x939   :  { %v1008_v24 = vpop.xlane.xlu0 %1007 }
 0x93a   :  { %v1009_v25 = vsub.f32 %v2155_v49, %v1008_v24 }
 0x93c   :  { %v1010_v23 = vmul.f32 %v1009_v25, %v2175_v6 }
 0x93e   :  { %v1011_v26 = vsel %vm968_vm1, %v1010_v23, 0.0 }
 0x93f   :  { %v1012_v3 = vadd.f32 %v1011_v26, %v952_v60 }
 0x941   :  { %v1066_v28 = vmul.f32 %v2184_v15, %v1012_v3 }
 0x943   :  { %1067 = vadd.xlane.f32.xlu0 %v1066_v28 }
 0x951   :  { %v901_v34 = vpop.xlane.xlu1 %900 }
 0x952   :  { %v902_v8 = vsub.f32 %v2192_v30, %v901_v34 }
 0x954   :  { %v903_v31 = vmul.f32 %v902_v8, %v2133_v46 }
 0x955   :  { %v1035_v36 = vpop.xlane.xlu2 %1034 }
 0x956   :  { %v904_v19 = vsel %vm848_vm5, %v903_v31, 0.0  ;;  %v1036_v37 = vsub.f32 %v1032_v35, %v1035_v36  ;;  %vm1028_vm5 = vcmask 130168  }
 0x957   :  { %v905_v32 = vadd.f32 %v904_v19, %v845_v21 }
 0x958   :  { %1816 = vrsqrt.f32 %v1036_v37  ;;  %vm1043_vm3 = vweird.f32 %v1036_v37 }
 0x959   :  { %v959_v39 = vmul.f32 %v2136_v62, %v905_v32 }
 0x95b   :  { %960 = vadd.xlane.f32.xlu1 %v959_v39 }
 0x95e   :  { %v1817_v29 = vpop.eup %1816 }
 0x95f   :  { %v1038_v42 = vmul.f32 %v1817_v29, %v1036_v37  ;;  %vm1044_vm14 = vweird.f32 %v1817_v29 }
 0x960   :  { %vm1045_vm15 = vmor %vm1043_vm3, %vm1044_vm14  ;;  %vm1133_vm14 = vcmask 146568  }
 0x961   :  { %v1039_v40 = vmul.f32 %v1817_v29, %v1038_v42 }
 0x963   :  { %v1040_v41 = vmul.f32 0.5, %v1039_v40 }
 0x965   :  { %v1041_v43 = vsub.f32 1.5, %v1040_v41 }
 0x967   :  { %v1042_v44 = vmul.f32 %v1817_v29, %v1041_v43 }
 0x969   :  { %v2199_v47 = vsel %vm1045_vm15, %v1817_v29, %v1042_v44 }
 0x9b6   :  { %v1068_v45 = vpop.xlane.xlu0 %1067 }
 0x9b7   :  { %v1069_v46 = vsub.f32 %v2155_v49, %v1068_v45 }
 0x9b9   :  { %v1070_v62 = vmul.f32 %v1069_v46, %v2199_v47 }
 0x9bb   :  { %v1071_v17 = vsel %vm1028_vm5, %v1070_v62, 0.0 }
 0x9bc   :  { %v1072_v50 = vadd.f32 %v1071_v17, %v1012_v3  ;;  %v1137_v3 = vld [vmem:[#allocation0 + $0x11] ss:$0 sm:$0xff] }
 0x9be   :  { %1074 = vst [vmem:[#allocation1 + $0x10] sm:$0xff] %v1072_v50 }
 0x9c5   :  { %v1090_v51 = vld [vmem:[#allocation1 + $0x10] ss:$0 sm:$0xff] }
 0x9c6   :  { %v1111_v52 = vmul.f32 %v1090_v51, %v1072_v50  ;;  %v1093_v20 = vmul.f32 %v1090_v51, %v1090_v51 }
 0x9c8   :  { %1112 = vadd.xlane.f32.xlu0 %v1111_v52  ;;  %1094 = vadd.xlane.f32.xlu2 %v1093_v20 }
 0x9ce   :  { %v961_v53 = vpop.xlane.xlu1 %960 }
 0x9cf   :  { %v962_v55 = vsub.f32 %v2192_v30, %v961_v53 }
 0x9d1   :  { %v963_v56 = vmul.f32 %v962_v55, %v2150_v33  ;;  %v1184_v55 = vld [vmem:[#allocation0 + $0x12] ss:$0 sm:$0xff] }
 0x9d3   :  { %v964_v57 = vsel %vm908_vm0, %v963_v56, 0.0 }
 0x9d4   :  { %v965_v4 = vadd.f32 %v964_v57, %v905_v32 }
 0x9d6   :  { %v1019_v38 = vmul.f32 %v2161_v54, %v965_v4 }
 0x9d8   :  { %1020 = vadd.xlane.f32.xlu1 %v1019_v38 }
 0xa3b   :  { %v1095_v60 = vpop.xlane.xlu2 %1094  ;;  %v1113_v63 = vpop.xlane.xlu0 %1112 }
 0xa3c   :  { %v1096_v48 = vsub.f32 %v1092_v58, %v1095_v60  ;;  %v1114_v7 = vsub.f32 %v2155_v49, %v1113_v63 }
 0xa3e   :  { %1818 = vrsqrt.f32 %v1096_v48  ;;  %vm1103_vm7 = vweird.f32 %v1096_v48 }
 0xa44   :  { %v1819_v61 = vpop.eup %1818 }
 0xa45   :  { %v1098_v5 = vmul.f32 %v1819_v61, %v1096_v48  ;;  %vm1104_vm11 = vweird.f32 %v1819_v61 }
 0xa46   :  { %vm1105_vm0 = vmor %vm1103_vm7, %vm1104_vm11 }
 0xa47   :  { %v1099_v0 = vmul.f32 %v1819_v61, %v1098_v5  ;;  %vm1162_vm11 = vmand %vm1133_vm14, %vm146_vm6 }
 0xa49   :  { %v1100_v59 = vmul.f32 0.5, %v1099_v0 }
 0xa4b   :  { %v1101_v11 = vsub.f32 1.5, %v1100_v59  ;;  %v1021_v33 = vpop.xlane.xlu1 %1020 }
 0xa4c   :  { %v1022_v54 = vsub.f32 %v2192_v30, %v1021_v33 }
 0xa4d   :  { %v1102_v2 = vmul.f32 %v1819_v61, %v1101_v11 }
 0xa4e   :  { %v1023_v14 = vmul.f32 %v1022_v54, %v2175_v6 }
 0xa4f   :  { %v1106_v9 = vsel %vm1105_vm0, %v1819_v61, %v1102_v2  ;;  %vm1180_vm0 = vcmask 154768  }
 0xa50   :  { %v1115_v10 = vmul.f32 %v1114_v7, %v1106_v9  ;;  %v1024_v13 = vsel %vm968_vm1, %v1023_v14, 0.0 }
 0xa51   :  { %v1025_v18 = vadd.f32 %v1024_v13, %v965_v4 }
 0xa52   :  { %v1116_v12 = vsel %vm1088_vm10, %v1115_v10, 0.0 }
 0xa53   :  { %v1117_v16 = vadd.f32 %v1116_v12, %v1072_v50  ;;  %v1079_v21 = vmul.f32 %v2184_v15, %v1025_v18 }
 0xa55   :  { %1119 = vst [vmem:[#allocation1 + $0x10] sm:$0xff] %v1117_v16  ;;  %1080 = vadd.xlane.f32.xlu0 %v1079_v21 }
 0xa5c   :  { %v1135_v27 = vld [vmem:[#allocation1 + $0x11] ss:$0 sm:$0xff] }
 0xa5d   :  { %v1138_v22 = vmul.f32 %v1135_v27, %v1135_v27  ;;  %v1156_v24 = vmul.f32 %v1135_v27, %v1117_v16 }
 0xa5f   :  { %1139 = vadd.xlane.f32.xlu2 %v1138_v22  ;;  %1157 = vadd.xlane.f32.xlu1 %v1156_v24 }
 0xac8   :  { %v1081_v25 = vpop.xlane.xlu0 %1080 }
 0xac9   :  { %v1082_v23 = vsub.f32 %v2192_v30, %v1081_v25 }
 0xacb   :  { %v1083_v6 = vmul.f32 %v1082_v23, %v2199_v47 }
 0xacd   :  { %v1084_v26 = vsel %vm1028_vm5, %v1083_v6, 0.0 }
 0xace   :  { %v1085_v28 = vadd.f32 %v1084_v26, %v1025_v18  ;;  %v1231_v18 = vld [vmem:[#allocation0 + $0x13] ss:$0 sm:$0xff] }
 0xad0   :  { %v1124_v8 = vmul.f32 %v1090_v51, %v1085_v28 }
 0xad2   :  { %v1140_v34 = vpop.xlane.xlu2 %1139  ;;  %1125 = vadd.xlane.f32.xlu2 %v1124_v8  ;;  %v1158_v37 = vpop.xlane.xlu1 %1157 }
 0xad3   :  { %v1141_v31 = vsub.f32 %v1137_v3, %v1140_v34  ;;  %v1159_v42 = vsub.f32 %v2155_v49, %v1158_v37 }
 0xad5   :  { %1820 = vrsqrt.f32 %v1141_v31  ;;  %vm1148_vm3 = vweird.f32 %v1141_v31 }
 0xadb   :  { %v1821_v19 = vpop.eup %1820 }
 0xadc   :  { %v1143_v32 = vmul.f32 %v1821_v19, %v1141_v31  ;;  %vm1149_vm1 = vweird.f32 %v1821_v19 }
 0xadd   :  { %vm1150_vm15 = vmor %vm1148_vm3, %vm1149_vm1 }
 0xade   :  { %v1144_v39 = vmul.f32 %v1821_v19, %v1143_v32  ;;  %vm1209_vm3 = vmand %vm1180_vm0, %vm216_vm12 }
 0xae0   :  { %v1145_v35 = vmul.f32 0.5, %v1144_v39 }
 0xae2   :  { %v1146_v36 = vsub.f32 1.5, %v1145_v35 }
 0xae4   :  { %v1147_v29 = vmul.f32 %v1821_v19, %v1146_v36 }
 0xae6   :  { %v1151_v40 = vsel %vm1150_vm15, %v1821_v19, %v1147_v29 }
 0xae7   :  { %v1160_v41 = vmul.f32 %v1159_v42, %v1151_v40 }
 0xae9   :  { %v1163_v43 = vsel %vm1162_vm11, %v1160_v41, 0.0  ;;  %vm1227_vm11 = vcmask 162968  }
 0xaea   :  { %v1164_v44 = vadd.f32 %v1163_v43, %v1117_v16  ;;  %v1278_v43 = vld [vmem:[#allocation0 + $0x14] ss:$0 sm:$0xff] }
 0xaec   :  { %1166 = vst [vmem:[#allocation1 + $0x10] sm:$0xff] %v1164_v44 }
 0xaf3   :  { %v1182_v45 = vld [vmem:[#allocation1 + $0x12] ss:$0 sm:$0xff] }
 0xaf4   :  { %v1203_v46 = vmul.f32 %v1182_v45, %v1164_v44  ;;  %v1185_v62 = vmul.f32 %v1182_v45, %v1182_v45 }
 0xaf6   :  { %1204 = vadd.xlane.f32.xlu1 %v1203_v46  ;;  %1186 = vadd.xlane.f32.xlu0 %v1185_v62 }
 0xb45   :  { %v1126_v17 = vpop.xlane.xlu2 %1125 }
 0xb46   :  { %v1127_v50 = vsub.f32 %v2192_v30, %v1126_v17 }
 0xb48   :  { %v1128_v51 = vmul.f32 %v1127_v50, %v1106_v9 }
 0xb4a   :  { %v1129_v52 = vsel %vm1088_vm10, %v1128_v51, 0.0 }
 0xb4b   :  { %v1130_v20 = vadd.f32 %v1129_v52, %v1085_v28 }
 0xb4d   :  { %v1171_v53 = vmul.f32 %v1135_v27, %v1130_v20 }
 0xb4f   :  { %1172 = vadd.xlane.f32.xlu2 %v1171_v53 }
 0xb69   :  { %v1187_v56 = vpop.xlane.xlu0 %1186  ;;  %v1205_v48 = vpop.xlane.xlu1 %1204 }
 0xb6a   :  { %v1188_v57 = vsub.f32 %v1184_v55, %v1187_v56  ;;  %v1206_v0 = vsub.f32 %v2155_v49, %v1205_v48 }
 0xb6c   :  { %1822 = vrsqrt.f32 %v1188_v57  ;;  %vm1195_vm1 = vweird.f32 %v1188_v57 }
 0xb72   :  { %v1823_v4 = vpop.eup %1822 }
 0xb73   :  { %v1190_v38 = vmul.f32 %v1823_v4, %v1188_v57  ;;  %vm1196_vm7 = vweird.f32 %v1823_v4 }
 0xb74   :  { %vm1197_vm10 = vmor %vm1195_vm1, %vm1196_vm7 }
 0xb75   :  { %v1191_v58 = vmul.f32 %v1823_v4, %v1190_v38  ;;  %vm1256_vm1 = vmand %vm1227_vm11, %vm286_vm2 }
 0xb77   :  { %v1192_v60 = vmul.f32 0.5, %v1191_v58 }
 0xb79   :  { %v1193_v61 = vsub.f32 1.5, %v1192_v60 }
 0xb7b   :  { %v1194_v5 = vmul.f32 %v1823_v4, %v1193_v61 }
 0xb7d   :  { %v1198_v59 = vsel %vm1197_vm10, %v1823_v4, %v1194_v5 }
 0xb7e   :  { %v1207_v63 = vmul.f32 %v1206_v0, %v1198_v59 }
 0xb80   :  { %v1210_v11 = vsel %vm1209_vm3, %v1207_v63, 0.0  ;;  %vm1274_vm3 = vcmask 171168  }
 0xb81   :  { %v1211_v2 = vadd.f32 %v1210_v11, %v1164_v44  ;;  %v1325_v11 = vld [vmem:[#allocation0 + $0x15] ss:$0 sm:$0xff] }
 0xb83   :  { %1213 = vst [vmem:[#allocation1 + $0x10] sm:$0xff] %v1211_v2 }
 0xb8a   :  { %v1229_v33 = vld [vmem:[#allocation1 + $0x13] ss:$0 sm:$0xff] }
 0xb8b   :  { %v1250_v7 = vmul.f32 %v1229_v33, %v1211_v2  ;;  %v1232_v54 = vmul.f32 %v1229_v33, %v1229_v33 }
 0xb8d   :  { %1251 = vadd.xlane.f32.xlu1 %v1250_v7  ;;  %1233 = vadd.xlane.f32.xlu0 %v1232_v54 }
 0xbc2   :  { %v1173_v9 = vpop.xlane.xlu2 %1172 }
 0xbc3   :  { %v1174_v10 = vsub.f32 %v2192_v30, %v1173_v9 }
 0xbc5   :  { %v1175_v14 = vmul.f32 %v1174_v10, %v1151_v40 }
 0xbc7   :  { %v1176_v12 = vsel %vm1133_vm14, %v1175_v14, 0.0 }
 0xbc8   :  { %v1177_v13 = vadd.f32 %v1176_v12, %v1130_v20 }
 0xbca   :  { %v1218_v16 = vmul.f32 %v1182_v45, %v1177_v13 }
 0xbcc   :  { %1219 = vadd.xlane.f32.xlu2 %v1218_v16 }
 0xc00   :  { %v1234_v21 = vpop.xlane.xlu0 %1233  ;;  %v1252_v6 = vpop.xlane.xlu1 %1251 }
 0xc01   :  { %v1235_v27 = vsub.f32 %v1231_v18, %v1234_v21  ;;  %v1253_v28 = vsub.f32 %v2155_v49, %v1252_v6 }
 0xc03   :  { %1824 = vrsqrt.f32 %v1235_v27  ;;  %vm1242_vm7 = vweird.f32 %v1235_v27 }
 0xc09   :  { %v1825_v22 = vpop.eup %1824 }
 0xc0a   :  { %v1237_v24 = vmul.f32 %v1825_v22, %v1235_v27  ;;  %vm1243_vm15 = vweird.f32 %v1825_v22 }
 0xc0b   :  { %vm1244_vm14 = vmor %vm1242_vm7, %vm1243_vm15 }
 0xc0c   :  { %v1238_v25 = vmul.f32 %v1825_v22, %v1237_v24  ;;  %vm1303_vm7 = vmand %vm1274_vm3, %vm356_vm13 }
 0xc0e   :  { %v1239_v23 = vmul.f32 0.5, %v1238_v25 }
 0xc10   :  { %v1240_v26 = vsub.f32 1.5, %v1239_v23 }
 0xc12   :  { %v1241_v3 = vmul.f32 %v1825_v22, %v1240_v26 }
 0xc14   :  { %v1245_v34 = vsel %vm1244_vm14, %v1825_v22, %v1241_v3 }
 0xc15   :  { %v1254_v8 = vmul.f32 %v1253_v28, %v1245_v34 }
 0xc17   :  { %v1257_v31 = vsel %vm1256_vm1, %v1254_v8, 0.0  ;;  %vm1321_vm1 = vcmask 179368  }
 0xc18   :  { %v1258_v19 = vadd.f32 %v1257_v31, %v1211_v2 }
 0xc1a   :  { %1260 = vst [vmem:[#allocation1 + $0x10] sm:$0xff] %v1258_v19 }
 0xc21   :  { %v1276_v32 = vld [vmem:[#allocation1 + $0x14] ss:$0 sm:$0xff] }
 0xc22   :  { %v1297_v39 = vmul.f32 %v1276_v32, %v1258_v19  ;;  %v1279_v35 = vmul.f32 %v1276_v32, %v1276_v32 }
 0xc24   :  { %1298 = vadd.xlane.f32.xlu2 %v1297_v39  ;;  %1280 = vadd.xlane.f32.xlu0 %v1279_v35 }
 0xc3f   :  { %v1220_v36 = vpop.xlane.xlu2 %1219 }
 0xc40   :  { %v1221_v37 = vsub.f32 %v2192_v30, %v1220_v36 }
 0xc42   :  { %v1222_v29 = vmul.f32 %v1221_v37, %v1198_v59  ;;  %v1372_v37 = vld [vmem:[#allocation0 + $0x16] ss:$0 sm:$0xff] }
 0xc44   :  { %v1223_v42 = vsel %vm1180_vm0, %v1222_v29, 0.0 }
 0xc45   :  { %v1224_v40 = vadd.f32 %v1223_v42, %v1177_v13 }
 0xc47   :  { %v1265_v41 = vmul.f32 %v1229_v33, %v1224_v40 }
 0xc49   :  { %1266 = vadd.xlane.f32.xlu1 %v1265_v41 }
 0xc97   :  { %v1281_v44 = vpop.xlane.xlu0 %1280  ;;  %v1299_v51 = vpop.xlane.xlu2 %1298 }
 0xc98   :  { %v1282_v45 = vsub.f32 %v1278_v43, %v1281_v44  ;;  %v1300_v53 = vsub.f32 %v2155_v49, %v1299_v51 }
 0xc9a   :  { %1826 = vrsqrt.f32 %v1282_v45  ;;  %vm1289_vm15 = vweird.f32 %v1282_v45 }
 0xca0   :  { %v1827_v46 = vpop.eup %1826 }
 0xca1   :  { %v1284_v62 = vmul.f32 %v1827_v46, %v1282_v45  ;;  %vm1290_vm10 = vweird.f32 %v1827_v46 }
 0xca2   :  { %vm1291_vm0 = vmor %vm1289_vm15, %vm1290_vm10 }
 0xca3   :  { %v1285_v17 = vmul.f32 %v1827_v46, %v1284_v62  ;;  %vm1350_vm15 = vmand %vm1321_vm1, %vm426_vm8 }
 0xca5   :  { %v1286_v50 = vmul.f32 0.5, %v1285_v17 }
 0xca7   :  { %v1287_v52 = vsub.f32 1.5, %v1286_v50 }
 0xca9   :  { %v1288_v20 = vmul.f32 %v1827_v46, %v1287_v52 }
 0xcab   :  { %v1292_v55 = vsel %vm1291_vm0, %v1827_v46, %v1288_v20  ;;  %vm1368_vm0 = vcmask 187568  }
 0xcac   :  { %v1301_v56 = vmul.f32 %v1300_v53, %v1292_v55 }
 0xcae   :  { %v1304_v57 = vsel %vm1303_vm7, %v1301_v56, 0.0 }
 0xcaf   :  { %v1305_v4 = vadd.f32 %v1304_v57, %v1258_v19 }
 0xcb1   :  { %1307 = vst [vmem:[#allocation1 + $0x10] sm:$0xff] %v1305_v4 }
 0xcb8   :  { %v1323_v38 = vld [vmem:[#allocation1 + $0x15] ss:$0 sm:$0xff] }
 0xcb9   :  { %v1344_v58 = vmul.f32 %v1323_v38, %v1305_v4  ;;  %v1326_v60 = vmul.f32 %v1323_v38, %v1323_v38 }
 0xcbb   :  { %1345 = vadd.xlane.f32.xlu2 %v1344_v58  ;;  %1327 = vadd.xlane.f32.xlu1 %v1326_v60  ;;  %v1419_v60 = vld [vmem:[#allocation0 + $0x17] ss:$0 sm:$0xff] }
 0xcbc   :  { %v1267_v48 = vpop.xlane.xlu1 %1266 }
 0xcbd   :  { %v1268_v61 = vsub.f32 %v2192_v30, %v1267_v48 }
 0xcbf   :  { %v1269_v5 = vmul.f32 %v1268_v61, %v1245_v34 }
 0xcc1   :  { %v1270_v0 = vsel %vm1227_vm11, %v1269_v5, 0.0 }
 0xcc2   :  { %v1271_v59 = vadd.f32 %v1270_v0, %v1224_v40 }
 0xcc4   :  { %v1312_v63 = vmul.f32 %v1276_v32, %v1271_v59 }
 0xcc6   :  { %1313 = vadd.xlane.f32.xlu0 %v1312_v63 }
 0xd2e   :  { %v1328_v2 = vpop.xlane.xlu1 %1327  ;;  %v1346_v13 = vpop.xlane.xlu2 %1345 }
 0xd2f   :  { %v1329_v33 = vsub.f32 %v1325_v11, %v1328_v2  ;;  %v1347_v22 = vsub.f32 %v2155_v49, %v1346_v13 }
 0xd31   :  { %1828 = vrsqrt.f32 %v1329_v33  ;;  %vm1336_vm11 = vweird.f32 %v1329_v33 }
 0xd37   :  { %v1829_v7 = vpop.eup %1828 }
 0xd38   :  { %v1331_v54 = vmul.f32 %v1829_v7, %v1329_v33  ;;  %vm1337_vm14 = vweird.f32 %v1829_v7 }
 0xd39   :  { %v1314_v10 = vpop.xlane.xlu0 %1313  ;;  %vm1338_vm10 = vmor %vm1336_vm11, %vm1337_vm14 }
 0xd3a   :  { %v1332_v9 = vmul.f32 %v1829_v7, %v1331_v54  ;;  %v1315_v12 = vsub.f32 %v2192_v30, %v1314_v10 }
 0xd3c   :  { %v1333_v14 = vmul.f32 0.5, %v1332_v9  ;;  %v1316_v18 = vmul.f32 %v1315_v12, %v1292_v55 }
 0xd3e   :  { %v1334_v16 = vsub.f32 1.5, %v1333_v14  ;;  %v1317_v27 = vsel %vm1274_vm3, %v1316_v18, 0.0  ;;  %v1466_v18 = vld [vmem:[#allocation0 + $0x18] ss:$0 sm:$0xff] }
 0xd3f   :  { %v1318_v24 = vadd.f32 %v1317_v27, %v1271_v59 }
 0xd40   :  { %v1335_v21 = vmul.f32 %v1829_v7, %v1334_v16 }
 0xd41   :  { %v1359_v6 = vmul.f32 %v1323_v38, %v1318_v24 }
 0xd42   :  { %v1339_v25 = vsel %vm1338_vm10, %v1829_v7, %v1335_v21 }
 0xd43   :  { %v1348_v23 = vmul.f32 %v1347_v22, %v1339_v25  ;;  %1360 = vadd.xlane.f32.xlu0 %v1359_v6 }
 0xd45   :  { %v1351_v26 = vsel %vm1350_vm15, %v1348_v23, 0.0 }
 0xd46   :  { %v1352_v3 = vadd.f32 %v1351_v26, %v1305_v4 }
 0xd48   :  { %1354 = vst [vmem:[#allocation1 + $0x10] sm:$0xff] %v1352_v3 }
 0xd4f   :  { %v1370_v28 = vld [vmem:[#allocation1 + $0x16] ss:$0 sm:$0xff] }
 0xd50   :  { %v1391_v34 = vmul.f32 %v1370_v28, %v1352_v3  ;;  %v1373_v8 = vmul.f32 %v1370_v28, %v1370_v28 }
 0xd52   :  { %1392 = vadd.xlane.f32.xlu2 %v1391_v34  ;;  %1374 = vadd.xlane.f32.xlu1 %v1373_v8 }
 0xdb6   :  { %v1361_v31 = vpop.xlane.xlu0 %1360 }
 0xdb7   :  { %v1362_v19 = vsub.f32 %v2192_v30, %v1361_v31 }
 0xdb9   :  { %v1363_v32 = vmul.f32 %v1362_v19, %v1339_v25 }
 0xdbb   :  { %v1364_v39 = vsel %vm1321_vm1, %v1363_v32, 0.0  ;;  %vm1397_vm1 = vmand %vm1368_vm0, %vm496_vm4 }
 0xdbc   :  { %v1365_v35 = vadd.f32 %v1364_v39, %v1318_v24 }
 0xdbe   :  { %v1406_v36 = vmul.f32 %v1370_v28, %v1365_v35 }
 0xdc0   :  { %1407 = vadd.xlane.f32.xlu0 %v1406_v36  ;;  %v1498_v36 = vld [vmem:[#allocation0 + $0x19] ss:$0 sm:$0xff] }
 0xdc5   :  { %v1375_v29 = vpop.xlane.xlu1 %1374  ;;  %v1393_v45 = vpop.xlane.xlu2 %1392 }
 0xdc6   :  { %v1376_v42 = vsub.f32 %v1372_v37, %v1375_v29  ;;  %v1394_v17 = vsub.f32 %v2155_v49, %v1393_v45 }
 0xdc8   :  { %1830 = vrsqrt.f32 %v1376_v42  ;;  %vm1383_vm7 = vweird.f32 %v1376_v42 }
 0xdce   :  { %v1831_v40 = vpop.eup %1830 }
 0xdcf   :  { %v1378_v41 = vmul.f32 %v1831_v40, %v1376_v42  ;;  %vm1384_vm3 = vweird.f32 %v1831_v40 }
 0xdd0   :  { %vm1385_vm14 = vmor %vm1383_vm7, %vm1384_vm3  ;;  %vm1415_vm3 = vcmask 195768  }
 0xdd1   :  { %v1379_v43 = vmul.f32 %v1831_v40, %v1378_v41 }
 0xdd3   :  { %v1380_v44 = vmul.f32 0.5, %v1379_v43 }
 0xdd5   :  { %v1381_v46 = vsub.f32 1.5, %v1380_v44 }
 0xdd7   :  { %v1382_v62 = vmul.f32 %v1831_v40, %v1381_v46 }
 0xdd9   :  { %v1386_v50 = vsel %vm1385_vm14, %v1831_v40, %v1382_v62 }
 0xdda   :  { %v1395_v51 = vmul.f32 %v1394_v17, %v1386_v50 }
 0xddc   :  { %v1398_v52 = vsel %vm1397_vm1, %v1395_v51, 0.0  ;;  %vm1462_vm1 = vcmask 203968  }
 0xddd   :  { %v2246_v20 = vadd.f32 %v1398_v52, %v1352_v3 }
 0xddf   :  { %1401 = vst [vmem:[#allocation1 + $0x10] sm:$0xff] %v2246_v20 }
 0xde6   :  { %v2249_v53 = vld [vmem:[#allocation1 + $0x17] ss:$0 sm:$0xff] }
 0xde7   :  { %v1420_v55 = vmul.f32 %v2249_v53, %v2249_v53 }
 0xde9   :  { %1421 = vadd.xlane.f32.xlu1 %v1420_v55 }
 0xe33   :  { %v1408_v56 = vpop.xlane.xlu0 %1407 }
 0xe34   :  { %v1409_v49 = vsub.f32 %v2192_v30, %v1408_v56 }
 0xe36   :  { %v1410_v57 = vmul.f32 %v1409_v49, %v1386_v50 }
 0xe38   :  { %v1411_v4 = vsel %vm1368_vm0, %v1410_v57, 0.0  ;;  %v1532_v57 = vld [vmem:[#allocation0 + $0x1a] ss:$0 sm:$0xff] }
 0xe39   :  { %v1412_v38 = vadd.f32 %v1411_v4, %v1365_v35 }
 0xe3b   :  { %v1453_v58 = vmul.f32 %v2249_v53, %v1412_v38 }
 0xe3d   :  { %1454 = vadd.xlane.f32.xlu2 %v1453_v58 }
 0xe5c   :  { %v1422_v48 = vpop.xlane.xlu1 %1421 }
 0xe5d   :  { %v1423_v61 = vsub.f32 %v1419_v60, %v1422_v48 }
 0xe5f   :  { %1832 = vrsqrt.f32 %v1423_v61  ;;  %vm1430_vm10 = vweird.f32 %v1423_v61 }
 0xe65   :  { %v1833_v5 = vpop.eup %1832 }
 0xe66   :  { %v1425_v0 = vmul.f32 %v1833_v5, %v1423_v61  ;;  %vm1431_vm11 = vweird.f32 %v1833_v5 }
 0xe67   :  { %vm1432_vm15 = vmor %vm1430_vm10, %vm1431_vm11  ;;  %vm1494_vm10 = vcmask 212168  }
 0xe68   :  { %v1426_v59 = vmul.f32 %v1833_v5, %v1425_v0 }
 0xe6a   :  { %v1427_v63 = vmul.f32 0.5, %v1426_v59 }
 0xe6c   :  { %v1428_v11 = vsub.f32 1.5, %v1427_v63 }
 0xe6e   :  { %v1429_v2 = vmul.f32 %v1833_v5, %v1428_v11 }
 0xe70   :  { %v2257_v54 = vsel %vm1432_vm15, %v1833_v5, %v1429_v2 }
 0xeb0   :  { %v1455_v33 = vpop.xlane.xlu2 %1454 }
 0xeb1   :  { %v1456_v7 = vsub.f32 %v2192_v30, %v1455_v33 }
 0xeb3   :  { %v1457_v9 = vmul.f32 %v1456_v7, %v2257_v54 }
 0xeb5   :  { %v1458_v10 = vsel %vm1415_vm3, %v1457_v9, 0.0 }
 0xeb6   :  { %v1459_v14 = vadd.f32 %v1458_v10, %v1412_v38 }
 0xeb8   :  { %1461 = vst [vmem:[#allocation1 + $0x18] sm:$0xff] %v1459_v14 }
 0xebf   :  { %v1464_v12 = vld [vmem:[#allocation1 + $0x18] ss:$0 sm:$0xff] }
 0xec0   :  { %v1485_v13 = vmul.f32 %v1464_v12, %v1459_v14  ;;  %v1467_v16 = vmul.f32 %v1464_v12, %v1464_v12  ;;  %v1566_v12 = vld [vmem:[#allocation0 + $0x1b] ss:$0 sm:$0xff] }
 0xec2   :  { %1486 = vadd.xlane.f32.xlu1 %v1485_v13  ;;  %1468 = vadd.xlane.f32.xlu0 %v1467_v16 }
 0xf35   :  { %v1469_v21 = vpop.xlane.xlu0 %1468  ;;  %v1487_v6 = vpop.xlane.xlu1 %1486 }
 0xf36   :  { %v1470_v27 = vsub.f32 %v1466_v18, %v1469_v21  ;;  %v1488_v28 = vsub.f32 %v2192_v30, %v1487_v6 }
 0xf38   :  { %1834 = vrsqrt.f32 %v1470_v27  ;;  %vm1477_vm7 = vweird.f32 %v1470_v27 }
 0xf3e   :  { %v1835_v22 = vpop.eup %1834 }
 0xf3f   :  { %v1472_v24 = vmul.f32 %v1835_v22, %v1470_v27  ;;  %vm1478_vm0 = vweird.f32 %v1835_v22 }
 0xf40   :  { %vm1479_vm14 = vmor %vm1477_vm7, %vm1478_vm0 }
 0xf41   :  { %v1473_v25 = vmul.f32 %v1835_v22, %v1472_v24  ;;  %vm1523_vm7 = vmand %vm1494_vm10, %vm146_vm6 }
 0xf43   :  { %v1474_v23 = vmul.f32 0.5, %v1473_v25 }
 0xf45   :  { %v1475_v26 = vsub.f32 1.5, %v1474_v23 }
 0xf47   :  { %v1476_v3 = vmul.f32 %v1835_v22, %v1475_v26 }
 0xf49   :  { %v1480_v34 = vsel %vm1479_vm14, %v1835_v22, %v1476_v3  ;;  %vm1528_vm14 = vcmask 220368  }
 0xf4a   :  { %v1489_v8 = vmul.f32 %v1488_v28, %v1480_v34  ;;  %vm1557_vm10 = vmand %vm1528_vm14, %vm216_vm12  ;;  %vm1596_vm14 = vcmask 236768  }
 0xf4c   :  { %v1490_v31 = vsel %vm1462_vm1, %v1489_v8, 0.0 }
 0xf4d   :  { %v1491_v19 = vadd.f32 %v1490_v31, %v1459_v14 }
 0xf4f   :  { %1493 = vst [vmem:[#allocation1 + $0x18] sm:$0xff] %v1491_v19 }
 0xf56   :  { %v1496_v32 = vld [vmem:[#allocation1 + $0x19] ss:$0 sm:$0xff] }
 0xf57   :  { %v1517_v39 = vmul.f32 %v1496_v32, %v1491_v19  ;;  %v1499_v35 = vmul.f32 %v1496_v32, %v1496_v32  ;;  %v1600_v32 = vld [vmem:[#allocation0 + $0x1c] ss:$0 sm:$0xff] }
 0xf59   :  { %1518 = vadd.xlane.f32.xlu0 %v1517_v39  ;;  %1500 = vadd.xlane.f32.xlu2 %v1499_v35 }
 0xfcc   :  { %v1501_v37 = vpop.xlane.xlu2 %1500  ;;  %v1519_v44 = vpop.xlane.xlu0 %1518 }
 0xfcd   :  { %v1502_v29 = vsub.f32 %v1498_v36, %v1501_v37  ;;  %v1520_v62 = vsub.f32 %v2192_v30, %v1519_v44 }
 0xfcf   :  { %1836 = vrsqrt.f32 %v1502_v29  ;;  %vm1509_vm15 = vweird.f32 %v1502_v29 }
 0xfd5   :  { %v1837_v42 = vpop.eup %1836 }
 0xfd6   :  { %v1504_v40 = vmul.f32 %v1837_v42, %v1502_v29  ;;  %vm1510_vm11 = vweird.f32 %v1837_v42 }
 0xfd7   :  { %vm1511_vm0 = vmor %vm1509_vm15, %vm1510_vm11  ;;  %vm1562_vm15 = vcmask 228568  }
 0xfd8   :  { %v1505_v41 = vmul.f32 %v1837_v42, %v1504_v40 }
 0xfda   :  { %v1506_v43 = vmul.f32 0.5, %v1505_v41 }
 0xfdc   :  { %v1507_v45 = vsub.f32 1.5, %v1506_v43 }
 0xfde   :  { %v1508_v46 = vmul.f32 %v1837_v42, %v1507_v45 }
 0xfe0   :  { %v1512_v17 = vsel %vm1511_vm0, %v1837_v42, %v1508_v46 }
 0xfe1   :  { %v1521_v50 = vmul.f32 %v1520_v62, %v1512_v17 }
 0xfe3   :  { %v1524_v51 = vsel %vm1523_vm7, %v1521_v50, 0.0 }
 0xfe4   :  { %v1525_v52 = vadd.f32 %v1524_v51, %v1491_v19 }
 0xfe6   :  { %1527 = vst [vmem:[#allocation1 + $0x18] sm:$0xff] %v1525_v52 }
 0xfed   :  { %v1530_v55 = vld [vmem:[#allocation1 + $0x1a] ss:$0 sm:$0xff] }
 0xfee   :  { %v1551_v56 = vmul.f32 %v1530_v55, %v1525_v52  ;;  %v1533_v49 = vmul.f32 %v1530_v55, %v1530_v55  ;;  %v1634_v55 = vld [vmem:[#allocation0 + $0x1d] ss:$0 sm:$0xff] }
 0xff0   :  { %1552 = vadd.xlane.f32.xlu2 %v1551_v56  ;;  %1534 = vadd.xlane.f32.xlu1 %v1533_v49 }
0x1063   :  { %v1535_v4 = vpop.xlane.xlu1 %1534  ;;  %v1553_v5 = vpop.xlane.xlu2 %1552 }
0x1064   :  { %v1536_v38 = vsub.f32 %v1532_v57, %v1535_v4  ;;  %v1554_v63 = vsub.f32 %v2192_v30, %v1553_v5 }
0x1066   :  { %1838 = vrsqrt.f32 %v1536_v38  ;;  %vm1543_vm1 = vweird.f32 %v1536_v38 }
0x106c   :  { %v1839_v58 = vpop.eup %1838 }
0x106d   :  { %v1538_v60 = vmul.f32 %v1839_v58, %v1536_v38  ;;  %vm1544_vm6 = vweird.f32 %v1839_v58 }
0x106e   :  { %vm1545_vm11 = vmor %vm1543_vm1, %vm1544_vm6 }
0x106f   :  { %v1539_v48 = vmul.f32 %v1839_v58, %v1538_v60  ;;  %vm1591_vm6 = vmand %vm1562_vm15, %vm286_vm2 }
0x1071   :  { %v1540_v61 = vmul.f32 0.5, %v1539_v48 }
0x1073   :  { %v1541_v0 = vsub.f32 1.5, %v1540_v61 }
0x1075   :  { %v1542_v59 = vmul.f32 %v1839_v58, %v1541_v0 }
0x1077   :  { %v1546_v11 = vsel %vm1545_vm11, %v1839_v58, %v1542_v59 }
0x1078   :  { %v1555_v2 = vmul.f32 %v1554_v63, %v1546_v11 }
0x107a   :  { %v1558_v33 = vsel %vm1557_vm10, %v1555_v2, 0.0  ;;  %vm1625_vm10 = vmand %vm1596_vm14, %vm356_vm13 }
0x107b   :  { %v1559_v7 = vadd.f32 %v1558_v33, %v1525_v52 }
0x107d   :  { %1561 = vst [vmem:[#allocation1 + $0x18] sm:$0xff] %v1559_v7 }
0x1084   :  { %v1564_v9 = vld [vmem:[#allocation1 + $0x1b] ss:$0 sm:$0xff] }
0x1085   :  { %v1585_v10 = vmul.f32 %v1564_v9, %v1559_v7  ;;  %v1567_v14 = vmul.f32 %v1564_v9, %v1564_v9  ;;  %v1050_v9 = vld [vmem:[#allocation1 + $0x8] sm:$0xff] }
0x1087   :  { %1586 = vadd.xlane.f32.xlu1 %v1585_v10  ;;  %1568 = vadd.xlane.f32.xlu0 %v1567_v14  ;;  %v560_v10 = vld [vmem:[#allocation1] sm:$0xff]  ;;  %v1051_v14 = vmul.f32 %v1050_v9, %v2184_v15 }
0x10fa   :  { %v1569_v13 = vpop.xlane.xlu0 %1568  ;;  %v1587_v24 = vpop.xlane.xlu1 %1586 }
0x10fb   :  { %v1570_v16 = vsub.f32 %v1566_v12, %v1569_v13  ;;  %v1588_v6 = vsub.f32 %v2192_v30, %v1587_v24  ;;  %v1850_v12 = vld [vmem:[#allocation1 + $0x7] ss:$0 sm:$0xff] }
0x10fc   :  { %v561_v13 = vmul.f32 %v1850_v12, %v560_v10 }
0x10fd   :  { %1840 = vrsqrt.f32 %v1570_v16  ;;  %vm1577_vm0 = vweird.f32 %v1570_v16 }
0x1103   :  { %v1841_v18 = vpop.eup %1840 }
0x1104   :  { %v1572_v21 = vmul.f32 %v1841_v18, %v1570_v16  ;;  %vm1578_vm12 = vweird.f32 %v1841_v18 }
0x1105   :  { %vm1579_vm7 = vmor %vm1577_vm0, %vm1578_vm12  ;;  %vm1630_vm12 = vcmask 244968  }
0x1106   :  { %v1573_v27 = vmul.f32 %v1841_v18, %v1572_v21 }
0x1108   :  { %v1574_v22 = vmul.f32 0.5, %v1573_v27  ;;  %v1048_v27 = vld [vmem:[#allocation0 + $0x8] sm:$0xff] }
0x110a   :  { %v1575_v25 = vsub.f32 1.5, %v1574_v22  ;;  %v559_v22 = vld [vmem:[#allocation0] sm:$0xff] }
0x110c   :  { %v1576_v23 = vmul.f32 %v1841_v18, %v1575_v25 }
0x110e   :  { %v1580_v26 = vsel %vm1579_vm7, %v1841_v18, %v1576_v23  ;;  %vm1659_vm7 = vmand %vm1630_vm12, %vm426_vm8  ;;  %vm566_vm8 = vcmask 1047559  }
0x110f   :  { %v1589_v3 = vmul.f32 %v1588_v6, %v1580_v26 }
0x1111   :  { %v1592_v28 = vsel %vm1591_vm6, %v1589_v3, 0.0  ;;  %vm1057_vm6 = vmand %vm1028_vm5, %vm566_vm8  ;;  %vm1664_vm5 = vcmask 253168  }
0x1112   :  { %v1593_v34 = vadd.f32 %v1592_v28, %v1559_v7 }
0x1114   :  { %1595 = vst [vmem:[#allocation1 + $0x18] sm:$0xff] %v1593_v34 }
0x111b   :  { %v1598_v8 = vld [vmem:[#allocation1 + $0x1c] ss:$0 sm:$0xff] }
0x111c   :  { %v1619_v31 = vmul.f32 %v1598_v8, %v1593_v34  ;;  %v1601_v19 = vmul.f32 %v1598_v8, %v1598_v8 }
0x111e   :  { %1620 = vadd.xlane.f32.xlu0 %v1619_v31  ;;  %1602 = vadd.xlane.f32.xlu2 %v1601_v19 }
0x1191   :  { %v1603_v39 = vpop.xlane.xlu2 %1602  ;;  %v1621_v40 = vpop.xlane.xlu0 %1620 }
0x1192   :  { %v1604_v35 = vsub.f32 %v1600_v32, %v1603_v39  ;;  %v1622_v44 = vsub.f32 %v2192_v30, %v1621_v40 }
0x1194   :  { %1842 = vrsqrt.f32 %v1604_v35  ;;  %vm1611_vm1 = vweird.f32 %v1604_v35 }
0x119a   :  { %v1843_v36 = vpop.eup %1842 }
0x119b   :  { %v1606_v37 = vmul.f32 %v1843_v36, %v1604_v35  ;;  %vm1612_vm2 = vweird.f32 %v1843_v36  ;;  %v1684_v35 = vld [vmem:[#allocation0 + $0x18] sm:$0xff] }
0x119c   :  { %vm1613_vm11 = vmor %vm1611_vm1, %vm1612_vm2 }
0x119d   :  { %v1607_v29 = vmul.f32 %v1843_v36, %v1606_v37  ;;  %vm567_vm2 = vmand %vm540_vm9, %vm566_vm8 }
0x119f   :  { %v1608_v42 = vmul.f32 0.5, %v1607_v29 }
0x11a1   :  { %v1609_v41 = vsub.f32 1.5, %v1608_v42 }
0x11a3   :  { %v1610_v43 = vmul.f32 %v1843_v36, %v1609_v41 }
0x11a5   :  { %v1614_v45 = vsel %vm1613_vm11, %v1843_v36, %v1610_v43  ;;  %vm1693_vm11 = vmand %vm1664_vm5, %vm496_vm4 }
0x11a6   :  { %v1623_v46 = vmul.f32 %v1622_v44, %v1614_v45  ;;  %v1438_v45 = vmul.f32 %v2249_v53, %v2246_v20  ;;  %vm1444_vm4 = vmand %vm1415_vm3, %vm566_vm8 }
0x11a8   :  { %v1626_v62 = vsel %vm1625_vm10, %v1623_v46, 0.0  ;;  %v1702_v46 = vld [vmem:[#allocation0 + $0x1f] ss:$0 sm:$0xff] }
0x11a9   :  { %v1627_v17 = vadd.f32 %v1626_v62, %v1593_v34 }
0x11ab   :  { %1629 = vst [vmem:[#allocation1 + $0x18] sm:$0xff] %v1627_v17 }
0x11b2   :  { %v1632_v50 = vld [vmem:[#allocation1 + $0x1d] ss:$0 sm:$0xff] }
0x11b3   :  { %v1653_v51 = vmul.f32 %v1632_v50, %v1627_v17  ;;  %v1635_v52 = vmul.f32 %v1632_v50, %v1632_v50  ;;  %v1435_v50 = vld [vmem:[#allocation0 + $0x10] sm:$0xff] }
0x11b5   :  { %1654 = vadd.xlane.f32.xlu2 %v1653_v51  ;;  %1636 = vadd.xlane.f32.xlu1 %v1635_v52 }
0x1228   :  { %v1637_v56 = vpop.xlane.xlu1 %1636  ;;  %v1655_v60 = vpop.xlane.xlu2 %1654 }
0x1229   :  { %v1638_v49 = vsub.f32 %v1634_v55, %v1637_v56  ;;  %v1656_v5 = vsub.f32 %v2192_v30, %v1655_v60  ;;  %v1668_v30 = vld [vmem:[#allocation0 + $0x1e] ss:$0 sm:$0xff] }
0x122b   :  { %1844 = vrsqrt.f32 %v1638_v49  ;;  %vm1645_vm15 = vweird.f32 %v1638_v49 }
0x1231   :  { %v1845_v57 = vpop.eup %1844 }
0x1232   :  { %v1640_v4 = vmul.f32 %v1845_v57, %v1638_v49  ;;  %vm1646_vm13 = vweird.f32 %v1845_v57 }
0x1233   :  { %vm1647_vm0 = vmor %vm1645_vm15, %vm1646_vm13  ;;  %vm1698_vm13 = vcmask 261368  }
0x1234   :  { %v1641_v38 = vmul.f32 %v1845_v57, %v1640_v4  ;;  %vm1727_vm3 = vmand %vm1698_vm13, %vm566_vm8 }
0x1236   :  { %v1642_v58 = vmul.f32 0.5, %v1641_v38 }
0x1238   :  { %v1643_v48 = vsub.f32 1.5, %v1642_v58 }
0x123a   :  { %v1644_v61 = vmul.f32 %v1845_v57, %v1643_v48 }
0x123c   :  { %v1648_v0 = vsel %vm1647_vm0, %v1845_v57, %v1644_v61 }
0x123d   :  { %v1657_v59 = vmul.f32 %v1656_v5, %v1648_v0 }
0x123f   :  { %v1660_v63 = vsel %vm1659_vm7, %v1657_v59, 0.0 }
0x1240   :  { %v1661_v11 = vadd.f32 %v1660_v63, %v1627_v17 }
0x1242   :  { %1663 = vst [vmem:[#allocation1 + $0x18] sm:$0xff] %v1661_v11 }
0x1249   :  { %v1666_v2 = vld [vmem:[#allocation1 + $0x1e] ss:$0 sm:$0xff] }
0x124a   :  { %v1687_v33 = vmul.f32 %v1666_v2, %v1661_v11  ;;  %v1669_v7 = vmul.f32 %v1666_v2, %v1666_v2 }
0x124c   :  { %1688 = vadd.xlane.f32.xlu1 %v1687_v33  ;;  %1670 = vadd.xlane.f32.xlu0 %v1669_v7 }
0x1254   :  { %1052 = vadd.xlane.f32.xlu1 %v1051_v14  ;;  %562 = vadd.xlane.f32.xlu0 %v561_v13 }
0x12bf   :  { %v1689_v16 = vpop.xlane.xlu1 %1688  ;;  %v1671_v18 = vpop.xlane.xlu0 %1670 }
0x12c0   :  { %v1672_v21 = vsub.f32 %v1668_v30, %v1671_v18 }
0x12c2   :  { %1846 = vrsqrt.f32 %v1672_v21  ;;  %vm1679_vm9 = vweird.f32 %v1672_v21 }
0x12c7   :  { %v1053_v24 = vpop.xlane.xlu1 %1052  ;;  %v563_v25 = vpop.xlane.xlu0 %562 }
0x12c8   :  { %v1847_v23 = vpop.eup %1846  ;;  %v1054_v6 = vsub.f32 %v1048_v27, %v1053_v24  ;;  %v564_v15 = vsub.f32 %v559_v22, %v563_v25 }
0x12c9   :  { %v1674_v26 = vmul.f32 %v1847_v23, %v1672_v21  ;;  %vm1680_vm14 = vweird.f32 %v1847_v23 }
0x12ca   :  { %v1055_v3 = vmul.f32 %v1054_v6, %v2199_v47  ;;  %v565_v28 = vmul.f32 %v564_v15, %v2028_v1  ;;  %v1690_v47 = vsub.f32 %v1684_v35, %v1689_v16  ;;  %vm1681_vm1 = vmor %vm1679_vm9, %vm1680_vm14 }
0x12cb   :  { %v1675_v34 = vmul.f32 %v1847_v23, %v1674_v26 }
0x12cc   :  { %v1058_v8 = vsel %vm1057_vm6, %v1055_v3, 0.0  ;;  %v568_v31 = vsel %vm567_vm2, %v565_v28, 0.0 }
0x12cd   :  { %v1676_v19 = vmul.f32 0.5, %v1675_v34  ;;  %v1059_v32 = vadd.f32 %v1058_v8, %v1050_v9  ;;  %v569_v39 = vadd.f32 %v568_v31, %v560_v10 }
0x12cf   :  { %v1677_v36 = vsub.f32 1.5, %v1676_v19  ;;  %1061 = vst [vmem:[#allocation1 + $0x8] sm:$0xff] %v1059_v32 }
0x12d0   :  { %1769 = vst [vmem:[%s2300_s1 + $0x8] sm:$0xff] %v1059_v32 }
0x12d1   :  { %v1678_v37 = vmul.f32 %v1847_v23, %v1677_v36  ;;  %570 = vst [vmem:[#allocation1] sm:$0xff] %v569_v39 }
0x12d2   :  { %1767 = vst [vmem:[%s2300_s1] sm:$0xff] %v569_v39 }
0x12d3   :  { %v1682_v1 = vsel %vm1681_vm1, %v1847_v23, %v1678_v37 }
0x12d4   :  { %v1691_v29 = vmul.f32 %v1690_v47, %v1682_v1 }
0x12d6   :  { %v1694_v42 = vsel %vm1693_vm11, %v1691_v29, 0.0 }
0x12d7   :  { %v1695_v40 = vadd.f32 %v1694_v42, %v1661_v11 }
0x12d9   :  { %1697 = vst [vmem:[#allocation1 + $0x18] sm:$0xff] %v1695_v40 }
0x12e0   :  { %v1700_v41 = vld [vmem:[#allocation1 + $0x1f] ss:$0 sm:$0xff] }
0x12e1   :  { %v1721_v43 = vmul.f32 %v1700_v41, %v1695_v40  ;;  %v1703_v44 = vmul.f32 %v1700_v41, %v1700_v41 }
0x12e3   :  { %1722 = vadd.xlane.f32.xlu0 %v1721_v43  ;;  %1704 = vadd.xlane.f32.xlu2 %v1703_v44 }
0x12eb   :  { %1439 = vadd.xlane.f32.xlu2 %v1438_v45 }
0x1356   :  { %v1705_v62 = vpop.xlane.xlu2 %1704  ;;  %v1723_v60 = vpop.xlane.xlu0 %1722 }
0x1357   :  { %v1706_v17 = vsub.f32 %v1702_v46, %v1705_v62  ;;  %v1724_v61 = vsub.f32 %v1684_v35, %v1723_v60 }
0x1359   :  { %1848 = vrsqrt.f32 %v1706_v17  ;;  %vm1713_vm12 = vweird.f32 %v1706_v17 }
0x135e   :  { %v1440_v51 = vpop.xlane.xlu2 %1439 }
0x135f   :  { %v1849_v52 = vpop.eup %1848  ;;  %v1441_v55 = vsub.f32 %v1435_v50, %v1440_v51 }
0x1360   :  { %v1708_v56 = vmul.f32 %v1849_v52, %v1706_v17  ;;  %vm1714_vm10 = vweird.f32 %v1849_v52 }
0x1361   :  { %v1442_v49 = vmul.f32 %v1441_v55, %v2257_v54  ;;  %vm1715_vm15 = vmor %vm1713_vm12, %vm1714_vm10 }
0x1362   :  { %v1709_v57 = vmul.f32 %v1849_v52, %v1708_v56 }
0x1363   :  { %v1445_v4 = vsel %vm1444_vm4, %v1442_v49, 0.0 }
0x1364   :  { %v1710_v38 = vmul.f32 0.5, %v1709_v57  ;;  %v1446_v53 = vadd.f32 %v1445_v4, %v2246_v20 }
0x1366   :  { %v1711_v58 = vsub.f32 1.5, %v1710_v38  ;;  %1448 = vst [vmem:[#allocation1 + $0x10] sm:$0xff] %v1446_v53 }
0x1367   :  { %1771 = vst [vmem:[%s2300_s1 + $0x10] sm:$0xff] %v1446_v53 }
0x1368   :  { %v1712_v48 = vmul.f32 %v1849_v52, %v1711_v58 }
0x136a   :  { %v1716_v5 = vsel %vm1715_vm15, %v1849_v52, %v1712_v48 }
0x136b   :  { %v1725_v54 = vmul.f32 %v1724_v61, %v1716_v5 }
0x136d   :  { %v1728_v0 = vsel %vm1727_vm3, %v1725_v54, 0.0 }
0x136e   :  { %v1729_v59 = vadd.f32 %v1728_v0, %v1695_v40 }
0x1370   :  { %1731 = vst [vmem:[#allocation1 + $0x18] sm:$0xff] %v1729_v59 }
0x1371   :  { %1773 = vst [vmem:[%s2300_s1 + $0x18] sm:$0xff] %v1729_v59 }

// kernel: custom-call.89
= control target key start
LH: loop header
LB: loop body
LE: loop exit
PB: predicated region body
PF: predicated region fallthrough
CT: control target
= control target key end

     0   :  { %v47_v0 = vlaneseq  ;;  %v836_v18 = vmov -1.0   ;;  %v837_v61 = vmov 0.0   ;;  %s1040_s0 = inlined_call_operand.vmem [shape: f32[1,32,32], index: 0, kind: input, shape index: {}]   ;;  %s1041_s1 = inlined_call_operand.vmem [shape: f32[1,32,32], index: 1, kind: output, shape index: {}]  }
   0x1   :  { %v36_v1 = vld [vmem:[%s1040_s0] sm:$0xff]  ;;  %v38_v39 = vld [vmem:[%s1040_s0 + $0x8] sm:$0xff] }
   0x2   :  { %v851_v2 = vand.u32 127, %v47_v0  ;;  %v853_v3 = vshrl.u32 %v47_v0, 7 }
   0x4   :  { %vm53_vm0 = vcmp.eq.s32.totalorder %v853_v3, %v851_v2  ;;  %vm49_vm1 = vcmp.lt.s32.totalorder %v851_v2, 32  ;;  %vm58_vm2 = vcmp.ge.s32.totalorder %v853_v3, %v851_v2  ;;  %vm172_vm8 = vcmp.eq.s32.totalorder %v851_v2, 0 }
   0x5   :  { %v55_v4 = vsel %vm53_vm0, %v36_v1, 0.0  ;;  %vm59_vm3 = vmand %vm58_vm2, %vm49_vm1  ;;  %vm169_vm9 = vcmp.eq.s32.totalorder %v851_v2, %v853_v3  ;;  %v173_v19 = vsel %vm172_vm8, 1.0, %v836_v18  ;;  %vm201_vm10 = vcmp.eq.s32.totalorder %v851_v2, 1 }
   0x6   :  { %56 = vadd.xlane.f32.xlu0 %v55_v4  ;;  %v60_v13 = vsel %vm59_vm3, %v36_v1, 0.0  ;;  %v174_v20 = vsel %vm169_vm9, %v173_v19, 0.0  ;;  %vm211_vm11 = vcmp.eq.s32.totalorder %v851_v2, 2  ;;  %vm221_vm12 = vcmp.eq.s32.totalorder %v851_v2, 3 }
   0x7   :  { %v81_v40 = vadd.s32 8, %v853_v3  ;;  %vm231_vm14 = vcmp.eq.s32.totalorder %v851_v2, 4  ;;  %vm241_vm8 = vcmp.eq.s32.totalorder %v851_v2, 5  ;;  %vm251_vm9 = vcmp.eq.s32.totalorder %v851_v2, 6 }
   0x9   :  { %vm82_vm13 = vcmp.eq.s32.totalorder %v81_v40, %v851_v2  ;;  %vm87_vm15 = vcmp.ge.s32.totalorder %v81_v40, %v851_v2 }
   0xa   :  { %v84_v41 = vsel %vm82_vm13, %v38_v39, 0.0  ;;  %vm88_vm3 = vmand %vm87_vm15, %vm49_vm1  ;;  %vm299_vm13 = vcmp.eq.s32.totalorder %v851_v2, 10  ;;  %vm327_vm15 = vcmp.eq.s32.totalorder %v851_v2, 12 }
   0xb   :  { %v89_v56 = vsel %vm88_vm3, %v38_v39, 0.0  ;;  %vm341_vm3 = vcmp.eq.s32.totalorder %v851_v2, 13 }
  0x79   :  { %v857_v5 = vpop.xlane.xlu0 %56 }
  0x7a   :  { %828 = vrcp.f32 %v857_v5  ;;  %v72_v9 = vand.u32 2147483648, %v857_v5  ;;  %v70_v11 = vand.u32 2147483647, %v857_v5  ;;  %vm66_vm5 = vweird.f32 %v857_v5 }
  0x7c   :  { %v73_v14 = vor.u32 1.1754944e-38, %v72_v9  ;;  %vm71_vm7 = vcmp.eq.f32.partialorder %v70_v11, 8.507059e+37 }
  0x80   :  { %v829_v6 = vpop.eup %828 }
  0x81   :  { %v62_v7 = vmul.f32 %v829_v6, %v857_v5  ;;  %vm67_vm4 = vweird.f32 %v829_v6 }
  0x82   :  { %vm68_vm6 = vmor %vm66_vm5, %vm67_vm4 }
  0x83   :  { %v63_v8 = vsub.f32 1.0, %v62_v7 }
  0x85   :  { %v64_v10 = vmul.f32 %v829_v6, %v63_v8 }
  0x87   :  { %v65_v12 = vadd.f32 %v829_v6, %v64_v10 }
  0x89   :  { %v69_v15 = vsel %vm68_vm6, %v829_v6, %v65_v12 }
  0x8a   :  { %v871_v16 = vsel %vm71_vm7, %v73_v14, %v69_v15  ;;  %vm180_vm7 = vcmp.eq.s32.totalorder %v851_v2, %v81_v40 }
  0x8b   :  { %v75_v17 = vmul.f32 %v871_v16, %v60_v13  ;;  %v181_v62 = vsel %vm180_vm7, -1.0, %v837_v61 }
  0x8d   :  { %76 = vst [vmem:[#allocation2] sm:$0xff] %v75_v17 }
  0x94   :  { %v197_v21 = vld [vmem:[#allocation2 + $0x1] ss:$0 sm:$0xff]  ;;  %v207_v24 = vld [vmem:[#allocation2 + $0x2] ss:$0 sm:$0xff]  ;;  %v217_v29 = vld [vmem:[#allocation2 + $0x3] ss:$0 sm:$0xff] }
  0x95   :  { %v198_v22 = vxor.u32 2147483648, %v197_v21  ;;  %v208_v26 = vxor.u32 2147483648, %v207_v24  ;;  %v218_v31 = vxor.u32 2147483648, %v217_v29  ;;  %v227_v34 = vld [vmem:[#allocation2 + $0x4] ss:$0 sm:$0xff] }
  0x96   :  { %v228_v36 = vxor.u32 2147483648, %v227_v34  ;;  %v237_v42 = vld [vmem:[#allocation2 + $0x5] ss:$0 sm:$0xff]  ;;  %v247_v60 = vld [vmem:[#allocation2 + $0x6] ss:$0 sm:$0xff] }
  0x97   :  { %v202_v23 = vmul.f32 %v198_v22, %v174_v20  ;;  %v238_v44 = vxor.u32 2147483648, %v237_v42  ;;  %v248_v1 = vxor.u32 2147483648, %v247_v60  ;;  %v257_v9 = vld [vmem:[#allocation2 + $0x7] ss:$0 sm:$0xff] }
  0x98   :  { %v258_v11 = vxor.u32 2147483648, %v257_v9 }
  0x99   :  { %203 = vadd.xlane.f32.xlu0 %v202_v23 }
 0x10c   :  { %v204_v25 = vpop.xlane.xlu0 %203 }
 0x10d   :  { %v205_v27 = vsel %vm201_vm10, %v204_v25, %v174_v20  ;;  %vm261_vm10 = vcmp.eq.s32.totalorder %v851_v2, 7 }
 0x10e   :  { %v212_v28 = vmul.f32 %v208_v26, %v205_v27 }
 0x110   :  { %213 = vadd.xlane.f32.xlu1 %v212_v28 }
 0x183   :  { %v214_v30 = vpop.xlane.xlu1 %213 }
 0x184   :  { %v215_v32 = vsel %vm211_vm11, %v214_v30, %v205_v27  ;;  %vm271_vm11 = vcmp.eq.s32.totalorder %v851_v2, 8 }
 0x185   :  { %v222_v33 = vmul.f32 %v218_v31, %v215_v32 }
 0x187   :  { %223 = vadd.xlane.f32.xlu1 %v222_v33 }
 0x18f   :  { %85 = vadd.xlane.f32.xlu1 %v84_v41 }
 0x1fa   :  { %v224_v35 = vpop.xlane.xlu1 %223 }
 0x1fb   :  { %v225_v37 = vsel %vm221_vm12, %v224_v35, %v215_v32  ;;  %vm285_vm12 = vcmp.eq.s32.totalorder %v851_v2, 9 }
 0x1fc   :  { %v232_v38 = vmul.f32 %v228_v36, %v225_v37 }
 0x1fe   :  { %233 = vadd.xlane.f32.xlu2 %v232_v38 }
 0x202   :  { %v886_v47 = vpop.xlane.xlu1 %85 }
 0x203   :  { %830 = vrcp.f32 %v886_v47  ;;  %v101_v50 = vand.u32 2147483648, %v886_v47  ;;  %vm95_vm0 = vweird.f32 %v886_v47  ;;  %v99_v52 = vand.u32 2147483647, %v886_v47 }
 0x205   :  { %v102_v54 = vor.u32 1.1754944e-38, %v101_v50  ;;  %vm100_vm6 = vcmp.eq.f32.partialorder %v99_v52, 8.507059e+37 }
 0x209   :  { %v831_v48 = vpop.eup %830 }
 0x20a   :  { %v91_v49 = vmul.f32 %v831_v48, %v886_v47  ;;  %vm96_vm2 = vweird.f32 %v831_v48 }
 0x20b   :  { %vm97_vm4 = vmor %vm95_vm0, %vm96_vm2 }
 0x20c   :  { %v92_v51 = vsub.f32 1.0, %v91_v49 }
 0x20e   :  { %v93_v53 = vmul.f32 %v831_v48, %v92_v51 }
 0x210   :  { %v94_v55 = vadd.f32 %v831_v48, %v93_v53 }
 0x212   :  { %v98_v57 = vsel %vm97_vm4, %v831_v48, %v94_v55 }
 0x213   :  { %v898_v58 = vsel %vm100_vm6, %v102_v54, %v98_v57  ;;  %v40_v57 = vld [vmem:[%s1040_s0 + $0x10] sm:$0xff] }
 0x214   :  { %v104_v59 = vmul.f32 %v898_v58, %v89_v56  ;;  %v110_v56 = vadd.s32 16, %v853_v3 }
 0x216   :  { %105 = vst [vmem:[#allocation2 + $0x8] sm:$0xff] %v104_v59  ;;  %vm111_vm2 = vcmp.eq.s32.totalorder %v110_v56, %v851_v2  ;;  %vm116_vm4 = vcmp.ge.s32.totalorder %v110_v56, %v851_v2 }
 0x217   :  { %v113_v59 = vsel %vm111_vm2, %v40_v57, 0.0  ;;  %vm419_vm2 = vcmp.eq.s32.totalorder %v851_v2, 18 }
 0x21d   :  { %v267_v63 = vld [vmem:[#allocation2 + $0x8] ss:$0 sm:$0xff]  ;;  %v281_v18 = vld [vmem:[#allocation2 + $0x9] ss:$0 sm:$0xff]  ;;  %v295_v26 = vld [vmem:[#allocation2 + $0xa] ss:$0 sm:$0xff] }
 0x21e   :  { %v268_v4 = vxor.u32 2147483648, %v267_v63  ;;  %v282_v20 = vxor.u32 2147483648, %v281_v18  ;;  %v296_v28 = vxor.u32 2147483648, %v295_v26  ;;  %v309_v34 = vld [vmem:[#allocation2 + $0xb] ss:$0 sm:$0xff] }
 0x21f   :  { %v310_v36 = vxor.u32 2147483648, %v309_v34  ;;  %v323_v42 = vld [vmem:[#allocation2 + $0xc] ss:$0 sm:$0xff]  ;;  %v337_v51 = vld [vmem:[#allocation2 + $0xd] ss:$0 sm:$0xff] }
 0x220   :  { %v276_v8 = vmul.f32 %v268_v4, %v181_v62  ;;  %v338_v53 = vxor.u32 2147483648, %v337_v51 }
 0x222   :  { %277 = vadd.xlane.f32.xlu1 %v276_v8 }
 0x271   :  { %v234_v43 = vpop.xlane.xlu2 %233 }
 0x272   :  { %v235_v45 = vsel %vm231_vm14, %v234_v43, %v225_v37  ;;  %vm313_vm14 = vcmp.eq.s32.totalorder %v851_v2, 11 }
 0x273   :  { %v242_v46 = vmul.f32 %v238_v44, %v235_v45  ;;  %v324_v44 = vxor.u32 2147483648, %v323_v42 }
 0x275   :  { %243 = vadd.xlane.f32.xlu2 %v242_v46 }
 0x295   :  { %v278_v19 = vpop.xlane.xlu1 %277 }
 0x296   :  { %v279_v21 = vsel %vm271_vm11, %v278_v19, %v181_v62 }
 0x297   :  { %v290_v22 = vmul.f32 %v282_v20, %v279_v21 }
 0x2e8   :  { %v244_v0 = vpop.xlane.xlu2 %243 }
 0x2e9   :  { %v245_v6 = vsel %vm241_vm8, %v244_v0, %v235_v45  ;;  %v351_v0 = vld [vmem:[#allocation2 + $0xe] ss:$0 sm:$0xff]  ;;  %vm117_vm8 = vmand %vm116_vm4, %vm49_vm1  ;;  %vm455_vm4 = vcmp.eq.s32.totalorder %v851_v2, 20 }
 0x2ea   :  { %v252_v7 = vmul.f32 %v248_v1, %v245_v6  ;;  %v118_v18 = vsel %vm117_vm8, %v40_v57, 0.0 }
 0x2ec   :  { %253 = vadd.xlane.f32.xlu0 %v252_v7 }
 0x35f   :  { %v254_v10 = vpop.xlane.xlu0 %253 }
 0x360   :  { %v255_v12 = vsel %vm251_vm9, %v254_v10, %v245_v6 }
 0x361   :  { %v262_v13 = vmul.f32 %v258_v11, %v255_v12 }
 0x363   :  { %263 = vadd.xlane.f32.xlu2 %v262_v13 }
 0x3d6   :  { %v264_v14 = vpop.xlane.xlu2 %263 }
 0x3d7   :  { %v265_v15 = vsel %vm261_vm10, %v264_v14, %v255_v12 }
 0x3d8   :  { %v272_v17 = vmul.f32 %v268_v4, %v265_v15  ;;  %v352_v4 = vxor.u32 2147483648, %v351_v0 }
 0x3da   :  { %273 = vadd.xlane.f32.xlu0 %v272_v17 }
 0x3e2   :  { %291 = vadd.xlane.f32.xlu0 %v290_v22 }
 0x44d   :  { %v274_v23 = vpop.xlane.xlu0 %273 }
 0x44e   :  { %v275_v24 = vsel %vm271_vm11, %v274_v23, %v265_v15  ;;  %vm355_vm11 = vcmp.eq.s32.totalorder %v851_v2, 14 }
 0x44f   :  { %v286_v25 = vmul.f32 %v282_v20, %v275_v24 }
 0x451   :  { %287 = vadd.xlane.f32.xlu2 %v286_v25  ;;  %v365_v25 = vld [vmem:[#allocation2 + $0xf] ss:$0 sm:$0xff] }
 0x455   :  { %v292_v27 = vpop.xlane.xlu0 %291 }
 0x456   :  { %v293_v29 = vsel %vm285_vm12, %v292_v27, %v279_v21  ;;  %v366_v27 = vxor.u32 2147483648, %v365_v25 }
 0x457   :  { %v304_v30 = vmul.f32 %v296_v28, %v293_v29 }
 0x459   :  { %305 = vadd.xlane.f32.xlu2 %v304_v30 }
 0x4c4   :  { %v288_v31 = vpop.xlane.xlu2 %287 }
 0x4c5   :  { %v289_v32 = vsel %vm285_vm12, %v288_v31, %v275_v24  ;;  %vm187_vm12 = vcmp.eq.s32.totalorder %v851_v2, %v110_v56 }
 0x4c6   :  { %v300_v33 = vmul.f32 %v296_v28, %v289_v32 }
 0x4c8   :  { %301 = vadd.xlane.f32.xlu1 %v300_v33 }
 0x4cc   :  { %v306_v35 = vpop.xlane.xlu2 %305 }
 0x4cd   :  { %v307_v37 = vsel %vm299_vm13, %v306_v35, %v293_v29 }
 0x4ce   :  { %v318_v38 = vmul.f32 %v310_v36, %v307_v37 }
 0x4d0   :  { %319 = vadd.xlane.f32.xlu1 %v318_v38 }
 0x53b   :  { %v302_v39 = vpop.xlane.xlu1 %301 }
 0x53c   :  { %v303_v40 = vsel %vm299_vm13, %v302_v39, %v289_v32  ;;  %v188_v32 = vsel %vm187_vm12, -1.0, %v837_v61  ;;  %vm369_vm13 = vcmp.eq.s32.totalorder %v851_v2, 15 }
 0x53d   :  { %v314_v41 = vmul.f32 %v310_v36, %v303_v40 }
 0x53f   :  { %315 = vadd.xlane.f32.xlu0 %v314_v41 }
 0x543   :  { %v320_v43 = vpop.xlane.xlu1 %319 }
 0x544   :  { %v321_v45 = vsel %vm313_vm14, %v320_v43, %v307_v37 }
 0x545   :  { %v332_v46 = vmul.f32 %v324_v44, %v321_v45 }
 0x547   :  { %333 = vadd.xlane.f32.xlu0 %v332_v46 }
 0x5b2   :  { %v316_v48 = vpop.xlane.xlu0 %315 }
 0x5b3   :  { %v317_v49 = vsel %vm313_vm14, %v316_v48, %v303_v40  ;;  %vm383_vm14 = vcmp.eq.s32.totalorder %v851_v2, 16 }
 0x5b4   :  { %v328_v50 = vmul.f32 %v324_v44, %v317_v49 }
 0x5b6   :  { %329 = vadd.xlane.f32.xlu2 %v328_v50 }
 0x5ba   :  { %v334_v52 = vpop.xlane.xlu0 %333 }
 0x5bb   :  { %v335_v54 = vsel %vm327_vm15, %v334_v52, %v321_v45 }
 0x5bc   :  { %v346_v55 = vmul.f32 %v338_v53, %v335_v54 }
 0x5be   :  { %347 = vadd.xlane.f32.xlu2 %v346_v55 }
 0x5c6   :  { %114 = vadd.xlane.f32.xlu2 %v113_v59 }
 0x629   :  { %v330_v60 = vpop.xlane.xlu2 %329 }
 0x62a   :  { %v331_v62 = vsel %vm327_vm15, %v330_v60, %v317_v49  ;;  %vm401_vm15 = vcmp.eq.s32.totalorder %v851_v2, 17 }
 0x62b   :  { %v342_v63 = vmul.f32 %v338_v53, %v331_v62 }
 0x62d   :  { %343 = vadd.xlane.f32.xlu1 %v342_v63 }
 0x631   :  { %v348_v1 = vpop.xlane.xlu2 %347 }
 0x632   :  { %v349_v6 = vsel %vm341_vm3, %v348_v1, %v335_v54 }
 0x633   :  { %v360_v7 = vmul.f32 %v352_v4, %v349_v6 }
 0x635   :  { %361 = vadd.xlane.f32.xlu1 %v360_v7 }
 0x639   :  { %v919_v8 = vpop.xlane.xlu2 %114 }
 0x63a   :  { %832 = vrcp.f32 %v919_v8  ;;  %v130_v11 = vand.u32 2147483648, %v919_v8  ;;  %vm124_vm6 = vweird.f32 %v919_v8  ;;  %v128_v13 = vand.u32 2147483647, %v919_v8 }
 0x63c   :  { %v131_v15 = vor.u32 1.1754944e-38, %v130_v11  ;;  %vm129_vm10 = vcmp.eq.f32.partialorder %v128_v13, 8.507059e+37 }
 0x640   :  { %v833_v9 = vpop.eup %832 }
 0x641   :  { %v120_v10 = vmul.f32 %v833_v9, %v919_v8  ;;  %vm125_vm7 = vweird.f32 %v833_v9 }
 0x642   :  { %vm126_vm9 = vmor %vm124_vm6, %vm125_vm7  ;;  %vm473_vm7 = vcmp.eq.s32.totalorder %v851_v2, 21 }
 0x643   :  { %v121_v12 = vsub.f32 1.0, %v120_v10 }
 0x645   :  { %v122_v14 = vmul.f32 %v833_v9, %v121_v12 }
 0x647   :  { %v123_v17 = vadd.f32 %v833_v9, %v122_v14 }
 0x649   :  { %v127_v19 = vsel %vm126_vm9, %v833_v9, %v123_v17  ;;  %vm491_vm9 = vcmp.eq.s32.totalorder %v851_v2, 22 }
 0x64a   :  { %v931_v20 = vsel %vm129_vm10, %v131_v15, %v127_v19 }
 0x64b   :  { %v133_v21 = vmul.f32 %v931_v20, %v118_v18 }
 0x64d   :  { %134 = vst [vmem:[#allocation2 + $0x10] sm:$0xff] %v133_v21 }
 0x654   :  { %v379_v29 = vld [vmem:[#allocation2 + $0x10] ss:$0 sm:$0xff]  ;;  %v397_v40 = vld [vmem:[#allocation2 + $0x11] ss:$0 sm:$0xff]  ;;  %v415_v52 = vld [vmem:[#allocation2 + $0x12] ss:$0 sm:$0xff] }
 0x655   :  { %v380_v31 = vxor.u32 2147483648, %v379_v29  ;;  %v398_v41 = vxor.u32 2147483648, %v397_v40  ;;  %v416_v54 = vxor.u32 2147483648, %v415_v52  ;;  %v433_v1 = vld [vmem:[#allocation2 + $0x13] ss:$0 sm:$0xff] }
 0x656   :  { %v451_v17 = vld [vmem:[#allocation2 + $0x14] ss:$0 sm:$0xff]  ;;  %v469_v29 = vld [vmem:[#allocation2 + $0x15] ss:$0 sm:$0xff]  ;;  %v487_v40 = vld [vmem:[#allocation2 + $0x16] ss:$0 sm:$0xff] }
 0x657   :  { %v392_v33 = vmul.f32 %v380_v31, %v188_v32  ;;  %v452_v19 = vxor.u32 2147483648, %v451_v17 }
 0x6a0   :  { %v344_v22 = vpop.xlane.xlu1 %343 }
 0x6a1   :  { %v345_v23 = vsel %vm341_vm3, %v344_v22, %v331_v62  ;;  %vm437_vm3 = vcmp.eq.s32.totalorder %v851_v2, 19 }
 0x6a2   :  { %v356_v24 = vmul.f32 %v352_v4, %v345_v23 }
 0x6a4   :  { %357 = vadd.xlane.f32.xlu0 %v356_v24 }
 0x6a8   :  { %v362_v26 = vpop.xlane.xlu1 %361 }
 0x6a9   :  { %v363_v28 = vsel %vm355_vm11, %v362_v26, %v349_v6  ;;  %v434_v6 = vxor.u32 2147483648, %v433_v1 }
 0x6aa   :  { %v374_v30 = vmul.f32 %v366_v27, %v363_v28 }
 0x6ac   :  { %375 = vadd.xlane.f32.xlu1 %v374_v30 }
 0x6b4   :  { %393 = vadd.xlane.f32.xlu1 %v392_v33 }
 0x717   :  { %v358_v34 = vpop.xlane.xlu0 %357 }
 0x718   :  { %v359_v35 = vsel %vm355_vm11, %v358_v34, %v345_v23 }
 0x719   :  { %v370_v36 = vmul.f32 %v366_v27, %v359_v35 }
 0x71b   :  { %371 = vadd.xlane.f32.xlu0 %v370_v36 }
 0x71f   :  { %v376_v37 = vpop.xlane.xlu1 %375 }
 0x720   :  { %v377_v38 = vsel %vm369_vm13, %v376_v37, %v363_v28 }
 0x721   :  { %v388_v39 = vmul.f32 %v380_v31, %v377_v38 }
 0x723   :  { %389 = vadd.xlane.f32.xlu0 %v388_v39 }
 0x727   :  { %v394_v42 = vpop.xlane.xlu1 %393 }
 0x728   :  { %v395_v43 = vsel %vm383_vm14, %v394_v42, %v188_v32  ;;  %v488_v42 = vxor.u32 2147483648, %v487_v40 }
 0x729   :  { %v410_v44 = vmul.f32 %v398_v41, %v395_v43 }
 0x72b   :  { %411 = vadd.xlane.f32.xlu1 %v410_v44 }
 0x78e   :  { %v372_v45 = vpop.xlane.xlu0 %371 }
 0x78f   :  { %v373_v46 = vsel %vm369_vm13, %v372_v45, %v359_v35 }
 0x790   :  { %v384_v48 = vmul.f32 %v380_v31, %v373_v46  ;;  %v470_v31 = vxor.u32 2147483648, %v469_v29 }
 0x792   :  { %385 = vadd.xlane.f32.xlu2 %v384_v48 }
 0x796   :  { %v390_v49 = vpop.xlane.xlu0 %389 }
 0x797   :  { %v391_v50 = vsel %vm383_vm14, %v390_v49, %v377_v38 }
 0x798   :  { %v406_v51 = vmul.f32 %v398_v41, %v391_v50 }
 0x79a   :  { %407 = vadd.xlane.f32.xlu0 %v406_v51 }
 0x79e   :  { %v412_v53 = vpop.xlane.xlu1 %411 }
 0x79f   :  { %v413_v55 = vsel %vm401_vm15, %v412_v53, %v395_v43 }
 0x7a0   :  { %v428_v56 = vmul.f32 %v416_v54, %v413_v55 }
 0x7a2   :  { %429 = vadd.xlane.f32.xlu1 %v428_v56  ;;  %v505_v56 = vld [vmem:[#allocation2 + $0x17] ss:$0 sm:$0xff] }
 0x805   :  { %v386_v57 = vpop.xlane.xlu2 %385 }
 0x806   :  { %v387_v59 = vsel %vm383_vm14, %v386_v57, %v373_v46  ;;  %v42_v57 = vld [vmem:[%s1040_s0 + $0x18] sm:$0xff] }
 0x807   :  { %v402_v60 = vmul.f32 %v398_v41, %v387_v59 }
 0x809   :  { %403 = vadd.xlane.f32.xlu2 %v402_v60  ;;  %v506_v60 = vxor.u32 2147483648, %v505_v56 }
 0x80d   :  { %v408_v62 = vpop.xlane.xlu0 %407 }
 0x80e   :  { %v409_v63 = vsel %vm401_vm15, %v408_v62, %v391_v50 }
 0x80f   :  { %v424_v0 = vmul.f32 %v416_v54, %v409_v63 }
 0x811   :  { %425 = vadd.xlane.f32.xlu0 %v424_v0 }
 0x815   :  { %v430_v4 = vpop.xlane.xlu1 %429 }
 0x816   :  { %v431_v7 = vsel %vm419_vm2, %v430_v4, %v413_v55  ;;  %v139_v55 = vadd.s32 24, %v853_v3 }
 0x817   :  { %v446_v9 = vmul.f32 %v434_v6, %v431_v7 }
 0x818   :  { %vm140_vm8 = vcmp.eq.s32.totalorder %v139_v55, %v851_v2  ;;  %vm145_vm10 = vcmp.ge.s32.totalorder %v139_v55, %v851_v2 }
 0x819   :  { %447 = vadd.xlane.f32.xlu1 %v446_v9  ;;  %vm146_vm13 = vmand %vm145_vm10, %vm49_vm1  ;;  %vm194_vm1 = vcmp.eq.s32.totalorder %v851_v2, %v139_v55  ;;  %vm637_vm10 = vcmp.eq.s32.totalorder %v851_v2, 29 }
 0x87c   :  { %v404_v10 = vpop.xlane.xlu2 %403 }
 0x87d   :  { %v405_v11 = vsel %vm401_vm15, %v404_v10, %v387_v59 }
 0x87e   :  { %v420_v12 = vmul.f32 %v416_v54, %v405_v11 }
 0x880   :  { %421 = vadd.xlane.f32.xlu2 %v420_v12 }
 0x884   :  { %v426_v13 = vpop.xlane.xlu0 %425 }
 0x885   :  { %v427_v14 = vsel %vm419_vm2, %v426_v13, %v409_v63  ;;  %v142_v63 = vsel %vm140_vm8, %v42_v57, 0.0  ;;  %vm593_vm8 = vcmp.eq.s32.totalorder %v851_v2, 27 }
 0x886   :  { %v442_v15 = vmul.f32 %v434_v6, %v427_v14 }
 0x888   :  { %443 = vadd.xlane.f32.xlu0 %v442_v15 }
 0x88c   :  { %v448_v18 = vpop.xlane.xlu1 %447 }
 0x88d   :  { %v449_v21 = vsel %vm437_vm3, %v448_v18, %v431_v7 }
 0x88e   :  { %v464_v22 = vmul.f32 %v452_v19, %v449_v21 }
 0x890   :  { %465 = vadd.xlane.f32.xlu1 %v464_v22 }
 0x8f3   :  { %v422_v23 = vpop.xlane.xlu2 %421 }
 0x8f4   :  { %v423_v24 = vsel %vm419_vm2, %v422_v23, %v405_v11  ;;  %vm509_vm2 = vcmp.eq.s32.totalorder %v851_v2, 23 }
 0x8f5   :  { %v438_v25 = vmul.f32 %v434_v6, %v423_v24 }
 0x8f7   :  { %439 = vadd.xlane.f32.xlu2 %v438_v25 }
 0x8fb   :  { %v444_v26 = vpop.xlane.xlu0 %443 }
 0x8fc   :  { %v445_v27 = vsel %vm437_vm3, %v444_v26, %v427_v14 }
 0x8fd   :  { %v460_v28 = vmul.f32 %v452_v19, %v445_v27 }
 0x8ff   :  { %461 = vadd.xlane.f32.xlu0 %v460_v28 }
 0x903   :  { %v466_v30 = vpop.xlane.xlu1 %465 }
 0x904   :  { %v467_v32 = vsel %vm455_vm4, %v466_v30, %v449_v21  ;;  %v147_v21 = vsel %vm146_vm13, %v42_v57, 0.0  ;;  %vm681_vm13 = vcmp.eq.s32.totalorder %v851_v2, 31 }
 0x905   :  { %v482_v33 = vmul.f32 %v470_v31, %v467_v32 }
 0x907   :  { %483 = vadd.xlane.f32.xlu1 %v482_v33 }
 0x96a   :  { %v440_v34 = vpop.xlane.xlu2 %439 }
 0x96b   :  { %v441_v35 = vsel %vm437_vm3, %v440_v34, %v423_v24  ;;  %vm527_vm3 = vcmp.eq.s32.totalorder %v851_v2, 24 }
 0x96c   :  { %v456_v36 = vmul.f32 %v452_v19, %v441_v35 }
 0x96e   :  { %457 = vadd.xlane.f32.xlu2 %v456_v36  ;;  %v195_v36 = vsel %vm194_vm1, -1.0, %v837_v61 }
 0x972   :  { %v462_v37 = vpop.xlane.xlu0 %461 }
 0x973   :  { %v463_v38 = vsel %vm455_vm4, %v462_v37, %v445_v27 }
 0x974   :  { %v478_v39 = vmul.f32 %v470_v31, %v463_v38 }
 0x976   :  { %479 = vadd.xlane.f32.xlu0 %v478_v39 }
 0x97a   :  { %v484_v41 = vpop.xlane.xlu1 %483 }
 0x97b   :  { %v485_v43 = vsel %vm473_vm7, %v484_v41, %v467_v32 }
 0x97c   :  { %v500_v44 = vmul.f32 %v488_v42, %v485_v43 }
 0x97e   :  { %501 = vadd.xlane.f32.xlu1 %v500_v44 }
 0x9e1   :  { %v458_v45 = vpop.xlane.xlu2 %457 }
 0x9e2   :  { %v459_v46 = vsel %vm455_vm4, %v458_v45, %v441_v35  ;;  %vm549_vm4 = vcmp.eq.s32.totalorder %v851_v2, 25 }
 0x9e3   :  { %v474_v48 = vmul.f32 %v470_v31, %v459_v46 }
 0x9e5   :  { %475 = vadd.xlane.f32.xlu2 %v474_v48 }
 0x9e9   :  { %v480_v49 = vpop.xlane.xlu0 %479 }
 0x9ea   :  { %v481_v50 = vsel %vm473_vm7, %v480_v49, %v463_v38 }
 0x9eb   :  { %v496_v51 = vmul.f32 %v488_v42, %v481_v50 }
 0x9ed   :  { %497 = vadd.xlane.f32.xlu0 %v496_v51 }
 0x9f1   :  { %v502_v1 = vpop.xlane.xlu1 %501 }
 0x9f2   :  { %v503_v4 = vsel %vm491_vm9, %v502_v1, %v485_v43 }
 0x9f3   :  { %v518_v3 = vmul.f32 %v506_v60, %v503_v4 }
 0xa58   :  { %v476_v52 = vpop.xlane.xlu2 %475 }
 0xa59   :  { %v477_v53 = vsel %vm473_vm7, %v476_v52, %v459_v46  ;;  %vm571_vm7 = vcmp.eq.s32.totalorder %v851_v2, 26 }
 0xa5a   :  { %v492_v54 = vmul.f32 %v488_v42, %v477_v53 }
 0xa5c   :  { %493 = vadd.xlane.f32.xlu2 %v492_v54 }
 0xa60   :  { %v498_v59 = vpop.xlane.xlu0 %497 }
 0xa61   :  { %v499_v62 = vsel %vm491_vm9, %v498_v59, %v481_v50 }
 0xa62   :  { %v514_v0 = vmul.f32 %v506_v60, %v499_v62 }
 0xa64   :  { %143 = vadd.xlane.f32.xlu2 %v142_v63  ;;  %515 = vadd.xlane.f32.xlu1 %v514_v0 }
 0xa6c   :  { %519 = vadd.xlane.f32.xlu2 %v518_v3 }
 0xacf   :  { %v494_v6 = vpop.xlane.xlu2 %493 }
 0xad0   :  { %v495_v7 = vsel %vm491_vm9, %v494_v6, %v477_v53  ;;  %vm615_vm9 = vcmp.eq.s32.totalorder %v851_v2, 28 }
 0xad1   :  { %v510_v9 = vmul.f32 %v506_v60, %v495_v7 }
 0xad3   :  { %511 = vadd.xlane.f32.xlu0 %v510_v9 }
 0xad7   :  { %v982_v10 = vpop.xlane.xlu2 %143  ;;  %v516_v25 = vpop.xlane.xlu1 %515 }
 0xad8   :  { %834 = vrcp.f32 %v982_v10  ;;  %v159_v13 = vand.u32 2147483648, %v982_v10  ;;  %vm153_vm11 = vweird.f32 %v982_v10  ;;  %v157_v15 = vand.u32 2147483647, %v982_v10 }
 0xad9   :  { %v517_v29 = vsel %vm509_vm2, %v516_v25, %v499_v62 }
 0xada   :  { %v160_v18 = vor.u32 1.1754944e-38, %v159_v13  ;;  %vm158_vm15 = vcmp.eq.f32.partialorder %v157_v15, 8.507059e+37 }
 0xade   :  { %v835_v11 = vpop.eup %834 }
 0xadf   :  { %v149_v12 = vmul.f32 %v835_v11, %v982_v10  ;;  %vm154_vm12 = vweird.f32 %v835_v11  ;;  %v520_v26 = vpop.xlane.xlu2 %519 }
 0xae0   :  { %vm155_vm14 = vmor %vm153_vm11, %vm154_vm12  ;;  %v521_v30 = vsel %vm509_vm2, %v520_v26, %v503_v4  ;;  %vm659_vm12 = vcmp.eq.s32.totalorder %v851_v2, 30 }
 0xae1   :  { %v150_v14 = vsub.f32 1.0, %v149_v12 }
 0xae3   :  { %v151_v17 = vmul.f32 %v835_v11, %v150_v14 }
 0xae5   :  { %v152_v19 = vadd.f32 %v835_v11, %v151_v17 }
 0xae7   :  { %v156_v22 = vsel %vm155_vm14, %v835_v11, %v152_v19 }
 0xae8   :  { %v994_v23 = vsel %vm158_vm15, %v160_v18, %v156_v22 }
 0xae9   :  { %v162_v24 = vmul.f32 %v994_v23, %v147_v21 }
 0xaeb   :  { %163 = vst [vmem:[#allocation2 + $0x18] sm:$0xff] %v162_v24 }
 0xaf2   :  { %v523_v27 = vld [vmem:[#allocation2 + $0x18] ss:$0 sm:$0xff]  ;;  %v545_v38 = vld [vmem:[#allocation2 + $0x19] ss:$0 sm:$0xff]  ;;  %v567_v52 = vld [vmem:[#allocation2 + $0x1a] ss:$0 sm:$0xff] }
 0xaf3   :  { %v524_v28 = vxor.u32 2147483648, %v523_v27  ;;  %v546_v41 = vxor.u32 2147483648, %v545_v38  ;;  %v568_v55 = vxor.u32 2147483648, %v567_v52  ;;  %v589_v6 = vld [vmem:[#allocation2 + $0x1b] ss:$0 sm:$0xff] }
 0xaf4   :  { %v590_v11 = vxor.u32 2147483648, %v589_v6  ;;  %v611_v25 = vld [vmem:[#allocation2 + $0x1c] ss:$0 sm:$0xff] }
 0xaf5   :  { %v536_v31 = vmul.f32 %v524_v28, %v521_v30  ;;  %v532_v32 = vmul.f32 %v524_v28, %v517_v29  ;;  %v540_v37 = vmul.f32 %v524_v28, %v195_v36 }
 0xaf7   :  { %537 = vadd.xlane.f32.xlu2 %v536_v31  ;;  %533 = vadd.xlane.f32.xlu1 %v532_v32 }
 0xb46   :  { %v512_v33 = vpop.xlane.xlu0 %511 }
 0xb47   :  { %v513_v34 = vsel %vm509_vm2, %v512_v33, %v495_v7 }
 0xb48   :  { %v528_v35 = vmul.f32 %v524_v28, %v513_v34  ;;  %v612_v28 = vxor.u32 2147483648, %v611_v25 }
 0xb4a   :  { %529 = vadd.xlane.f32.xlu0 %v528_v35 }
 0xb52   :  { %541 = vadd.xlane.f32.xlu0 %v540_v37 }
 0xb6a   :  { %v538_v39 = vpop.xlane.xlu2 %537  ;;  %v534_v40 = vpop.xlane.xlu1 %533 }
 0xb6b   :  { %v539_v42 = vsel %vm527_vm3, %v538_v39, %v521_v30  ;;  %v535_v43 = vsel %vm527_vm3, %v534_v40, %v517_v29  ;;  %v633_v39 = vld [vmem:[#allocation2 + $0x1d] ss:$0 sm:$0xff] }
 0xb6c   :  { %v554_v44 = vmul.f32 %v546_v41, %v535_v43  ;;  %v558_v45 = vmul.f32 %v546_v41, %v539_v42 }
 0xb6e   :  { %555 = vadd.xlane.f32.xlu2 %v554_v44  ;;  %559 = vadd.xlane.f32.xlu0 %v558_v45 }
 0xbbd   :  { %v530_v46 = vpop.xlane.xlu0 %529 }
 0xbbe   :  { %v531_v48 = vsel %vm527_vm3, %v530_v46, %v513_v34 }
 0xbbf   :  { %v550_v49 = vmul.f32 %v546_v41, %v531_v48 }
 0xbc1   :  { %551 = vadd.xlane.f32.xlu1 %v550_v49 }
 0xbc5   :  { %v542_v50 = vpop.xlane.xlu0 %541 }
 0xbc6   :  { %v543_v61 = vsel %vm527_vm3, %v542_v50, %v195_v36 }
 0xbc7   :  { %v562_v51 = vmul.f32 %v546_v41, %v543_v61 }
 0xbc9   :  { %563 = vadd.xlane.f32.xlu1 %v562_v51 }
 0xbe1   :  { %v556_v53 = vpop.xlane.xlu2 %555  ;;  %v560_v54 = vpop.xlane.xlu0 %559 }
 0xbe2   :  { %v557_v56 = vsel %vm549_vm4, %v556_v53, %v535_v43  ;;  %v561_v57 = vsel %vm549_vm4, %v560_v54, %v539_v42  ;;  %v634_v42 = vxor.u32 2147483648, %v633_v39  ;;  %v655_v53 = vld [vmem:[#allocation2 + $0x1e] ss:$0 sm:$0xff] }
 0xbe3   :  { %v576_v59 = vmul.f32 %v568_v55, %v557_v56  ;;  %v580_v60 = vmul.f32 %v568_v55, %v561_v57 }
 0xbe5   :  { %577 = vadd.xlane.f32.xlu0 %v576_v59  ;;  %581 = vadd.xlane.f32.xlu1 %v580_v60 }
 0xc34   :  { %v552_v62 = vpop.xlane.xlu1 %551 }
 0xc35   :  { %v553_v63 = vsel %vm549_vm4, %v552_v62, %v531_v48 }
 0xc36   :  { %v572_v0 = vmul.f32 %v568_v55, %v553_v63 }
 0xc38   :  { %573 = vadd.xlane.f32.xlu2 %v572_v0 }
 0xc3c   :  { %v564_v1 = vpop.xlane.xlu1 %563 }
 0xc3d   :  { %v565_v4 = vsel %vm549_vm4, %v564_v1, %v543_v61 }
 0xc3e   :  { %v584_v3 = vmul.f32 %v568_v55, %v565_v4 }
 0xc40   :  { %585 = vadd.xlane.f32.xlu2 %v584_v3 }
 0xc58   :  { %v582_v7 = vpop.xlane.xlu1 %581  ;;  %v578_v9 = vpop.xlane.xlu0 %577 }
 0xc59   :  { %v583_v12 = vsel %vm571_vm7, %v582_v7, %v561_v57  ;;  %v579_v13 = vsel %vm571_vm7, %v578_v9, %v557_v56  ;;  %v656_v56 = vxor.u32 2147483648, %v655_v53  ;;  %v677_v7 = vld [vmem:[#allocation2 + $0x1f] ss:$0 sm:$0xff] }
 0xc5a   :  { %v602_v14 = vmul.f32 %v590_v11, %v583_v12  ;;  %v598_v15 = vmul.f32 %v590_v11, %v579_v13 }
 0xc5c   :  { %603 = vadd.xlane.f32.xlu2 %v602_v14  ;;  %599 = vadd.xlane.f32.xlu1 %v598_v15 }
 0xcab   :  { %v574_v17 = vpop.xlane.xlu2 %573 }
 0xcac   :  { %v575_v18 = vsel %vm571_vm7, %v574_v17, %v553_v63 }
 0xcad   :  { %v594_v19 = vmul.f32 %v590_v11, %v575_v18 }
 0xcaf   :  { %595 = vadd.xlane.f32.xlu0 %v594_v19 }
 0xcb3   :  { %v586_v21 = vpop.xlane.xlu2 %585 }
 0xcb4   :  { %v587_v22 = vsel %vm571_vm7, %v586_v21, %v565_v4 }
 0xcb5   :  { %v606_v24 = vmul.f32 %v590_v11, %v587_v22 }
 0xcb7   :  { %607 = vadd.xlane.f32.xlu0 %v606_v24 }
 0xccf   :  { %v604_v26 = vpop.xlane.xlu2 %603  ;;  %v600_v27 = vpop.xlane.xlu1 %599 }
 0xcd0   :  { %v605_v29 = vsel %vm593_vm8, %v604_v26, %v583_v12  ;;  %v601_v30 = vsel %vm593_vm8, %v600_v27, %v579_v13  ;;  %v678_v12 = vxor.u32 2147483648, %v677_v7 }
 0xcd1   :  { %v624_v31 = vmul.f32 %v612_v28, %v605_v29  ;;  %v620_v32 = vmul.f32 %v612_v28, %v601_v30 }
 0xcd3   :  { %625 = vadd.xlane.f32.xlu0 %v624_v31  ;;  %621 = vadd.xlane.f32.xlu2 %v620_v32 }
 0xd22   :  { %v596_v33 = vpop.xlane.xlu0 %595 }
 0xd23   :  { %v597_v34 = vsel %vm593_vm8, %v596_v33, %v575_v18 }
 0xd24   :  { %v616_v35 = vmul.f32 %v612_v28, %v597_v34 }
 0xd26   :  { %617 = vadd.xlane.f32.xlu1 %v616_v35 }
 0xd2a   :  { %v608_v36 = vpop.xlane.xlu0 %607 }
 0xd2b   :  { %v609_v37 = vsel %vm593_vm8, %v608_v36, %v587_v22 }
 0xd2c   :  { %v628_v38 = vmul.f32 %v612_v28, %v609_v37 }
 0xd2e   :  { %629 = vadd.xlane.f32.xlu1 %v628_v38 }
 0xd46   :  { %v622_v40 = vpop.xlane.xlu2 %621  ;;  %v626_v41 = vpop.xlane.xlu0 %625 }
 0xd47   :  { %v623_v43 = vsel %vm615_vm9, %v622_v40, %v601_v30  ;;  %v627_v44 = vsel %vm615_vm9, %v626_v41, %v605_v29 }
 0xd48   :  { %v642_v45 = vmul.f32 %v634_v42, %v623_v43  ;;  %v646_v46 = vmul.f32 %v634_v42, %v627_v44 }
 0xd4a   :  { %643 = vadd.xlane.f32.xlu0 %v642_v45  ;;  %647 = vadd.xlane.f32.xlu1 %v646_v46 }
 0xd99   :  { %v618_v48 = vpop.xlane.xlu1 %617 }
 0xd9a   :  { %v619_v49 = vsel %vm615_vm9, %v618_v48, %v597_v34 }
 0xd9b   :  { %v638_v50 = vmul.f32 %v634_v42, %v619_v49 }
 0xd9d   :  { %639 = vadd.xlane.f32.xlu2 %v638_v50 }
 0xda1   :  { %v630_v61 = vpop.xlane.xlu1 %629 }
 0xda2   :  { %v631_v51 = vsel %vm615_vm9, %v630_v61, %v609_v37 }
 0xda3   :  { %v650_v52 = vmul.f32 %v634_v42, %v631_v51 }
 0xda5   :  { %651 = vadd.xlane.f32.xlu2 %v650_v52 }
 0xdbd   :  { %v648_v54 = vpop.xlane.xlu1 %647  ;;  %v644_v55 = vpop.xlane.xlu0 %643 }
 0xdbe   :  { %v649_v57 = vsel %vm637_vm10, %v648_v54, %v627_v44  ;;  %v645_v59 = vsel %vm637_vm10, %v644_v55, %v623_v43 }
 0xdbf   :  { %v668_v60 = vmul.f32 %v656_v56, %v649_v57  ;;  %v664_v62 = vmul.f32 %v656_v56, %v645_v59 }
 0xdc1   :  { %669 = vadd.xlane.f32.xlu2 %v668_v60  ;;  %665 = vadd.xlane.f32.xlu1 %v664_v62 }
 0xe10   :  { %v640_v63 = vpop.xlane.xlu2 %639 }
 0xe11   :  { %v641_v0 = vsel %vm637_vm10, %v640_v63, %v619_v49 }
 0xe12   :  { %v660_v1 = vmul.f32 %v656_v56, %v641_v0 }
 0xe14   :  { %661 = vadd.xlane.f32.xlu0 %v660_v1 }
 0xe18   :  { %v652_v4 = vpop.xlane.xlu2 %651 }
 0xe19   :  { %v653_v3 = vsel %vm637_vm10, %v652_v4, %v631_v51 }
 0xe1a   :  { %v672_v6 = vmul.f32 %v656_v56, %v653_v3 }
 0xe1c   :  { %673 = vadd.xlane.f32.xlu0 %v672_v6 }
 0xe34   :  { %v670_v9 = vpop.xlane.xlu2 %669  ;;  %v666_v11 = vpop.xlane.xlu1 %665 }
 0xe35   :  { %v671_v13 = vsel %vm659_vm12, %v670_v9, %v649_v57  ;;  %v667_v14 = vsel %vm659_vm12, %v666_v11, %v645_v59 }
 0xe36   :  { %v690_v15 = vmul.f32 %v678_v12, %v671_v13  ;;  %v686_v17 = vmul.f32 %v678_v12, %v667_v14 }
 0xe38   :  { %691 = vadd.xlane.f32.xlu0 %v690_v15  ;;  %687 = vadd.xlane.f32.xlu2 %v686_v17 }
 0xe87   :  { %v662_v18 = vpop.xlane.xlu0 %661 }
 0xe88   :  { %v663_v19 = vsel %vm659_vm12, %v662_v18, %v641_v0 }
 0xe89   :  { %v682_v21 = vmul.f32 %v678_v12, %v663_v19 }
 0xe8b   :  { %683 = vadd.xlane.f32.xlu1 %v682_v21 }
 0xe8f   :  { %v674_v22 = vpop.xlane.xlu0 %673 }
 0xe90   :  { %v675_v24 = vsel %vm659_vm12, %v674_v22, %v653_v3 }
 0xe91   :  { %v694_v25 = vmul.f32 %v678_v12, %v675_v24 }
 0xe93   :  { %695 = vadd.xlane.f32.xlu1 %v694_v25 }
 0xeab   :  { %v688_v26 = vpop.xlane.xlu2 %687  ;;  %v692_v27 = vpop.xlane.xlu0 %691 }
 0xeac   :  { %v689_v28 = vsel %vm681_vm13, %v688_v26, %v667_v14  ;;  %v693_v29 = vsel %vm681_vm13, %v692_v27, %v671_v13 }
 0xead   :  { %v730_v30 = vmul.f32 %v689_v28, %v898_v58  ;;  %v749_v31 = vmul.f32 %v693_v29, %v931_v20 }
 0xeaf   :  { %v732_v32 = vsel %vm95_vm0, %v689_v28, %v730_v30  ;;  %v751_v33 = vsel %vm124_vm6, %v693_v29, %v749_v31 }
 0xeb0   :  { %810 = vst [vmem:[%s1041_s1 + $0x8] sm:$0xff] %v732_v32 }
 0xeb1   :  { %812 = vst [vmem:[%s1041_s1 + $0x10] sm:$0xff] %v751_v33 }
 0xefe   :  { %v684_v34 = vpop.xlane.xlu1 %683 }
 0xeff   :  { %v685_v58 = vsel %vm681_vm13, %v684_v34, %v663_v19 }
 0xf00   :  { %v712_v20 = vmul.f32 %v685_v58, %v871_v16 }
 0xf02   :  { %v714_v47 = vsel %vm66_vm5, %v685_v58, %v712_v20 }
 0xf03   :  { %808 = vst [vmem:[%s1041_s1] sm:$0xff] %v714_v47 }
 0xf06   :  { %v696_v8 = vpop.xlane.xlu1 %695 }
 0xf07   :  { %v697_v35 = vsel %vm681_vm13, %v696_v8, %v675_v24 }
 0xf08   :  { %v768_v36 = vmul.f32 %v697_v35, %v994_v23 }
 0xf0a   :  { %v770_v37 = vsel %vm153_vm11, %v697_v35, %v768_v36 }
 0xf0b   :  { %814 = vst [vmem:[%s1041_s1 + $0x18] sm:$0xff] %v770_v37 }

// kernel: custom-call.59
= control target key start
LH: loop header
LB: loop body
LE: loop exit
PB: predicated region body
PF: predicated region fallthrough
CT: control target
= control target key end

     0   :  { %s3448_s0 = inlined_call_operand.vmem [shape: f32[16,16], index: 0, kind: input, shape index: {}]   ;;  %s3449_s1 = inlined_call_operand.vmem [shape: f32[16,16], index: 1, kind: input, shape index: {}]   ;;  %s3450_s2 = inlined_call_operand.vmem [shape: f32[16,16], index: 2, kind: input, shape index: {}]   ;;  %s3451_s3 = inlined_call_operand.vmem [shape: f32[16,16], index: 3, kind: input, shape index: {}]   ;;  %s3452_s4 = inlined_call_operand.vmem [shape: f32[16], index: 4, kind: output, shape index: {0}]   ;;  %s3453_s5 = inlined_call_operand.vmem [shape: f32[16], index: 5, kind: output, shape index: {1}]   ;;  %s3454_s6 = inlined_call_operand.vmem [shape: f32[16,16], index: 6, kind: output, shape index: {2}]   ;;  %s3455_s7 = inlined_call_operand.vmem [shape: f32[16,16], index: 7, kind: output, shape index: {3}]   ;;  %s3456_s8 = inlined_call_operand.vmem [shape: f32[16,16], index: 8, kind: output, shape index: {4}]   ;;  %s3457_s9 = inlined_call_operand.vmem [shape: f32[16,16], index: 9, kind: output, shape index: {5}]  }
   0x1   :  { %s20_s11 = scalar_lea.vmem %s3448_s0, 8 }
   0x2   :  { %p1727_p0 = scmp.gt.s32.totalorder %s3448_s0, %s20_s11 }
   0x3   :  { %s2904_s14 = smov (!%p1727_p0), [#allocation0]   ;;  %s2908_s17 = smov (!%p1727_p0), %s3448_s0  }
   0x4   :  { %1728 = sbr.rel (%p1727_p0) target bundleno = 17 (0x11), region = 421 }
   0x9 LB: > { %v54_v0 = vld [vmem:[%s2910_s17] sm:$0xff]  ;;  %s56_s17 = scalar_lea.vmem %s2910_s17, 8   ;;  %s2910_s17 = sphi %s2908_s17, %s56_s17   ;;  %s2906_s14 = sphi %s2904_s14, %s57_s14  }
   0xa   : > { %55 = vst [vmem:[%s2906_s14] sm:$0xff] %v54_v0  ;;  %s57_s14 = scalar_lea.vmem %s2906_s14, 8   ;;  %p51_p1 = scmp.gt.s32.totalorder %s56_s17, %s20_s11 }
   0xc   :  { %53 = sbr.rel (!%p51_p1) target bundleno = 9 (0x9), region = 427 }
  0x11 PF:  { %s76_s20 = scalar_lea.vmem %s3449_s1, 8 }
  0x12   :  { %p1747_p2 = scmp.gt.s32.totalorder %s3449_s1, %s76_s20 }
  0x13   :  { %s2912_s0 = smov (!%p1747_p2), [#allocation1]   ;;  %s2916_s25 = smov (!%p1747_p2), %s3449_s1  }
  0x14   :  { %1748 = sbr.rel (%p1747_p2) target bundleno = 33 (0x21), region = 443 }
  0x19 LB: > { %v110_v1 = vld [vmem:[%s2918_s25] sm:$0xff]  ;;  %s112_s25 = scalar_lea.vmem %s2918_s25, 8   ;;  %s2918_s25 = sphi %s2916_s25, %s112_s25   ;;  %s2914_s0 = sphi %s2912_s0, %s113_s0  }
  0x1a   : > { %111 = vst [vmem:[%s2914_s0] sm:$0xff] %v110_v1  ;;  %s113_s0 = scalar_lea.vmem %s2914_s0, 8   ;;  %p107_p3 = scmp.gt.s32.totalorder %s112_s25, %s76_s20 }
  0x1c   :  { %109 = sbr.rel (!%p107_p3) target bundleno = 25 (0x19), region = 449 }
  0x21 PF:  { %s132_s28 = scalar_lea.vmem %s3450_s2, 8 }
  0x22   :  { %p1767_p4 = scmp.gt.s32.totalorder %s3450_s2, %s132_s28 }
  0x23   :  { %s2920_s1 = smov (!%p1767_p4), [#allocation2]   ;;  %s2924_s12 = smov (!%p1767_p4), %s3450_s2  }
  0x24   :  { %1768 = sbr.rel (%p1767_p4) target bundleno = 49 (0x31), region = 465 }
  0x29 LB: > { %v166_v2 = vld [vmem:[%s2926_s12] sm:$0xff]  ;;  %s168_s12 = scalar_lea.vmem %s2926_s12, 8   ;;  %s2926_s12 = sphi %s2924_s12, %s168_s12   ;;  %s2922_s1 = sphi %s2920_s1, %s169_s1  }
  0x2a   : > { %167 = vst [vmem:[%s2922_s1] sm:$0xff] %v166_v2  ;;  %s169_s1 = scalar_lea.vmem %s2922_s1, 8   ;;  %p163_p5 = scmp.gt.s32.totalorder %s168_s12, %s132_s28 }
  0x2c   :  { %165 = sbr.rel (!%p163_p5) target bundleno = 41 (0x29), region = 471 }
  0x31 PF:  { %s188_s15 = scalar_lea.vmem %s3451_s3, 8 }
  0x32   :  { %p1787_p6 = scmp.gt.s32.totalorder %s3451_s3, %s188_s15 }
  0x33   :  { %s2928_s2 = smov (!%p1787_p6), [#allocation3]   ;;  %s2932_s20 = smov (!%p1787_p6), %s3451_s3  }
  0x34   :  { %1788 = sbr.rel (%p1787_p6) target bundleno = 65 (0x41), region = 487 }
  0x39 LB: > { %v222_v3 = vld [vmem:[%s2934_s20] sm:$0xff]  ;;  %s224_s20 = scalar_lea.vmem %s2934_s20, 8   ;;  %s2934_s20 = sphi %s2932_s20, %s224_s20   ;;  %s2930_s2 = sphi %s2928_s2, %s225_s2  }
  0x3a   : > { %223 = vst [vmem:[%s2930_s2] sm:$0xff] %v222_v3  ;;  %s225_s2 = scalar_lea.vmem %s2930_s2, 8   ;;  %p219_p7 = scmp.gt.s32.totalorder %s224_s20, %s188_s15 }
  0x3c   :  { %221 = sbr.rel (!%p219_p7) target bundleno = 57 (0x39), region = 493 }
  0x41 PF:  { %s235_s21 = smov [#allocation12]  ;;  %v236_v4 = vld [vmem:[#allocation0] sm:$0xff]  ;;  %v240_v5 = vld [vmem:[#allocation0 + $0x8] sm:$0xff]  ;;  %s242_s22 = smov [#allocation13]  ;;  %v243_v6 = vld [vmem:[#allocation1] sm:$0xff]  ;;  %v276_v7 = vlaneseq  ;;  %v2976_v15 = vmov 0.0  }
  0x42   :  { %237 = vst [vmem:[%s235_s21] sm:$0xff] %v236_v4  ;;  %v247_v8 = vld [vmem:[#allocation1 + $0x8] sm:$0xff]  ;;  %s249_s3 = smov [#allocation14]  ;;  %v250_v9 = vld [vmem:[#allocation2] sm:$0xff]  ;;  %v254_v10 = vld [vmem:[#allocation2 + $0x8] sm:$0xff]  ;;  %s256_s0 = smov [#allocation15] }
  0x43   :  { %2052 = vst [vmem:[%s235_s21 + $0x8] sm:$0xff] %v240_v5  ;;  %v257_v11 = vld [vmem:[#allocation3] sm:$0xff]  ;;  %v3065_v12 = vshrl.u32 %v276_v7, 7  ;;  %v261_v13 = vld [vmem:[#allocation3 + $0x8] sm:$0xff]  ;;  %v3067_v14 = vand.u32 127, %v276_v7  ;;  %s275_s23 = smov [#allocation8] }
  0x44   :  { %244 = vst [vmem:[%s242_s22] sm:$0xff] %v243_v6  ;;  %s295_s24 = smov [#allocation11]  ;;  %s1805_s25 = smov [#allocation12] }
  0x45   :  { %2053 = vst [vmem:[%s242_s22 + $0x8] sm:$0xff] %v247_v8  ;;  %v281_v12 = vmov %v3065_v12  ;;  %v278_v14 = vmov %v3067_v14  ;;  %vm1809_vm4 = vcmp.lt.s32.totalorder %v3067_v14, 16  ;;  %s1831_s26 = smov [#allocation13]  ;;  %s1854_s27 = smov [#allocation14] }
  0x46   :  { %251 = vst [vmem:[%s249_s3] sm:$0xff] %v250_v9  ;;  %v291_v16 = vadd.s32 8, %v281_v12  ;;  %v301_v12 = vmov %v3065_v12  ;;  %vm285_vm0 = vcmp.eq.s32.totalorder %v281_v12, %v278_v14  ;;  %s1877_s28 = smov [#allocation15] }
  0x47   :  { %2054 = vst [vmem:[%s249_s3 + $0x8] sm:$0xff] %v254_v10  ;;  %v311_v19 = vadd.s32 8, %v301_v12 }
  0x48   :  { %258 = vst [vmem:[%s256_s0] sm:$0xff] %v257_v11  ;;  %vm292_vm1 = vcmp.eq.s32.totalorder %v291_v16, %v278_v14  ;;  %v298_v14 = vmov %v3067_v14 }
  0x49   :  { %2055 = vst [vmem:[%s256_s0 + $0x8] sm:$0xff] %v261_v13  ;;  %vm305_vm2 = vcmp.eq.s32.totalorder %v301_v12, %v298_v14  ;;  %vm312_vm3 = vcmp.eq.s32.totalorder %v311_v19, %v298_v14  ;;  %v1801_v14 = vmov %v3067_v14  ;;  %v1804_v12 = vmov %v3065_v12 }
  0x4a   :  { %263 = vst [vmem:[#allocation8] sm:$0xff] %v2976_v15  ;;  %v1811_v26 = vld [vmem:[%s1805_s25] sm:$0xff]  ;;  %v2060_v27 = vld [vmem:[%s1805_s25 + $0x8] sm:$0xff]  ;;  %vm1814_vm5 = vcmp.eq.s32.totalorder %v1804_v12, %v1801_v14  ;;  %v1827_v14 = vmov %v3067_v14  ;;  %v1820_v34 = vadd.s32 8, %v1804_v12  ;;  %v1830_v12 = vmov %v3065_v12 }
  0x4b   :  { %265 = vst [vmem:[#allocation8 + $0x8] sm:$0xff] %v2976_v15  ;;  %v1812_v29 = vsel %vm1809_vm4, %v1811_v26, 0.0  ;;  %v1818_v30 = vsel %vm1809_vm4, %v2060_v27, 0.0  ;;  %v1853_v12 = vmov %v3065_v12 }
  0x4c   :  { %266 = vst [vmem:[#allocation9] sm:$0xff] %v2976_v15  ;;  %v1837_v28 = vld [vmem:[%s1831_s26] sm:$0xff]  ;;  %v2061_v32 = vld [vmem:[%s1831_s26 + $0x8] sm:$0xff]  ;;  %v1813_v35 = vmul.f32 %v1812_v29, %v1812_v29  ;;  %v1819_v36 = vmul.f32 %v1818_v30, %v1818_v30  ;;  %vm1821_vm6 = vcmp.eq.s32.totalorder %v1820_v34, %v1801_v14  ;;  %v1850_v14 = vmov %v3067_v14 }
  0x4d   :  { %268 = vst [vmem:[#allocation9 + $0x8] sm:$0xff] %v2976_v15  ;;  %v1838_v31 = vsel %vm1809_vm4, %v1837_v28, 0.0  ;;  %v1844_v38 = vsel %vm1809_vm4, %v2061_v32, 0.0  ;;  %v1873_v14 = vmov %v3067_v14  ;;  %v1876_v12 = vmov %v3065_v12 }
  0x4e   :  { %269 = vst [vmem:[#allocation10] sm:$0xff] %v2976_v15  ;;  %v1860_v33 = vld [vmem:[%s1854_s27] sm:$0xff]  ;;  %v1839_v37 = vmul.f32 %v1838_v31, %v1838_v31  ;;  %v2062_v39 = vld [vmem:[%s1854_s27 + $0x8] sm:$0xff]  ;;  %v1824_v41 = vadd.f32 %v1819_v36, %v1813_v35  ;;  %v1845_v42 = vmul.f32 %v1844_v38, %v1844_v38  ;;  %v1815_v45 = vsel %vm1814_vm5, 0.0, %v1813_v35 }
  0x4f   :  { %271 = vst [vmem:[#allocation10 + $0x8] sm:$0xff] %v2976_v15  ;;  %v1861_v40 = vsel %vm1809_vm4, %v1860_v33, 0.0  ;;  %v1867_v44 = vsel %vm1809_vm4, %v2062_v39, 0.0  ;;  %v1822_v49 = vsel %vm1821_vm6, 0.0, %v1819_v36  ;;  %vm1886_vm7 = vcmp.eq.s32.totalorder %v1876_v12, %v1873_v14 }
  0x50   :  { %272 = vst [vmem:[#allocation11] sm:$0xff] %v2976_v15  ;;  %v1883_v43 = vld [vmem:[%s1877_s28] sm:$0xff]  ;;  %v1841_v46 = vadd.f32 %v1839_v37, %v1824_v41  ;;  %v1862_v47 = vmul.f32 %v1861_v40, %v1861_v40  ;;  %v2063_v48 = vld [vmem:[%s1877_s28 + $0x8] sm:$0xff]  ;;  %v1823_v51 = vadd.f32 %v1822_v49, %v1815_v45  ;;  %v1868_v53 = vmul.f32 %v1867_v44, %v1867_v44 }
  0x51   :  { %274 = vst [vmem:[#allocation11 + $0x8] sm:$0xff] %v2976_v15  ;;  %v1884_v50 = vsel %vm1809_vm4, %v1883_v43, 0.0  ;;  %v1892_v54 = vsel %vm1809_vm4, %v2063_v48, 0.0  ;;  %v1894_v61 = vadd.s32 8, %v1876_v12 }
  0x52   :  { %v282_v17 = vld [vmem:[%s275_s23] sm:$0xff]  ;;  %v2056_v18 = vld [vmem:[%s275_s23 + $0x8] sm:$0xff]  ;;  %v1847_v52 = vadd.f32 %v1845_v42, %v1841_v46  ;;  %v1840_v55 = vadd.f32 %v1839_v37, %v1823_v51  ;;  %v1885_v57 = vmul.f32 %v1884_v50, %v1884_v50  ;;  %v1893_v60 = vmul.f32 %v1892_v54, %v1892_v54 }
  0x53   :  { %v286_v20 = vsel %vm285_vm0, 1.0, %v282_v17  ;;  %v293_v21 = vsel %vm292_vm1, 1.0, %v2056_v18  ;;  %vm1895_vm8 = vcmp.eq.s32.totalorder %v1894_v61, %v1873_v14 }
  0x54   :  { %287 = vst [vmem:[%s275_s23] sm:$0xff] %v286_v20  ;;  %v1864_v56 = vadd.f32 %v1862_v47, %v1847_v52  ;;  %v1846_v58 = vadd.f32 %v1845_v42, %v1840_v55  ;;  %v1887_v1 = vsel %vm1886_vm7, 0.0, %v1885_v57  ;;  %v1896_v4 = vsel %vm1895_vm8, 0.0, %v1893_v60 }
  0x55   :  { %2057 = vst [vmem:[%s275_s23 + $0x8] sm:$0xff] %v293_v21 }
  0x56   :  { %v1870_v59 = vadd.f32 %v1868_v53, %v1864_v56  ;;  %v1863_v62 = vadd.f32 %v1862_v47, %v1846_v58 }
  0x58   :  { %v302_v22 = vld [vmem:[%s295_s24] sm:$0xff]  ;;  %v2058_v23 = vld [vmem:[%s295_s24 + $0x8] sm:$0xff]  ;;  %v1889_v63 = vadd.f32 %v1885_v57, %v1870_v59  ;;  %v1869_v0 = vadd.f32 %v1868_v53, %v1863_v62 }
  0x59   :  { %v306_v24 = vsel %vm305_vm2, 1.0, %v302_v22  ;;  %v313_v25 = vsel %vm312_vm3, 1.0, %v2058_v23 }
  0x5a   :  { %307 = vst [vmem:[%s295_s24] sm:$0xff] %v306_v24  ;;  %v1898_v2 = vadd.f32 %v1893_v60, %v1889_v63  ;;  %v1888_v3 = vadd.f32 %v1887_v1, %v1869_v0 }
  0x5b   :  { %2059 = vst [vmem:[%s295_s24 + $0x8] sm:$0xff] %v313_v25 }
  0x5c   :  { %1899 = vadd.xlane.f32.xlu0 %v1898_v2  ;;  %v1897_v5 = vadd.f32 %v1896_v4, %v1888_v3 }
  0x64   :  { %1907 = vadd.xlane.f32.xlu0 %v1897_v5 }
  0xcf   :  { %v1900_v6 = vpop.xlane.xlu0 %1899 }
  0xd0   :  { %v1901_v7 = vrot.slane %v1900_v6, 4 }
  0xd2   :  { %v1902_v8 = vadd.f32 %v1901_v7, %v1900_v6 }
  0xd4   :  { %v1903_v9 = vrot.slane %v1902_v8, 2 }
  0xd6   :  { %v1904_v15 = vadd.f32 %v1903_v9, %v1902_v8 }
  0xd7   :  { %v1908_v10 = vpop.xlane.xlu0 %1907 }
  0xd8   :  { %v1909_v11 = vrot.slane %v1908_v10, 4  ;;  %v1905_v18 = vrot.slane %v1904_v15, 1 }
  0xda   :  { %v1910_v13 = vadd.f32 %v1909_v11, %v1908_v10  ;;  %v1906_v21 = vadd.f32 %v1905_v18, %v1904_v15 }
  0xdc   :  { %v1911_v16 = vrot.slane %v1910_v13, 2 }
  0xde   :  { %v1912_v17 = vadd.f32 %v1911_v16, %v1910_v13 }
  0xe0   :  { %v1913_v19 = vrot.slane %v1912_v17, 1 }
  0xe2   :  { %v1914_v20 = vadd.f32 %v1913_v19, %v1912_v17 }
  0xe4   :  { %2185 = vpush %v1914_v20 }
  0xe5   :  { %2187 = vpush %v1906_v21 }
 0x115   :  { %s2186_s29 = spop %2185 }
 0x116   :  { %s2188_s30 = spop %2187 }
 0x117   :  { %s1917_s1 = smul.f32 1e-10, %s2188_s30 }
 0x119   :  { %p1918_p8 = scmp.le.f32.partialorder %s2186_s29, %s1917_s1 }
 0x11a   :  { %s3099_s10 = smov (!%p1918_p8), 0  }
 0x11b   :  { %1921 = sbr.rel (%p1918_p8) target bundleno = 995 (0x3e3), region = 509 }
 0x120 LB: > { %s3104_s11 = smov 0   ;;  %s2938_s10 = sphi %s3099_s10, %s3458_s10  }
 0x121 LB: >> { %s451_s12 = smov [#allocation12]  ;;  %v455_v14 = vmov %v3067_v14  ;;  %v458_v12 = vmov %v3065_v12  ;;  %s477_s13 = smov [#allocation13]  ;;  %s2942_s11 = sphi %s3104_s11, %s450_s11  }
 0x122   : >> { %v481_v14 = vmov %v3067_v14  ;;  %v484_v12 = vmov %v3065_v12  ;;  %v459_v22 = vld [vmem:[%s451_s12] sm:$0xff]  ;;  %vm462_vm9 = vcmp.eq.s32.totalorder %v458_v12, %v455_v14  ;;  %v2064_v23 = vld [vmem:[%s451_s12 + $0x8] sm:$0xff]  ;;  %v467_v24 = vadd.s32 8, %v458_v12  ;;  %s503_s14 = smov [#allocation15]  ;;  %s452_s15 = smov [#allocation16] }
 0x123   : >> { %vm488_vm10 = vcmp.eq.s32.totalorder %v484_v12, %v481_v14  ;;  %v493_v25 = vadd.s32 8, %v484_v12  ;;  %v463_v26 = vsel %vm462_vm9, %v459_v22, 0.0  ;;  %v485_v27 = vld [vmem:[%s477_s13] sm:$0xff]  ;;  %v2065_v28 = vld [vmem:[%s477_s13 + $0x8] sm:$0xff]  ;;  %v507_v14 = vmov %v3067_v14  ;;  %s478_s16 = smov [#allocation17]  ;;  %s504_s17 = smov [#allocation18] }
 0x124   : >> { %v510_v12 = vmov %v3065_v12  ;;  %vm468_vm11 = vcmp.eq.s32.totalorder %v467_v24, %v455_v14  ;;  %v489_v29 = vsel %vm488_vm10, %v485_v27, 0.0  ;;  %v511_v30 = vld [vmem:[%s503_s14] sm:$0xff]  ;;  %v2066_v34 = vld [vmem:[%s503_s14 + $0x8] sm:$0xff]  ;;  %s533_s2 = smov [#allocation17]  ;;  %s531_s18 = smov [#allocation16] }
 0x125   : >> { %vm494_vm12 = vcmp.eq.s32.totalorder %v493_v25, %v481_v14  ;;  %vm514_vm13 = vcmp.eq.s32.totalorder %v510_v12, %v507_v14  ;;  %v469_v31 = vsel %vm468_vm11, %v2064_v23, %v463_v26  ;;  %v519_v35 = vadd.s32 8, %v510_v12  ;;  %s535_s19 = smov [#allocation18]  ;;  %s610_s20 = smov [#allocation19] }
 0x126   : >> { %v495_v32 = vsel %vm494_vm12, %v2065_v28, %v489_v29  ;;  %v515_v33 = vsel %vm514_vm13, %v511_v30, 0.0  ;;  %v470_v36 = vrot.slane %v469_v31, 4  ;;  %s612_s21 = smov [#allocation20]  ;;  %s529_s22 = smov [#allocation21]  ;;  %v640_v12 = vmov %v3065_v12 }
 0x127   : >> { %v496_v37 = vrot.slane %v495_v32, 4  ;;  %vm520_vm14 = vcmp.eq.s32.totalorder %v519_v35, %v507_v14  ;;  %s530_s3 = smov [#allocation22]  ;;  %s614_s22 = smov %s529_s22  ;;  %v622_v14 = vmov %v3067_v14 }
 0x128   : >> { %v471_v38 = vadd.f32 %v470_v36, %v469_v31  ;;  %v521_v40 = vsel %vm520_vm14, %v2066_v34, %v515_v33  ;;  %s616_s3 = smov %s530_s3  ;;  %v637_v14 = vmov %v3067_v14  ;;  %s618_s0 = smov [#allocation21] }
 0x129   : >> { %v497_v39 = vadd.f32 %v496_v37, %v495_v32  ;;  %v522_v41 = vrot.slane %v521_v40, 4  ;;  %s633_s23 = smov [#allocation21]  ;;  %s649_s24 = smov [#allocation22] }
 0x12a   : >> { %v472_v42 = vrot.slane %v471_v38, 2  ;;  %s664_s25 = smov [#allocation22]  ;;  %s631_s26 = smov [#allocation23] }
 0x12b   : >> { %v498_v43 = vrot.slane %v497_v39, 2  ;;  %v523_v44 = vadd.f32 %v522_v41, %v521_v40  ;;  %s646_s27 = smov [#allocation23]  ;;  %s662_s28 = smov [#allocation24] }
 0x12c   : >> { %v473_v45 = vadd.f32 %v472_v42, %v471_v38  ;;  %s677_s29 = smov [#allocation24]  ;;  %s680_s30 = smov [#allocation23] }
 0x12d   : >> { %v499_v46 = vadd.f32 %v498_v43, %v497_v39  ;;  %v524_v47 = vrot.slane %v523_v44, 2  ;;  %s3128_s1 = smov [#allocation13]  ;;  %s3130_s12 = smov [#allocation15] }
 0x12e   : >> { %v474_v48 = vrot.slane %v473_v45, 1  ;;  %s1104_s13 = smov [#allocation23]  ;;  %s3132_s14 = smov [#allocation8] }
 0x12f   : >> { %v500_v49 = vrot.slane %v499_v46, 1  ;;  %v525_v50 = vadd.f32 %v524_v47, %v523_v44  ;;  %s450_s11 = sadd.s32 1, %s2942_s11  }
 0x130   : >> { %v475_v51 = vadd.f32 %v474_v48, %v473_v45  ;;  %p447_p9 = scmp.ge.s32.totalorder %s450_s11, 31  }
 0x131   : >> { %v501_v52 = vadd.f32 %v500_v49, %v499_v46  ;;  %v526_v53 = vrot.slane %v525_v50, 1  ;;  %s398_s11 = smov (%p447_p9), [#allocation15] }
 0x132   : >> { %476 = vst [vmem:[%s452_s15] sm:$0x1] %v475_v51  ;;  %s3134_s15 = smov [#allocation9] }
 0x133   : >> { %502 = vst [vmem:[%s478_s16] sm:$0x1] %v501_v52  ;;  %v527_v54 = vadd.f32 %v526_v53, %v525_v50  ;;  %v641_v53 = vadd.s32 8, %v640_v12  ;;  %v625_v12 = vmov %v3065_v12  ;;  %s3138_s16 = smov [#allocation10] }
 0x134   : >> { %v671_v12 = vmov %v3065_v12 }
 0x135   : >> { %528 = vst [vmem:[%s504_s17] sm:$0x1] %v527_v54  ;;  %s682_s17 = smov [#allocation24] }
 0x139   : >> { %v532_v62 = vld [vmem:[%s531_s18] sm:$0xff]  ;;  %s3141_s18 = smov [#allocation11] }
 0x13a   : >> { %v3115_v55 = vld [vmem:[%s533_s2] sm:$0xff]  ;;  %v586_v24 = vand.u32 2147483647, %v532_v62  ;;  %s1106_s2 = smov [#allocation24] }
 0x13b   : >> { %v538_v56 = vmul.f32 2.0, %v3115_v55  ;;  %v587_v32 = vand.u32 2147483647, %v3115_v55 }
 0x13c   : >> { %v536_v63 = vld [vmem:[%s535_s19] sm:$0xff]  ;;  %s3144_s19 = smov [#allocation12] }
 0x13d   : >> { %2664 = vrcp.f32 %v538_v56  ;;  %v550_v59 = vand.u32 2147483648, %v538_v56  ;;  %vm544_vm15 = vweird.f32 %v538_v56  ;;  %v548_v61 = vand.u32 2147483647, %v538_v56 }
 0x13e   : >> { %v537_v2 = vsub.f32 %v536_v63, %v532_v62  ;;  %v588_v25 = vand.u32 2147483647, %v536_v63 }
 0x13f   : >> { %v551_v1 = vor.u32 1.1754944e-38, %v550_v59  ;;  %vm549_vm2 = vcmp.eq.f32.partialorder %v548_v61, 8.507059e+37 }
 0x140   : >> { %v589_v27 = vmin.f32 %v586_v24, %v588_v25 }
 0x142   : >> { %v590_v33 = vmul.f32 1.1920929e-08, %v589_v27 }
 0x143   : >> { %v2665_v57 = vpop.eup %2664 }
 0x144   : >> { %v540_v58 = vmul.f32 %v2665_v57, %v538_v56  ;;  %vm545_vm0 = vweird.f32 %v2665_v57  ;;  %vm591_vm11 = vcmp.le.f32.partialorder %v587_v32, %v590_v33  ;;  %v672_v56 = vadd.s32 8, %v671_v12 }
 0x145   : >> { %vm546_vm1 = vmor %vm544_vm15, %vm545_vm0  ;;  %vm627_vm15 = vcmp.eq.s32.totalorder %v625_v12, %v622_v14  ;;  %vm642_vm0 = vcmp.eq.s32.totalorder %v641_v53, %v637_v14  ;;  %v653_v14 = vmov %v3067_v14  ;;  %v656_v12 = vmov %v3065_v12 }
 0x146   : >> { %v541_v60 = vsub.f32 1.0, %v540_v58  ;;  %v668_v14 = vmov %v3067_v14 }
 0x148   : >> { %v542_v0 = vmul.f32 %v2665_v57, %v541_v60 }
 0x14a   : >> { %v543_v3 = vadd.f32 %v2665_v57, %v542_v0 }
 0x14c   : >> { %v547_v4 = vsel %vm546_vm1, %v2665_v57, %v543_v3  ;;  %vm658_vm1 = vcmp.eq.s32.totalorder %v656_v12, %v653_v14  ;;  %v689_v3 = vld [vmem:[%s3128_s1] sm:$0xff] }
 0x14d   : >> { %v552_v5 = vsel %vm549_vm2, %v551_v1, %v547_v4  ;;  %vm673_vm2 = vcmp.eq.s32.totalorder %v672_v56, %v668_v14  ;;  %v691_v4 = vld [vmem:[%s3130_s12] sm:$0xff]  ;;  %v844_v14 = vmov %v3067_v14 }
 0x14e   : >> { %v553_v6 = vmul.f32 %v552_v5, %v537_v2  ;;  %v1112_v5 = vld [vmem:[%s3132_s14] sm:$0xff]  ;;  %v802_v14 = vmov %v3067_v14 }
 0x14f   : >> { %v865_v14 = vmov %v3067_v14 }
 0x150   : >> { %v555_v7 = vmul.f32 %v553_v6, %v553_v6  ;;  %vm554_vm6 = vcmp.ge.f32.partialorder %v553_v6, 0.0 }
 0x152   : >> { %v556_v8 = vadd.f32 1.0, %v555_v7 }
 0x154   : >> { %2666 = vrsqrt.f32 %v556_v8  ;;  %vm564_vm3 = vcmp.eq.f32.partialorder %v556_v8, inf  ;;  %v567_v17 = vand.u32 2147483648, %v556_v8  ;;  %vm566_vm5 = vcmp.eq.f32.partialorder %v556_v8, 0.0 }
 0x15a   : >> { %v2667_v9 = vpop.eup %2666 }
 0x15b   : >> { %v558_v10 = vmul.f32 %v2667_v9, %v556_v8 }
 0x15d   : >> { %v559_v11 = vmul.f32 %v2667_v9, %v558_v10 }
 0x15f   : >> { %v560_v13 = vmul.f32 0.5, %v559_v11 }
 0x161   : >> { %v561_v15 = vsub.f32 1.5, %v560_v13 }
 0x163   : >> { %v562_v16 = vmul.f32 %v2667_v9, %v561_v15  ;;  %v1114_v9 = vld [vmem:[%s3138_s16] sm:$0xff] }
 0x165   : >> { %v563_v18 = vmul.f32 %v562_v16, %v556_v8 }
 0x167   : >> { %v565_v19 = vsel %vm564_vm3, %v556_v8, %v563_v18  ;;  %v1113_v8 = vld [vmem:[%s3134_s15] sm:$0xff]  ;;  %vm1024_vm3 = vcmp.eq.s32.totalorder %v3065_v12, 0 }
 0x168   : >> { %v568_v20 = vsel %vm566_vm5, %v567_v17, %v565_v19  ;;  %v1115_v17 = vld [vmem:[%s3141_s18] sm:$0xff]  ;;  %vm1048_vm5 = vcmp.eq.s32.totalorder %v3065_v12, 7  ;;  %v847_v12 = vmov %v3065_v12 }
 0x169   : >> { %v569_v21 = vxor.u32 2147483648, %v568_v20  ;;  %v805_v12 = vmov %v3065_v12 }
 0x16b   : >> { %v570_v22 = vsel %vm554_vm6, %v568_v20, %v569_v21  ;;  %vm851_vm6 = vcmp.eq.s32.totalorder %v847_v12, %v844_v14 }
 0x16c   : >> { %v571_v23 = vadd.f32 %v570_v22, %v553_v6  ;;  %v688_v22 = vld [vmem:[%s3144_s19] sm:$0xff] }
 0x16e   : >> { %2668 = vrcp.f32 %v571_v23  ;;  %v583_v29 = vand.u32 2147483648, %v571_v23  ;;  %vm577_vm7 = vweird.f32 %v571_v23  ;;  %v581_v31 = vand.u32 2147483647, %v571_v23 }
 0x170   : >> { %v584_v35 = vor.u32 1.1754944e-38, %v583_v29  ;;  %vm582_vm10 = vcmp.eq.f32.partialorder %v581_v31, 8.507059e+37 }
 0x174   : >> { %v2669_v26 = vpop.eup %2668 }
 0x175   : >> { %v573_v28 = vmul.f32 %v2669_v26, %v571_v23  ;;  %vm578_vm8 = vweird.f32 %v2669_v26 }
 0x176   : >> { %vm579_vm9 = vmor %vm577_vm7, %vm578_vm8  ;;  %vm810_vm8 = vcmp.eq.s32.totalorder %v805_v12, %v802_v14 }
 0x177   : >> { %v574_v30 = vsub.f32 1.0, %v573_v28 }
 0x179   : >> { %v575_v34 = vmul.f32 %v2669_v26, %v574_v30 }
 0x17b   : >> { %v576_v36 = vadd.f32 %v2669_v26, %v575_v34 }
 0x17d   : >> { %v580_v37 = vsel %vm579_vm9, %v2669_v26, %v576_v36 }
 0x17e   : >> { %v585_v38 = vsel %vm582_vm10, %v584_v35, %v580_v37 }
 0x17f   : >> { %v592_v39 = vsel %vm591_vm11, 0.0, %v585_v38 }
 0x180   : >> { %v593_v40 = vmul.f32 %v592_v39, %v592_v39  ;;  %v606_v41 = vmul.f32 %v592_v39, %v3115_v55 }
 0x182   : >> { %v594_v42 = vadd.f32 1.0, %v593_v40  ;;  %v607_v43 = vsub.f32 %v532_v62, %v606_v41  ;;  %v609_v44 = vadd.f32 %v606_v41, %v536_v63 }
 0x184   : >> { %2670 = vrsqrt.f32 %v594_v42  ;;  %611 = vst [vmem:[%s610_s20] sm:$0xff] %v607_v43  ;;  %vm601_vm12 = vweird.f32 %v594_v42  ;;  %s3147_s20 = smov [#allocation14] }
 0x185   : >> { %613 = vst [vmem:[%s612_s21] sm:$0xff] %v609_v44  ;;  %v690_v27 = vld [vmem:[%s3147_s20] sm:$0xff]  ;;  %s708_s21 = smov [#allocation23] }
 0x18a   : >> { %v2671_v45 = vpop.eup %2670 }
 0x18b   : >> { %v596_v46 = vmul.f32 %v2671_v45, %v594_v42  ;;  %vm602_vm13 = vweird.f32 %v2671_v45 }
 0x18c   : >> { %vm603_vm14 = vmor %vm601_vm12, %vm602_vm13 }
 0x18d   : >> { %v597_v47 = vmul.f32 %v2671_v45, %v596_v46 }
 0x18f   : >> { %v598_v48 = vmul.f32 0.5, %v597_v47 }
 0x191   : >> { %v599_v49 = vsub.f32 1.5, %v598_v48 }
 0x193   : >> { %v600_v50 = vmul.f32 %v2671_v45, %v599_v49 }
 0x195   : >> { %v604_v51 = vsel %vm603_vm14, %v2671_v45, %v600_v50  ;;  %vm895_vm14 = vcmp.eq.s32.totalorder %v3067_v14, 0 }
 0x196   : >> { %615 = vst [vmem:[%s614_s22] sm:$0xff] %v604_v51  ;;  %v605_v52 = vmul.f32 %v604_v51, %v592_v39  ;;  %s711_s22 = smov [#allocation24] }
 0x198   : >> { %617 = vst [vmem:[%s616_s3] sm:$0xff] %v605_v52  ;;  %s3156_s3 = smov [#allocation13] }
 0x19d   : >> { %v619_v54 = vld [vmem:[%s618_s0] ss:$0 sm:$0xff]  ;;  %s1132_s0 = smov [#allocation23] }
 0x19e   : >> { %v634_v55 = vld [vmem:[%s633_s23] ss:$0 sm:$0xff]  ;;  %v628_v57 = vsel %vm627_vm15, %v619_v54, 0.0  ;;  %s3159_s23 = smov [#allocation15]  ;;  %vm899_vm15 = vcmp.eq.s32.totalorder %v3067_v14, 1 }
 0x19f   : >> { %v643_v58 = vsel %vm642_vm0, %v634_v55, 0.0  ;;  %629 = vadd.xlane.f32.xlu0 %v628_v57  ;;  %v650_v59 = vld [vmem:[%s649_s24] ss:$0 sm:$0xff]  ;;  %s1135_s24 = smov [#allocation24]  ;;  %vm912_vm0 = vcmp.eq.s32.totalorder %v3067_v14, 15 }
 0x1a0   : >> { %644 = vadd.xlane.f32.xlu1 %v643_v58  ;;  %v665_v60 = vld [vmem:[%s664_s25] ss:$0 sm:$0xff]  ;;  %v659_v61 = vsel %vm658_vm1, %v650_v59, 0.0  ;;  %s3162_s25 = smov [#allocation8] }
 0x1a1   : >> { %v674_v62 = vsel %vm673_vm2, %v665_v60, 0.0 }
 0x1a7   : >> { %660 = vadd.xlane.f32.xlu0 %v659_v61 }
 0x1a8   : >> { %675 = vadd.xlane.f32.xlu1 %v674_v62 }
 0x212   : >> { %v630_v63 = vpop.xlane.xlu0 %629 }
 0x213   : >> { %v645_v0 = vpop.xlane.xlu1 %644  ;;  %632 = vst [vmem:[%s631_s26] sm:$0xff] %v630_v63  ;;  %s3165_s26 = smov [#allocation9] }
 0x214   : >> { %2067 = vst [vmem:[%s646_s27 + $0x8] sm:$0xff] %v645_v0  ;;  %s3169_s27 = smov [#allocation10] }
 0x21a   : >> { %v661_v1 = vpop.xlane.xlu0 %660 }
 0x21b   : >> { %v676_v2 = vpop.xlane.xlu1 %675  ;;  %663 = vst [vmem:[%s662_s28] sm:$0xff] %v661_v1  ;;  %v681_v6 = vld [vmem:[%s680_s30] sm:$0xff]  ;;  %v2069_v41 = vld [vmem:[%s708_s21 + $0x8] sm:$0xff]  ;;  %s3172_s28 = smov [#allocation11]  ;;  %s718_s30 = smov [#allocation14] }
 0x21c   : >> { %2068 = vst [vmem:[%s677_s29 + $0x8] sm:$0xff] %v676_v2  ;;  %v1105_v7 = vld [vmem:[%s1104_s13] sm:$0xff]  ;;  %v695_v10 = vmul.f32 %v689_v3, %v681_v6  ;;  %v702_v11 = vmul.f32 %v691_v4, %v681_v6  ;;  %v692_v35 = vmul.f32 %v688_v22, %v681_v6  ;;  %v699_v38 = vmul.f32 %v690_v27, %v681_v6  ;;  %v2127_v47 = vld [vmem:[%s1132_s0 + $0x8] sm:$0xff]  ;;  %s3176_s29 = smov [#allocation12]  ;;  %s744_s13 = smov [#allocation22] }
 0x21d   : >> { %v1116_v13 = vmul.f32 %v1112_v5, %v1105_v7  ;;  %v1119_v18 = vmul.f32 %v1113_v8, %v1105_v7  ;;  %v1123_v23 = vmul.f32 %v1114_v9, %v1105_v7  ;;  %v1126_v32 = vmul.f32 %v1115_v17, %v1105_v7  ;;  %s776_s21 = smov [#allocation15]  ;;  %s799_s0 = smov [#allocation19] }
 0x223   : >> { %v683_v15 = vld [vmem:[%s682_s17] sm:$0xff]  ;;  %v2070_v42 = vld [vmem:[%s711_s22 + $0x8] sm:$0xff]  ;;  %s3196_s17 = smov [#allocation11]  ;;  %s770_s22 = smov [#allocation12] }
 0x224   : >> { %v1107_v16 = vld [vmem:[%s1106_s2] sm:$0xff]  ;;  %v696_v19 = vmul.f32 %v691_v4, %v683_v15  ;;  %v701_v20 = vmul.f32 %v689_v3, %v683_v15  ;;  %v693_v31 = vmul.f32 %v690_v27, %v683_v15  ;;  %v698_v33 = vmul.f32 %v688_v22, %v683_v15  ;;  %v2128_v50 = vld [vmem:[%s1135_s24 + $0x8] sm:$0xff]  ;;  %s3198_s2 = smov [#allocation14]  ;;  %s862_s24 = smov [#allocation20] }
 0x225   : >> { %v1117_v21 = vmul.f32 %v1114_v9, %v1107_v16  ;;  %v1120_v24 = vmul.f32 %v1115_v17, %v1107_v16  ;;  %v1122_v25 = vmul.f32 %v1112_v5, %v1107_v16  ;;  %v1125_v26 = vmul.f32 %v1113_v8, %v1107_v16  ;;  %v3202_v15 = vld [vmem:[%s744_s13] ss:$0 sm:$0xff]  ;;  %s3306_s13 = smov [#allocation14] }
 0x226   : >> { %v697_v28 = vsub.f32 %v695_v10, %v696_v19  ;;  %v703_v29 = vadd.f32 %v702_v11, %v701_v20  ;;  %v694_v39 = vsub.f32 %v692_v35, %v693_v31  ;;  %v700_v40 = vadd.f32 %v699_v38, %v698_v33 }
 0x227   : >> { %v1118_v30 = vsub.f32 %v1116_v13, %v1117_v21  ;;  %v1121_v34 = vsub.f32 %v1119_v18, %v1120_v24  ;;  %v1124_v36 = vadd.f32 %v1123_v23, %v1122_v25  ;;  %v1127_v37 = vadd.f32 %v1126_v32, %v1125_v26 }
 0x228   : >> { %705 = vst [vmem:[%s3128_s1] sm:$0xff] %v697_v28  ;;  %s3185_s1 = smov [#allocation8] }
 0x229   : >> { %707 = vst [vmem:[%s3130_s12] sm:$0xff] %v703_v29  ;;  %s3187_s12 = smov [#allocation10] }
 0x22a   : >> { %1128 = vst [vmem:[%s3132_s14] sm:$0xff] %v1118_v30  ;;  %s3191_s14 = smov [#allocation15] }
 0x22b   : >> { %1129 = vst [vmem:[%s3134_s15] sm:$0xff] %v1121_v34  ;;  %s3193_s15 = smov [#allocation9] }
 0x22c   : >> { %1130 = vst [vmem:[%s3138_s16] sm:$0xff] %v1124_v36  ;;  %s742_s16 = smov [#allocation21] }
 0x22d   : >> { %1131 = vst [vmem:[%s3141_s18] sm:$0xff] %v1127_v37  ;;  %s3205_s18 = smov [#allocation12]  ;;  %v3212_v20 = vld [vmem:[%s742_s16] ss:$0 sm:$0xff]  ;;  %s3313_s16 = smov [#allocation15] }
 0x22e   : >> { %704 = vst [vmem:[%s3144_s19] sm:$0xff] %v694_v39  ;;  %s3207_s19 = smov [#allocation13] }
 0x22f   : >> { %v2072_v43 = vld [vmem:[%s3156_s3 + $0x8] sm:$0xff]  ;;  %706 = vst [vmem:[%s3147_s20] sm:$0xff] %v700_v40  ;;  %s774_s20 = smov [#allocation14] }
 0x230   : >> { %v2074_v44 = vld [vmem:[%s3159_s23 + $0x8] sm:$0xff]  ;;  %v729_v45 = vmul.f32 %v2072_v43, %v2069_v41  ;;  %v735_v46 = vmul.f32 %v2072_v43, %v2070_v42 }
 0x231   : >> { %v730_v48 = vmul.f32 %v2074_v44, %v2070_v42  ;;  %v736_v49 = vmul.f32 %v2074_v44, %v2069_v41  ;;  %v2129_v51 = vld [vmem:[%s3162_s25 + $0x8] sm:$0xff] }
 0x232   : >> { %v2130_v52 = vld [vmem:[%s3165_s26 + $0x8] sm:$0xff]  ;;  %v1150_v53 = vmul.f32 %v2129_v51, %v2127_v47  ;;  %v1156_v54 = vmul.f32 %v2129_v51, %v2128_v50 }
 0x233   : >> { %v731_v55 = vsub.f32 %v729_v45, %v730_v48  ;;  %v737_v56 = vadd.f32 %v736_v49, %v735_v46  ;;  %v2131_v57 = vld [vmem:[%s3169_s27 + $0x8] sm:$0xff]  ;;  %v1153_v58 = vmul.f32 %v2130_v52, %v2127_v47  ;;  %v1159_v59 = vmul.f32 %v2130_v52, %v2128_v50 }
 0x234   : >> { %v2132_v60 = vld [vmem:[%s3172_s28 + $0x8] sm:$0xff]  ;;  %v1151_v61 = vmul.f32 %v2131_v57, %v2128_v50  ;;  %v1157_v62 = vmul.f32 %v2131_v57, %v2127_v47 }
 0x235   : >> { %2076 = vst [vmem:[%s3156_s3 + $0x8] sm:$0xff] %v731_v55  ;;  %v1154_v63 = vmul.f32 %v2132_v60, %v2128_v50  ;;  %v1160_v0 = vmul.f32 %v2132_v60, %v2127_v47  ;;  %v2071_v1 = vld [vmem:[%s3176_s29 + $0x8] sm:$0xff]  ;;  %s772_s3 = smov [#allocation13] }
 0x236   : >> { %2078 = vst [vmem:[%s3159_s23 + $0x8] sm:$0xff] %v737_v56  ;;  %v1152_v2 = vsub.f32 %v1150_v53, %v1151_v61  ;;  %v1158_v3 = vadd.f32 %v1157_v62, %v1156_v54  ;;  %v2073_v4 = vld [vmem:[%s718_s30 + $0x8] sm:$0xff]  ;;  %v732_v5 = vmul.f32 %v2071_v1, %v2070_v42  ;;  %v726_v6 = vmul.f32 %v2071_v1, %v2069_v41  ;;  %s841_s23 = smov [#allocation14] }
 0x237   : >> { %v1155_v7 = vsub.f32 %v1153_v58, %v1154_v63  ;;  %v1161_v8 = vadd.f32 %v1160_v0, %v1159_v59  ;;  %v733_v9 = vmul.f32 %v2073_v4, %v2069_v41  ;;  %v727_v10 = vmul.f32 %v2073_v4, %v2070_v42 }
 0x238   : >> { %2133 = vst [vmem:[%s3162_s25 + $0x8] sm:$0xff] %v1152_v2  ;;  %s3285_s25 = smov [#allocation15] }
 0x239   : >> { %2134 = vst [vmem:[%s3165_s26 + $0x8] sm:$0xff] %v1155_v7  ;;  %v734_v11 = vadd.f32 %v733_v9, %v732_v5  ;;  %v728_v13 = vsub.f32 %v726_v6, %v727_v10  ;;  %s798_s26 = smov [#allocation12] }
 0x23a   : >> { %2135 = vst [vmem:[%s3169_s27 + $0x8] sm:$0xff] %v1158_v3  ;;  %s821_s27 = smov [#allocation13] }
 0x23b   : >> { %2136 = vst [vmem:[%s3172_s28 + $0x8] sm:$0xff] %v1161_v8  ;;  %s3291_s28 = smov [#allocation14] }
 0x23c   : >> { %2077 = vst [vmem:[%s718_s30 + $0x8] sm:$0xff] %v734_v11  ;;  %v751_v32 = vld [vmem:[%s3207_s19] sm:$0xff]  ;;  %v857_v11 = vadd.s32 8, %v847_v12  ;;  %v868_v12 = vmov %v3065_v12  ;;  %s3296_s30 = smov [#allocation12] }
 0x23d   : >> { %2075 = vst [vmem:[%s3176_s29 + $0x8] sm:$0xff] %v728_v13  ;;  %v753_v16 = vld [vmem:[%s3191_s14] sm:$0xff]  ;;  %v755_v47 = vmul.f32 %v751_v32, %v3202_v15  ;;  %v758_v50 = vmul.f32 %v751_v32, %v3212_v20  ;;  %v817_v13 = vadd.s32 8, %v805_v12  ;;  %v827_v12 = vmov %v3065_v12  ;;  %s3294_s29 = smov [#allocation12] }
 0x23e   : >> { %v761_v37 = vmul.f32 %v753_v16, %v3202_v15  ;;  %v764_v41 = vmul.f32 %v753_v16, %v3212_v20  ;;  %vm858_vm7 = vcmp.eq.s32.totalorder %v857_v11, %v844_v14  ;;  %v806_v16 = vld [vmem:[%s799_s0] ss:$0 sm:$0xff]  ;;  %v824_v14 = vmov %v3067_v14  ;;  %s375_s0 = smov (%p447_p9), [#allocation14] }
 0x23f   : >> { %v1168_v17 = vld [vmem:[%s3185_s1] ss:$0 sm:$0xff]  ;;  %v2138_v19 = vld [vmem:[%s3185_s1 + $0x7] ss:$0 sm:$0xff]  ;;  %v2139_v22 = vld [vmem:[%s3185_s1 + $0x7] sm:$0xfe]  ;;  %vm818_vm9 = vcmp.eq.s32.totalorder %v817_v13, %v802_v14  ;;  %vm873_vm10 = vcmp.eq.s32.totalorder %v868_v12, %v865_v14  ;;  %vm831_vm12 = vcmp.eq.s32.totalorder %v827_v12, %v824_v14 }
 0x240   : >> { %v2137_v18 = vld [vmem:[%s3185_s1 - $0x1] sm:$0xfe]  ;;  %v2140_v23 = vld [vmem:[%s3185_s1 + $0xf] ss:$0 sm:$0xff]  ;;  %v1186_v25 = vsel %vm1024_vm3, %v2138_v19, %v2139_v22  ;;  %v2148_v35 = vld [vmem:[%s3193_s15 + $0x7] ss:$0 sm:$0xff] }
 0x241   : >> { %v1175_v21 = vsel %vm1024_vm3, %v1168_v17, %v2137_v18  ;;  %v1212_v24 = vld [vmem:[%s3193_s15] ss:$0 sm:$0xff]  ;;  %v2143_v27 = vld [vmem:[%s3187_s12 + $0x9] sm:$0x7f]  ;;  %v2144_v28 = vld [vmem:[%s3187_s12 + $0x8] ss:$0 sm:$0xff] }
 0x242   : >> { %1178 = vst [vmem:[%s3185_s1] sm:$0xff] %v1175_v21  ;;  %v1190_v26 = vld [vmem:[%s3187_s12] ss:$0 sm:$0xff]  ;;  %v1199_v29 = vsel %vm1048_vm5, %v2140_v23, %v2143_v27  ;;  %v2146_v30 = vld [vmem:[%s3187_s12 + $0x1] sm:$0x7f]  ;;  %v2149_v36 = vld [vmem:[%s3193_s15 + $0x7] sm:$0xfe] }
 0x243   : >> { %2141 = vst [vmem:[%s3185_s1 + $0x8] sm:$0xff] %v1186_v25  ;;  %v2147_v31 = vld [vmem:[%s3193_s15 - $0x1] sm:$0xfe]  ;;  %v1207_v33 = vsel %vm1048_vm5, %v2144_v28, %v2146_v30  ;;  %v1230_v38 = vsel %vm1024_vm3, %v2148_v35, %v2149_v36  ;;  %v2150_v39 = vld [vmem:[%s3193_s15 + $0xf] ss:$0 sm:$0xff]  ;;  %v837_v17 = vadd.s32 8, %v827_v12 }
 0x244   : >> { %2142 = vst [vmem:[%s3185_s1 + $0x1] sm:$0x1] %v1190_v26  ;;  %v1219_v34 = vsel %vm1024_vm3, %v1212_v24, %v2147_v31  ;;  %v752_v40 = vld [vmem:[%s3198_s2] sm:$0xff]  ;;  %v2153_v42 = vld [vmem:[%s3196_s17 + $0x9] sm:$0x7f]  ;;  %s2977_s1 = smov 1  }
 0x245   : >> { %2145 = vst [vmem:[%s3187_s12 + $0x8] sm:$0xff] %v1199_v29  ;;  %v2154_v43 = vld [vmem:[%s3196_s17 + $0x8] ss:$0 sm:$0xff]  ;;  %v2156_v44 = vld [vmem:[%s3196_s17 + $0x1] sm:$0x7f]  ;;  %v760_v45 = vmul.f32 %v752_v40, %v3212_v20  ;;  %v763_v46 = vmul.f32 %v752_v40, %v3202_v15  ;;  %v1243_v48 = vsel %vm1048_vm5, %v2150_v39, %v2153_v42  ;;  %vm838_vm13 = vcmp.eq.s32.totalorder %v837_v17, %v824_v14 }
 0x246   : >> { %1209 = vst [vmem:[%s3187_s12] sm:$0xff] %v1207_v33  ;;  %v750_v49 = vld [vmem:[%s3205_s18] sm:$0xff]  ;;  %v1251_v52 = vsel %vm1048_vm5, %v2154_v43, %v2156_v44  ;;  %s3304_s12 = smov [#allocation15] }
 0x247   : >> { %1222 = vst [vmem:[%s3193_s15] sm:$0xff] %v1219_v34  ;;  %v1234_v51 = vld [vmem:[%s3196_s17] ss:$0 sm:$0xff]  ;;  %v762_v53 = vsub.f32 %v760_v45, %v761_v37  ;;  %v754_v54 = vmul.f32 %v750_v49, %v3212_v20  ;;  %v757_v55 = vmul.f32 %v750_v49, %v3202_v15  ;;  %v765_v56 = vadd.f32 %v764_v41, %v763_v46 }
 0x248   : >> { %2151 = vst [vmem:[%s3193_s15 + $0x8] sm:$0xff] %v1230_v38 }
 0x249   : >> { %2152 = vst [vmem:[%s3193_s15 + $0x1] sm:$0x1] %v1234_v51  ;;  %v756_v57 = vsub.f32 %v754_v54, %v755_v47  ;;  %v759_v58 = vadd.f32 %v758_v50, %v757_v55  ;;  %s2978_s15 = smov 127  }
 0x24a   : >> { %2155 = vst [vmem:[%s3196_s17 + $0x8] sm:$0xff] %v1243_v48 }
 0x24b   : >> { %1253 = vst [vmem:[%s3196_s17] sm:$0xff] %v1251_v52  ;;  %s3316_s17 = smov [#allocation13] }
 0x24c   : >> { %768 = vst [vmem:[%s3198_s2] sm:$0xff] %v762_v53  ;;  %s3344_s2 = smov [#allocation12] }
 0x24d   : >> { %769 = vst [vmem:[%s3191_s14] sm:$0xff] %v765_v56  ;;  %s885_s14 = smov [#allocation13] }
 0x24e   : >> { %766 = vst [vmem:[%s3205_s18] sm:$0xff] %v756_v57  ;;  %s1060_s18 = smov [#allocation13] }
 0x24f   : >> { %767 = vst [vmem:[%s3207_s19] sm:$0xff] %v759_v58  ;;  %s1017_s19 = smov [#allocation14] }
 0x253   : >> { %v2081_v59 = vld [vmem:[%s774_s20 + $0x8] sm:$0xff] }
 0x254   : >> { %v2082_v60 = vld [vmem:[%s776_s21 + $0x8] sm:$0xff]  ;;  %v788_v61 = vmul.f32 %v2081_v59, %v3212_v20  ;;  %v791_v62 = vmul.f32 %v2081_v59, %v3202_v15 }
 0x255   : >> { %v789_v63 = vmul.f32 %v2082_v60, %v3202_v15  ;;  %v792_v0 = vmul.f32 %v2082_v60, %v3212_v20  ;;  %v2079_v1 = vld [vmem:[%s770_s22 + $0x8] sm:$0xff] }
 0x256   : >> { %v2080_v2 = vld [vmem:[%s772_s3 + $0x8] sm:$0xff]  ;;  %v782_v3 = vmul.f32 %v2079_v1, %v3212_v20  ;;  %v785_v4 = vmul.f32 %v2079_v1, %v3202_v15 }
 0x257   : >> { %v790_v5 = vsub.f32 %v788_v61, %v789_v63  ;;  %v793_v6 = vadd.f32 %v792_v0, %v791_v62  ;;  %v783_v7 = vmul.f32 %v2080_v2, %v3202_v15  ;;  %v786_v8 = vmul.f32 %v2080_v2, %v3212_v20  ;;  %v869_v20 = vld [vmem:[%s862_s24] ss:$0 sm:$0xff] }
 0x258   : >> { %v880_v15 = vadd.s32 8, %v868_v12  ;;  %v322_v12 = vmov (%p447_p9), %v3065_v12 }
 0x259   : >> { %2085 = vst [vmem:[%s774_s20 + $0x8] sm:$0xff] %v790_v5  ;;  %v784_v9 = vsub.f32 %v782_v3, %v783_v7  ;;  %v787_v10 = vadd.f32 %v786_v8, %v785_v4  ;;  %s1061_s20 = smov [#allocation15] }
 0x25a   : >> { %2086 = vst [vmem:[%s776_s21 + $0x8] sm:$0xff] %v793_v6  ;;  %vm881_vm11 = vcmp.eq.s32.totalorder %v880_v15, %v865_v14  ;;  %s1254_s21 = sadd.s32 (%p447_p9), 1, %s2938_s10   ;;  %v319_v14 = vmov (%p447_p9), %v3067_v14 }
 0x25b   : >> { %2083 = vst [vmem:[%s770_s22 + $0x8] sm:$0xff] %v784_v9  ;;  %s323_s22 = smov (%p447_p9), [#allocation12]  ;;  %vm334_vm1 = vcmp.eq.s32.totalorder (%p447_p9), %v322_v12, %v319_v14  ;;  %v348_v14 = vmov (%p447_p9), %v3067_v14  ;;  %p443_p10 = scmp.ge.s32.totalorder (%p447_p9), %s1254_s21, 15 }
 0x25c   : >> { %2084 = vst [vmem:[%s772_s3 + $0x8] sm:$0xff] %v787_v10  ;;  %s352_s3 = smov (%p447_p9), [#allocation13]  ;;  %s3458_s10 = smov (%p447_p9), %s1254_s21 }
 0x260   : >> { %v848_v18 = vld [vmem:[%s841_s23] sm:$0xff]  ;;  %v2091_v19 = vld [vmem:[%s841_s23 + $0x8] sm:$0xff] }
 0x261   : >> { %v852_v21 = vsel %vm851_vm6, 0.0, %v848_v18  ;;  %v859_v22 = vsel %vm858_vm7, 0.0, %v2091_v19  ;;  %v870_v23 = vld [vmem:[%s3285_s25] sm:$0xff]  ;;  %v2093_v24 = vld [vmem:[%s3285_s25 + $0x8] sm:$0xff] }
 0x262   : >> { %853 = vst [vmem:[%s841_s23] sm:$0xff] %v852_v21  ;;  %v807_v25 = vld [vmem:[%s798_s26] sm:$0xff]  ;;  %v2087_v26 = vld [vmem:[%s798_s26 + $0x8] sm:$0xff]  ;;  %v874_v29 = vsel %vm873_vm10, %v869_v20, %v870_v23  ;;  %v882_v32 = vsel %vm881_vm11, %v869_v20, %v2093_v24 }
 0x263   : >> { %2092 = vst [vmem:[%s841_s23 + $0x8] sm:$0xff] %v859_v22  ;;  %v811_v27 = vsel %vm810_vm8, %v806_v16, %v807_v25  ;;  %v819_v28 = vsel %vm818_vm9, %v806_v16, %v2087_v26  ;;  %v828_v30 = vld [vmem:[%s821_s27] sm:$0xff]  ;;  %v2089_v31 = vld [vmem:[%s821_s27 + $0x8] sm:$0xff] }
 0x264   : >> { %812 = vst [vmem:[%s798_s26] sm:$0xff] %v811_v27  ;;  %v832_v33 = vsel %vm831_vm12, 0.0, %v828_v30  ;;  %v839_v34 = vsel %vm838_vm13, 0.0, %v2089_v31 }
 0x265   : >> { %2088 = vst [vmem:[%s798_s26 + $0x8] sm:$0xff] %v819_v28 }
 0x266   : >> { %875 = vst [vmem:[%s3285_s25] sm:$0xff] %v874_v29 }
 0x267   : >> { %2094 = vst [vmem:[%s3285_s25 + $0x8] sm:$0xff] %v882_v32 }
 0x268   : >> { %833 = vst [vmem:[%s821_s27] sm:$0xff] %v832_v33 }
 0x269   : >> { %2090 = vst [vmem:[%s821_s27 + $0x8] sm:$0xff] %v839_v34 }
 0x26a   : >> { %v956_v35 = vld [vmem:[%s3291_s28] sm:$0xff]  ;;  %v3310_v39 = vld [vmem:[%s3306_s13 + $0x8] sm:$0xff] }
 0x26b   : >> { %957 = vrot.lane.b32.xlu1 %v956_v35, %s2977_s1 }
 0x26c   : >> { %v3300_v36 = vld [vmem:[%s3294_s29 + $0x8] sm:$0xff]  ;;  %v890_v37 = vld [vmem:[%s3296_s30] sm:$0xff] }
 0x26d   : >> { %923 = vrot.lane.b32.xlu0 %v3300_v36, %s2977_s1  ;;  %891 = vrot.lane.b32.xlu2 %v890_v37, %s2977_s1 }
 0x26e   : >> { %v973_v38 = vld [vmem:[%s3304_s12] sm:$0xff]  ;;  %v2101_v41 = vld [vmem:[%s3313_s16 + $0x8] sm:$0xff] }
 0x270   : >> { %v886_v40 = vld [vmem:[%s885_s14] sm:$0xff]  ;;  %v2095_v42 = vld [vmem:[%s3316_s17 + $0x8] sm:$0xff] }
 0x273   : >> { %974 = vrot.lane.b32.xlu1 %v973_v38, %s2978_s15 }
 0x275   : >> { %989 = vrot.lane.b32.xlu0 %v3310_v39, %s2977_s1  ;;  %887 = vrot.lane.b32.xlu2 %v886_v40, %s2977_s1 }
 0x27d   : >> { %985 = vrot.lane.b32.xlu0 %v2101_v41, %s2977_s1  ;;  %908 = vrot.lane.b32.xlu2 %v886_v40, %s2978_s15 }
 0x285   : >> { %919 = vrot.lane.b32.xlu2 %v2095_v42, %s2977_s1 }
 0x28d   : >> { %953 = vrot.lane.b32.xlu2 %v973_v38, %s2977_s1  ;;  %v341_v38 = vadd.s32 (%p447_p9), 8, %v322_v12  ;;  %v351_v12 = vmov (%p447_p9), %v3065_v12 }
 0x28e   : > { %v374_v12 = vmov (%p447_p9), %v3065_v12 }
 0x28f   : > { %vm342_vm2 = vcmp.eq.s32.totalorder (%p447_p9), %v341_v38, %v319_v14  ;;  %v371_v14 = vmov (%p447_p9), %v3067_v14  ;;  %v397_v12 = vmov (%p447_p9), %v3065_v12 }
 0x290   : > { %v394_v14 = vmov (%p447_p9), %v3067_v14 }
 0x295   : >> { %940 = vrot.lane.b32.xlu2 %v2095_v42, %s2978_s15 }
 0x29d   : >> { %1006 = vrot.lane.b32.xlu2 %v2101_v41, %s2978_s15 }
 0x2c7   : >> { %v892_v43 = vpop.permute.xlu2 %891 }
 0x2c8   : >> { %v896_v44 = vsel %vm895_vm14, %v890_v37, %v892_v43 }
 0x2cf   : >> { %v888_v45 = vpop.permute.xlu2 %887 }
 0x2d0   : >> { %v900_v46 = vsel %vm899_vm15, %v888_v45, %v896_v44 }
 0x2d1   : >> { %v906_v47 = vsel %vm1809_vm4, %v900_v46, 0.0 }
 0x2d2   : >> { %946 = vst [vmem:[%s3296_s30] sm:$0xff] %v906_v47 }
 0x2d7   : >> { %v909_v48 = vpop.permute.xlu2 %908 }
 0x2d8   : >> { %v913_v49 = vsel %vm912_vm0, %v890_v37, %v909_v48 }
 0x2d9   : >> { %947 = vst [vmem:[%s885_s14] sm:$0xff] %v913_v49 }
 0x2dd   : >> { %v958_v50 = vpop.permute.xlu1 %957 }
 0x2de   : >> { %v962_v58 = vsel %vm895_vm14, %v956_v35, %v958_v50 }
 0x2df   : >> { %v924_v51 = vpop.permute.xlu0 %923  ;;  %v920_v52 = vpop.permute.xlu2 %919 }
 0x2e0   : >> { %v928_v53 = vsel %vm895_vm14, %v3300_v36, %v924_v51 }
 0x2e1   : >> { %v932_v54 = vsel %vm899_vm15, %v920_v52, %v928_v53 }
 0x2e2   : >> { %v938_v55 = vsel %vm1809_vm4, %v932_v54, 0.0 }
 0x2e3   : >> { %2099 = vst [vmem:[%s3294_s29 + $0x8] sm:$0xff] %v938_v55 }
 0x2e5   : >> { %v975_v56 = vpop.permute.xlu1 %974 }
 0x2e6   : >> { %v979_v57 = vsel %vm912_vm0, %v956_v35, %v975_v56 }
 0x2e7   : >> { %1013 = vst [vmem:[%s3304_s12] sm:$0xff] %v979_v57  ;;  %v990_v59 = vpop.permute.xlu0 %989  ;;  %v954_v60 = vpop.permute.xlu2 %953 }
 0x2e8   : >> { %v966_v61 = vsel %vm899_vm15, %v954_v60, %v962_v58  ;;  %v994_v6 = vsel %vm895_vm14, %v3310_v39, %v990_v59 }
 0x2e9   : >> { %v972_v62 = vsel %vm1809_vm4, %v966_v61, 0.0 }
 0x2ea   : >> { %v1018_v63 = vld [vmem:[%s3344_s2] ss:$0 sm:$0xff]  ;;  %v2108_v1 = vld [vmem:[%s3344_s2 + $0x7] ss:$0 sm:$0xff]  ;;  %1012 = vst [vmem:[%s3291_s28] sm:$0xff] %v972_v62  ;;  %v2109_v3 = vld [vmem:[%s3344_s2 + $0x7] sm:$0xfe] }
 0x2eb   : >> { %v2107_v0 = vld [vmem:[%s3344_s2 - $0x1] sm:$0xfe]  ;;  %v2110_v4 = vld [vmem:[%s3344_s2 + $0xf] ss:$0 sm:$0xff]  ;;  %v1036_v5 = vsel %vm1024_vm3, %v2108_v1, %v2109_v3 }
 0x2ec   : >> { %v1025_v2 = vsel %vm1024_vm3, %v1018_v63, %v2107_v0  ;;  %2111 = vst [vmem:[%s3344_s2 + $0x8] sm:$0xff] %v1036_v5 }
 0x2ed   : >> { %1028 = vst [vmem:[%s3344_s2] sm:$0xff] %v1025_v2 }
 0x2ef   : >> { %v986_v7 = vpop.permute.xlu0 %985  ;;  %v941_v8 = vpop.permute.xlu2 %940 }
 0x2f0   : >> { %v998_v9 = vsel %vm899_vm15, %v986_v7, %v994_v6  ;;  %v945_v10 = vsel %vm912_vm0, %v3300_v36, %v941_v8  ;;  %v418_v6 = vadd.s32 (%p447_p9), 8, %v397_v12 }
 0x2f1   : >> { %v1004_v11 = vsel %vm1809_vm4, %v998_v9, 0.0  ;;  %2100 = vst [vmem:[%s3316_s17 + $0x8] sm:$0xff] %v945_v10 }
 0x2f2   : >> { %2105 = vst [vmem:[%s3306_s13 + $0x8] sm:$0xff] %v1004_v11 }
 0x2f7   : >> { %v1007_v13 = vpop.permute.xlu2 %1006 }
 0x2f8   : >> { %v1062_v15 = vld [vmem:[%s1060_s18] ss:$0 sm:$0xff]  ;;  %v2118_v17 = vld [vmem:[%s1060_s18 + $0x7] ss:$0 sm:$0xff]  ;;  %v2119_v19 = vld [vmem:[%s1060_s18 + $0x7] sm:$0xfe]  ;;  %v1011_v26 = vsel %vm912_vm0, %v3310_v39, %v1007_v13 }
 0x2f9   : >> { %v2117_v16 = vld [vmem:[%s1060_s18 - $0x1] sm:$0xfe]  ;;  %v2120_v20 = vld [vmem:[%s1060_s18 + $0xf] ss:$0 sm:$0xff]  ;;  %v1080_v22 = vsel %vm1024_vm3, %v2118_v17, %v2119_v19  ;;  %v2114_v24 = vld [vmem:[%s1017_s19 + $0x8] ss:$0 sm:$0xff] }
 0x2fa   : >> { %v1069_v18 = vsel %vm1024_vm3, %v1062_v15, %v2117_v16  ;;  %v1040_v21 = vld [vmem:[%s1017_s19] ss:$0 sm:$0xff]  ;;  %v2113_v23 = vld [vmem:[%s1017_s19 + $0x9] sm:$0x7f]  ;;  %v2116_v25 = vld [vmem:[%s1017_s19 + $0x1] sm:$0x7f]  ;;  %vm409_vm3 = vcmp.eq.s32.totalorder (%p447_p9), %v397_v12, %v394_v14 }
 0x2fb   : >> { %1072 = vst [vmem:[%s1060_s18] sm:$0xff] %v1069_v18  ;;  %v1057_v27 = vsel %vm1048_vm5, %v2114_v24, %v2116_v25  ;;  %v1049_v28 = vsel %vm1048_vm5, %v2110_v4, %v2113_v23 }
 0x2fc   : >> { %2121 = vst [vmem:[%s1060_s18 + $0x8] sm:$0xff] %v1080_v22 }
 0x2fd   : >> { %1059 = vst [vmem:[%s1017_s19] sm:$0xff] %v1057_v27 }
 0x2fe   : >> { %2106 = vst [vmem:[%s3313_s16 + $0x8] sm:$0xff] %v1011_v26 }
 0x2ff   : >> { %2112 = vst [vmem:[%s3344_s2 + $0x1] sm:$0x1] %v1040_v21 }
 0x300   : >> { %2115 = vst [vmem:[%s1017_s19 + $0x8] sm:$0xff] %v1049_v28 }
 0x304   : > { %449 = sbr.rel (!%p447_p9) target bundleno = 289 (0x121), region = 504 }
 0x305   : >> { %v1084_v29 = vld [vmem:[%s1061_s20] ss:$0 sm:$0xff]  ;;  %v2123_v30 = vld [vmem:[%s1061_s20 + $0x9] sm:$0x7f]  ;;  %v2124_v31 = vld [vmem:[%s1061_s20 + $0x8] ss:$0 sm:$0xff] }
 0x306   : >> { %2122 = vst [vmem:[%s1060_s18 + $0x1] sm:$0x1] %v1084_v29  ;;  %v1093_v32 = vsel %vm1048_vm5, %v2120_v20, %v2123_v30  ;;  %v2126_v33 = vld [vmem:[%s1061_s20 + $0x1] sm:$0x7f]  ;;  %v2157_v36 = vld [vmem:[%s323_s22 + $0x8] sm:$0xff] (%p447_p9) }
 0x307   : >> { %2125 = vst [vmem:[%s1061_s20 + $0x8] sm:$0xff] %v1093_v32  ;;  %v1101_v34 = vsel %vm1048_vm5, %v2124_v31, %v2126_v33  ;;  %v329_v35 = vld [vmem:[%s323_s22] sm:$0xff] (%p447_p9)  ;;  %v338_v40 = vsel (%p447_p9), %vm1809_vm4, %v2157_v36, 0.0  ;;  %v2159_v48 = vld [vmem:[%s375_s0 + $0x8] sm:$0xff] (%p447_p9)  ;;  %vm419_vm5 = vcmp.eq.s32.totalorder (%p447_p9), %v418_v6, %v394_v14 }
 0x308   : >> { %1103 = vst [vmem:[%s1061_s20] sm:$0xff] %v1101_v34  ;;  %v330_v39 = vsel (%p447_p9), %vm1809_vm4, %v329_v35, 0.0  ;;  %v381_v43 = vld [vmem:[%s375_s0] sm:$0xff] (%p447_p9)  ;;  %v339_v45 = vmul.f32 (%p447_p9), %v338_v40, %v338_v40  ;;  %v388_v53 = vsel (%p447_p9), %vm1809_vm4, %v2159_v48, 0.0 }
 0x309   : > { %v331_v44 = vmul.f32 %v330_v39, %v330_v39  ;;  %v382_v49 = vsel %vm1809_vm4, %v381_v43, 0.0  ;;  %v389_v62 = vmul.f32 %v388_v53, %v388_v53 }
 0x30a   : > { %v383_v56 = vmul.f32 %v382_v49, %v382_v49  ;;  %v343_v58 = vsel %vm342_vm2, 0.0, %v339_v45 }
 0x30b   : > { %v345_v50 = vadd.f32 %v339_v45, %v331_v44  ;;  %v335_v54 = vsel %vm334_vm1, 0.0, %v331_v44 }
 0x30c   : > { %v344_v60 = vadd.f32 %v343_v58, %v335_v54 }
 0x30d   : > { %v358_v37 = vld [vmem:[%s352_s3] sm:$0xff]  ;;  %v2158_v42 = vld [vmem:[%s352_s3 + $0x8] sm:$0xff] }
 0x30e   : > { %v359_v41 = vsel %vm1809_vm4, %v358_v37, 0.0  ;;  %v365_v47 = vsel %vm1809_vm4, %v2158_v42, 0.0 }
 0x30f   : > { %v360_v46 = vmul.f32 %v359_v41, %v359_v41  ;;  %v366_v51 = vmul.f32 %v365_v47, %v365_v47  ;;  %v404_v52 = vld [vmem:[%s398_s11] sm:$0xff]  ;;  %v2160_v57 = vld [vmem:[%s398_s11 + $0x8] sm:$0xff] }
 0x310   : > { %v405_v59 = vsel %vm1809_vm4, %v404_v52, 0.0  ;;  %v415_v63 = vsel %vm1809_vm4, %v2160_v57, 0.0 }
 0x311   : > { %v362_v55 = vadd.f32 %v360_v46, %v345_v50  ;;  %v361_v0 = vadd.f32 %v360_v46, %v344_v60  ;;  %v406_v2 = vmul.f32 %v405_v59, %v405_v59  ;;  %v416_v5 = vmul.f32 %v415_v63, %v415_v63 }
 0x313   : > { %v368_v61 = vadd.f32 %v366_v51, %v362_v55  ;;  %v367_v3 = vadd.f32 %v366_v51, %v361_v0  ;;  %v410_v10 = vsel %vm409_vm3, 0.0, %v406_v2  ;;  %v420_v15 = vsel %vm419_vm5, 0.0, %v416_v5 }
 0x315   : > { %v385_v1 = vadd.f32 %v383_v56, %v368_v61  ;;  %v384_v7 = vadd.f32 %v383_v56, %v367_v3 }
 0x317   : > { %v391_v4 = vadd.f32 %v389_v62, %v385_v1  ;;  %v390_v9 = vadd.f32 %v389_v62, %v384_v7 }
 0x319   : > { %v412_v8 = vadd.f32 %v406_v2, %v391_v4  ;;  %v411_v13 = vadd.f32 %v410_v10, %v390_v9 }
 0x31b   : > { %v422_v11 = vadd.f32 %v416_v5, %v412_v8  ;;  %v421_v16 = vadd.f32 %v420_v15, %v411_v13 }
 0x31d   : > { %423 = vadd.xlane.f32.xlu0 %v422_v11 }
 0x325   : > { %431 = vadd.xlane.f32.xlu0 %v421_v16 }
 0x390   : > { %v424_v17 = vpop.xlane.xlu0 %423 }
 0x391   : > { %v425_v18 = vrot.slane %v424_v17, 4 }
 0x393   : > { %v426_v19 = vadd.f32 %v425_v18, %v424_v17 }
 0x395   : > { %v427_v20 = vrot.slane %v426_v19, 2 }
 0x397   : > { %v428_v24 = vadd.f32 %v427_v20, %v426_v19 }
 0x398   : > { %v432_v21 = vpop.xlane.xlu0 %431 }
 0x399   : > { %v433_v22 = vrot.slane %v432_v21, 4  ;;  %v429_v27 = vrot.slane %v428_v24, 1 }
 0x39b   : > { %v434_v23 = vadd.f32 %v433_v22, %v432_v21  ;;  %v430_v30 = vadd.f32 %v429_v27, %v428_v24 }
 0x39d   : > { %v435_v25 = vrot.slane %v434_v23, 2 }
 0x39f   : > { %v436_v26 = vadd.f32 %v435_v25, %v434_v23 }
 0x3a1   : > { %v437_v28 = vrot.slane %v436_v26, 1 }
 0x3a3   : > { %v438_v29 = vadd.f32 %v437_v28, %v436_v26 }
 0x3a5   : > { %2189 = vpush %v438_v29 }
 0x3a6   : > { %2191 = vpush %v430_v30 }
 0x3d6   : > { %s2190_s23 = spop %2189 }
 0x3d7   : > { %s2192_s24 = spop %2191 }
 0x3d8   : > { %s441_s25 = smul.f32 1e-10, %s2192_s24 }
 0x3da   : > { %p442_p11 = scmp.le.f32.partialorder %s2190_s23, %s441_s25 }
 0x3dc   : > { %p444_p12 = por %p443_p10, %p442_p11 }
 0x3de   :  { %1256 = sbr.rel (!%p444_p12) target bundleno = 288 (0x120), region = 515 }
 0x3e3 PF:  { %s1257_s26 = smov [#allocation12]  ;;  %v1261_v14 = vmov %v3067_v14  ;;  %v1264_v12 = vmov %v3065_v12  ;;  %s1283_s27 = smov [#allocation15] }
 0x3e4   :  { %v1287_v14 = vmov %v3067_v14  ;;  %v1290_v12 = vmov %v3065_v12  ;;  %v1265_v31 = vld [vmem:[%s1257_s26] sm:$0xff]  ;;  %vm1268_vm6 = vcmp.eq.s32.totalorder %v1264_v12, %v1261_v14  ;;  %v2161_v32 = vld [vmem:[%s1257_s26 + $0x8] sm:$0xff]  ;;  %v1273_v33 = vadd.s32 8, %v1264_v12  ;;  %s1258_s10 = smov [#allocation4]  ;;  %s1284_s28 = smov [#allocation6] }
 0x3e5   :  { %vm1294_vm7 = vcmp.eq.s32.totalorder %v1290_v12, %v1287_v14  ;;  %v1299_v34 = vadd.s32 8, %v1290_v12  ;;  %v1269_v35 = vsel %vm1268_vm6, %v1265_v31, 0.0  ;;  %v1291_v36 = vld [vmem:[%s1283_s27] sm:$0xff]  ;;  %v2162_v37 = vld [vmem:[%s1283_s27 + $0x8] sm:$0xff]  ;;  %s2944_s15 = smov %s3454_s6   ;;  %s2948_s16 = smov [#allocation8]  }
 0x3e6   :  { %vm1274_vm4 = vcmp.eq.s32.totalorder %v1273_v33, %v1261_v14  ;;  %v1295_v38 = vsel %vm1294_vm7, %v1291_v36, 0.0 }
 0x3e7   :  { %vm1300_vm8 = vcmp.eq.s32.totalorder %v1299_v34, %v1287_v14  ;;  %v1275_v39 = vsel %vm1274_vm4, %v2161_v32, %v1269_v35 }
 0x3e8   :  { %v1301_v40 = vsel %vm1300_vm8, %v2162_v37, %v1295_v38  ;;  %v1276_v41 = vrot.slane %v1275_v39, 4 }
 0x3e9   :  { %v1302_v42 = vrot.slane %v1301_v40, 4 }
 0x3ea   :  { %v1277_v43 = vadd.f32 %v1276_v41, %v1275_v39 }
 0x3eb   :  { %v1303_v44 = vadd.f32 %v1302_v42, %v1301_v40 }
 0x3ec   :  { %v1278_v45 = vrot.slane %v1277_v43, 2 }
 0x3ed   :  { %v1304_v46 = vrot.slane %v1303_v44, 2 }
 0x3ee   :  { %v1279_v47 = vadd.f32 %v1278_v45, %v1277_v43 }
 0x3ef   :  { %v1305_v48 = vadd.f32 %v1304_v46, %v1303_v44 }
 0x3f0   :  { %v1280_v49 = vrot.slane %v1279_v47, 1 }
 0x3f1   :  { %v1306_v50 = vrot.slane %v1305_v48, 1 }
 0x3f2   :  { %v1281_v12 = vadd.f32 %v1280_v49, %v1279_v47 }
 0x3f3   :  { %v1307_v51 = vadd.f32 %v1306_v50, %v1305_v48 }
 0x3f4   :  { %1282 = vst [vmem:[%s1258_s10] sm:$0x1] %v1281_v12 }
 0x3f5   :  { %1308 = vst [vmem:[%s1284_s28] sm:$0x1] %v1307_v51 }
 0x3fb   :  { %v1311_v52 = vld [vmem:[#allocation4] sm:$0x1] }
 0x3fc   :  { %1314 = vst [vmem:[#allocation5] sm:$0x1] %v1311_v52  ;;  %v1317_v14 = vld [vmem:[#allocation6] sm:$0x1] }
 0x3fd   :  { %1320 = vst [vmem:[#allocation7] sm:$0x1] %v1317_v14 }
 0x403   :  { %v1377_v53 = vld [vmem:[#allocation5] sm:$0x1] }
 0x404   :  { %1378 = vst [vmem:[%s3452_s4] sm:$0x1] %v1377_v53  ;;  %v1435_v54 = vld [vmem:[#allocation7] sm:$0x1] }
 0x405   :  { %1436 = vst [vmem:[%s3453_s5] sm:$0x1] %v1435_v54 }
 0x406 LB: > { %v1480_v55 = vld [vmem:[%s2950_s16] sm:$0xff]  ;;  %s1482_s16 = scalar_lea.vmem %s2950_s16, 8   ;;  %s2950_s16 = sphi %s2948_s16, %s1482_s16   ;;  %s2946_s15 = sphi %s2944_s15, %s1483_s15  }
 0x407   : > { %1481 = vst [vmem:[%s2946_s15] sm:$0xff] %v1480_v55  ;;  %s1483_s15 = scalar_lea.vmem %s2946_s15, 8   ;;  %p1477_p13 = scmp.gt.s32.totalorder %s1482_s16, [#allocation8 + $0x8] }
 0x408   :  { %s2952_s5 = smov (%p1477_p13), %s3455_s7   ;;  %s2956_s2 = smov (%p1477_p13), [#allocation9]  }
 0x409   :  { %1479 = sbr.rel (!%p1477_p13) target bundleno = 1030 (0x406), region = 581 }
 0x40e LB: > { %v1536_v56 = vld [vmem:[%s2958_s2] sm:$0xff]  ;;  %s1538_s2 = scalar_lea.vmem %s2958_s2, 8   ;;  %s2958_s2 = sphi %s2956_s2, %s1538_s2   ;;  %s2954_s5 = sphi %s2952_s5, %s1539_s5  }
 0x40f   : > { %1537 = vst [vmem:[%s2954_s5] sm:$0xff] %v1536_v56  ;;  %s1539_s5 = scalar_lea.vmem %s2954_s5, 8   ;;  %p1533_p0 = scmp.gt.s32.totalorder %s1538_s2, [#allocation9 + $0x8] }
 0x410   :  { %s2960_s19 = smov (%p1533_p0), %s3456_s8   ;;  %s2964_s20 = smov (%p1533_p0), [#allocation10]  }
 0x411   :  { %1535 = sbr.rel (!%p1533_p0) target bundleno = 1038 (0x40e), region = 603 }
 0x416 LB: > { %v1592_v57 = vld [vmem:[%s2966_s20] sm:$0xff]  ;;  %s1594_s20 = scalar_lea.vmem %s2966_s20, 8   ;;  %s2966_s20 = sphi %s2964_s20, %s1594_s20   ;;  %s2962_s19 = sphi %s2960_s19, %s1595_s19  }
 0x417   : > { %1593 = vst [vmem:[%s2962_s19] sm:$0xff] %v1592_v57  ;;  %s1595_s19 = scalar_lea.vmem %s2962_s19, 8   ;;  %p1589_p1 = scmp.gt.s32.totalorder %s1594_s20, [#allocation10 + $0x8] }
 0x418   :  { %s2968_s22 = smov (%p1589_p1), %s3457_s9   ;;  %s2972_s3 = smov (%p1589_p1), [#allocation11]  }
 0x419   :  { %1591 = sbr.rel (!%p1589_p1) target bundleno = 1046 (0x416), region = 625 }
 0x41e LB: > { %v1648_v58 = vld [vmem:[%s2974_s3] sm:$0xff]  ;;  %s1650_s3 = scalar_lea.vmem %s2974_s3, 8   ;;  %s2974_s3 = sphi %s2972_s3, %s1650_s3   ;;  %s2970_s22 = sphi %s2968_s22, %s1651_s22  }
 0x41f   : > { %1649 = vst [vmem:[%s2970_s22] sm:$0xff] %v1648_v58  ;;  %s1651_s22 = scalar_lea.vmem %s2970_s22, 8   ;;  %p1645_p2 = scmp.gt.s32.totalorder %s1650_s3, [#allocation11 + $0x8] }
 0x421   :  { %1647 = sbr.rel (!%p1645_p2) target bundleno = 1054 (0x41e), region = 647 }

// kernel: reverse.3
= control target key start
LH: loop header
LB: loop body
LE: loop exit
PB: predicated region body
PF: predicated region fallthrough
CT: control target
= control target key end

     0   :  { %v2_v0 = vlaneseq  ;;  %s127_s0 = inlined_call_operand.vmem [shape: f32[32], index: 0, kind: input, shape index: {}]   ;;  %s128_s1 = inlined_call_operand.vmem [shape: f32[32], index: 1, kind: output, shape index: {}]  }
   0x2   :  { %v3_v1 = vsub.s32 31, %v2_v0 }
   0x4   :  { %4 = vset.pattern.permute.xlu0 %v3_v1 }
   0x5   :  { %v45_v2 = vld [vmem:[#allocation1] sm:$0x1]  ;;  %v22_v3 = vld [vmem:[%s127_s0] sm:$0x1]  ;;  %v60_v10 = vshrl.u32 %v2_v0, 7 }
   0x6   :  { %46 = vst [vmem:[#allocation0] sm:$0x1] %v45_v2 }
   0x7   :  { %23 = vst [vmem:[#allocation1 + $0x1] sm:$0x1] %v22_v3  ;;  %vm61_vm0 = vcmp.lt.s32.totalorder %v60_v10, 1 }
   0xd   :  { %v48_v4 = vld [vmem:[#allocation0 + $0x7] ss:$-1 sm:$0xff] }
   0xe   :  { %v49_v5 = vrot.slane %v48_v4, 7  ;;  %v42_v6 = vld [vmem:[#allocation1 + $0x1] sm:$0x1] }
   0xf   :  { %44 = vst [vmem:[#allocation0 + $0x8] sm:$0x1] %v42_v6 }
  0x10   :  { %50 = vperm.xlu0 %4, %v49_v5  }
  0x16   :  { %v55_v7 = vld [vmem:[#allocation0 + $0xf] ss:$-1 sm:$0xff] }
  0x17   :  { %v56_v8 = vrot.slane %v55_v7, 7 }
  0x19   :  { %57 = vperm.xlu0 %4, %v56_v8  }
  0x82   :  { %v51_v9 = vpop.permute.xlu0 %50 }
  0x83   :  { %52 = vst [vmem:[#allocation2] sm:$0xff] %v51_v9 }
  0x8b   :  { %v58_v11 = vpop.permute.xlu0 %57 }
  0x8c   :  { %62 = vst.msk [vmem:[#allocation2] sm:$0xff] %vm61_vm0, %v58_v11 }
  0x93   :  { %v65_v12 = vld [vmem:[#allocation2] sm:$0x1] }
  0x94   :  { %68 = vst [vmem:[#allocation3] sm:$0x1] %v65_v12 }
  0x9b   :  { %v85_v13 = vld [vmem:[#allocation3] sm:$0x1] }
  0x9c   :  { %86 = vst [vmem:[%s128_s1] sm:$0x1] %v85_v13 }

// kernel: wct_core.4
= control target key start
LH: loop header
LB: loop body
LE: loop exit
PB: predicated region body
PF: predicated region fallthrough
CT: control target
= control target key end

     0   :  { %v65_v0 = vlaneseq  ;;  %vm51_vm1 = vcmask 261120   ;;  %v209_v19 = vmov 0.0   ;;  %vm46_vm2 = vcmask 7168   ;;  %s353_s0 = inlined_call_operand.vmem [shape: f32[32,144], index: 0, kind: input, shape index: {}]   ;;  %s354_s2 = inlined_call_operand.vmem [shape: f32[1,32,32], index: 2, kind: output, shape index: {1}]   ;;  %s355_s1 = inlined_call_operand.vmem [shape: f32[1,32,1], index: 1, kind: output, shape index: {0}]  }
   0x1   :  { %v62_v1 = vld [vmem:[%s353_s0 + $0x30] sm:$0xff]  ;;  %v60_v3 = vld [vmem:[%s353_s0 + $0x20] sm:$0xff]  ;;  %v63_v4 = vld [vmem:[%s353_s0 + $0x38] sm:$0xff]  ;;  %52 = vst.msk [vmem:[%s354_s2] sm:$0xff] %vm51_vm1, %v209_v19 }
   0x2   :  { %200 = vmatpush.xpose.msra.mxu2 %v62_v1  ;;  %v66_v2 = vand.u32 127, %v65_v0  ;;  %123 = vmatpush.xpose.msra.mxu0 %v62_v1  ;;  %v61_v6 = vld [vmem:[%s353_s0 + $0x28] sm:$0xff]  ;;  %v58_v8 = vld [vmem:[%s353_s0 + $0x10] sm:$0xff]  ;;  %v56_v9 = vld [vmem:[%s353_s0] sm:$0xff]  ;;  %53 = vst.msk [vmem:[%s354_s2 + $0x8] sm:$0xff] %vm51_vm1, %v209_v19 }
   0x3   :  { %v57_v7 = vld [vmem:[%s353_s0 + $0x8] sm:$0xff]  ;;  %v59_v14 = vld [vmem:[%s353_s0 + $0x18] sm:$0xff]  ;;  %54 = vst.msk [vmem:[%s354_s2 + $0x10] sm:$0xff] %vm51_vm1, %v209_v19 }
   0x4   :  { %v67_v5 = vadd.s32 128, %v66_v2  ;;  %55 = vst.msk [vmem:[%s354_s2 + $0x18] sm:$0xff] %vm51_vm1, %v209_v19 }
   0x5   :  { %49 = vst.msk [vmem:[%s355_s1 + $0x10] sm:$0xff] %vm46_vm2, %v209_v19 }
   0x6   :  { %vm73_vm0 = vcmp.lt.s32.totalorder %v67_v5, 144  ;;  %201 = vmatpush.xpose.msra.mxu2 %v60_v3  ;;  %124 = vmatpush.xpose.msra.mxu0 %v60_v3  ;;  %47 = vst.msk [vmem:[%s355_s1] sm:$0xff] %vm46_vm2, %v209_v19 }
   0x7   :  { %204 = vmatpush.xpose.msk.msra.mxu3 %vm73_vm0, %v63_v4  ;;  %192 = vmatpush.xpose.msk.msra.mxu1 %vm73_vm0, %v63_v4  ;;  %v79_v10 = vsel %vm73_vm0, %v61_v6, 0.0  ;;  %v75_v11 = vsel %vm73_vm0, %v57_v7, 0.0  ;;  %v81_v15 = vsel %vm73_vm0, %v63_v4, 0.0  ;;  %v77_v16 = vsel %vm73_vm0, %v59_v14, 0.0  ;;  %48 = vst.msk [vmem:[%s355_s1 + $0x8] sm:$0xff] %vm46_vm2, %v209_v19 }
   0x8   :  { %v92_v12 = vadd.f32 %v79_v10, %v60_v3  ;;  %v86_v13 = vadd.f32 %v75_v11, %v56_v9  ;;  %v95_v17 = vadd.f32 %v81_v15, %v62_v1  ;;  %v89_v18 = vadd.f32 %v77_v16, %v58_v8  ;;  %50 = vst.msk [vmem:[%s355_s1 + $0x18] sm:$0xff] %vm46_vm2, %v209_v19  ;;  %v107_v33 = vld [vmem:[%s354_s2] sm:$0xff] }
   0x9   :  { %v108_v42 = vld [vmem:[%s354_s2 + $0x8] sm:$0xff] }
   0xa   :  { %202 = vmatpush.xpose.msra.mxu2 %v58_v8  ;;  %125 = vmatpush.xpose.msra.mxu0 %v58_v8  ;;  %v109_v38 = vld [vmem:[%s354_s2 + $0x10] sm:$0xff] }
   0xb   :  { %205 = vmatpush.xpose.msk.msra.mxu3 %vm73_vm0, %v61_v6  ;;  %193 = vmatpush.xpose.msk.msra.mxu1 %vm73_vm0, %v61_v6  ;;  %v110_v48 = vld [vmem:[%s354_s2 + $0x18] sm:$0xff] }
   0xc   :  { %93 = vadd.xlane.f32.xlu1 %v92_v12  ;;  %87 = vadd.xlane.f32.xlu0 %v86_v13  ;;  %v84_v20 = vld [vmem:[%s355_s1 + $0x10] sm:$0xff] }
   0xd   :  { %v82_v24 = vld [vmem:[%s355_s1] sm:$0xff] }
   0xe   :  { %203 = vmatpush.xpose.msra.mxu2 %v56_v9  ;;  %126 = vmatpush.xpose.msra.mxu0 %v56_v9  ;;  %v83_v27 = vld [vmem:[%s355_s1 + $0x8] sm:$0xff] }
   0xf   :  { %206 = vmatpush.xpose.msk.msra.mxu3 %vm73_vm0, %v59_v14  ;;  %194 = vmatpush.xpose.msk.msra.mxu1 %vm73_vm0, %v59_v14  ;;  %v85_v26 = vld [vmem:[%s355_s1 + $0x18] sm:$0xff] }
  0x11   :  { %133 = vmatmul.f32.vlgmr.msra.gmra.mxu2 %v60_v3  ;;  %127 = vmatmul.f32.vlgmr.msra.gmra.mxu0 %v56_v9 }
  0x13   :  { %207 = vmatpush.xpose.msk.msra.mxu3 %vm73_vm0, %v57_v7  ;;  %195 = vmatpush.xpose.msk.msra.mxu1 %vm73_vm0, %v57_v7 }
  0x14   :  { %96 = vadd.xlane.f32.xlu1 %v95_v17  ;;  %90 = vadd.xlane.f32.xlu0 %v89_v18 }
  0x16   :  { %198 = vmatmul.msk.f32.vlgmr.msra.gmra.mxu3 %vm73_vm0, %v61_v6  ;;  %196 = vmatmul.msk.f32.vlgmr.msra.gmra.mxu1 %vm73_vm0, %v57_v7 }
  0x19   :  { %136 = vmatmul.f32.gmra.mxu2 %v62_v1  ;;  %130 = vmatmul.f32.gmra.mxu0 %v58_v8 }
  0x1e   :  { %199 = vmatmul.msk.f32.gmra.mxu3 %vm73_vm0, %v63_v4  ;;  %197 = vmatmul.msk.f32.gmra.mxu1 %vm73_vm0, %v59_v14 }
  0x7f   :  { %v94_v21 = vpop.xlane.xlu1 %93  ;;  %v88_v22 = vpop.xlane.xlu0 %87 }
  0x80   :  { %v100_v23 = vadd.f32 %v94_v21, %v84_v20  ;;  %v98_v25 = vadd.f32 %v88_v22, %v82_v24 }
  0x82   :  { %105 = vst.msk [vmem:[%s355_s1 + $0x10] sm:$0xff] %vm46_vm2, %v100_v23 }
  0x83   :  { %103 = vst.msk [vmem:[%s355_s1] sm:$0xff] %vm46_vm2, %v98_v25 }
  0x87   :  { %v97_v28 = vpop.xlane.xlu1 %96  ;;  %v91_v29 = vpop.xlane.xlu0 %90 }
  0x88   :  { %v101_v30 = vadd.f32 %v97_v28, %v85_v26  ;;  %v99_v31 = vadd.f32 %v91_v29, %v83_v27 }
  0x8a   :  { %106 = vst.msk [vmem:[%s355_s1 + $0x18] sm:$0xff] %vm46_vm2, %v101_v30 }
  0x8b   :  { %104 = vst.msk [vmem:[%s355_s1 + $0x8] sm:$0xff] %vm46_vm2, %v99_v31 }
  0x8e   :  { %v128_v32 = vpop.f32.mrf.mxu0 }
  0x93   :  { %v157_v34 = vpop.f32.mrf.mxu1 }
  0x94   :  { %v158_v35 = vadd.f32 %v157_v34, %v128_v32  ;;  %v134_v36 = vpop.f32.mrf.mxu2 }
  0x96   :  { %v169_v37 = vadd.f32 %v158_v35, %v107_v33  ;;  %v131_v40 = vpop.f32.mrf.mxu0 }
  0x98   :  { %174 = vst.msk [vmem:[%s354_s2] sm:$0xff] %vm51_vm1, %v169_v37 }
  0x99   :  { %v163_v39 = vpop.f32.mrf.mxu3 }
  0x9a   :  { %v164_v41 = vadd.f32 %v163_v39, %v134_v36 }
  0x9b   :  { %v160_v43 = vpop.f32.mrf.mxu1 }
  0x9c   :  { %v171_v44 = vadd.f32 %v164_v41, %v109_v38  ;;  %v161_v45 = vadd.f32 %v160_v43, %v131_v40  ;;  %v137_v47 = vpop.f32.mrf.mxu2 }
  0x9e   :  { %176 = vst.msk [vmem:[%s354_s2 + $0x10] sm:$0xff] %vm51_vm1, %v171_v44  ;;  %v170_v46 = vadd.f32 %v161_v45, %v108_v42 }
  0xa0   :  { %175 = vst.msk [vmem:[%s354_s2 + $0x8] sm:$0xff] %vm51_vm1, %v170_v46 }
  0xa1   :  { %v166_v49 = vpop.f32.mrf.mxu3 }
  0xa2   :  { %v167_v50 = vadd.f32 %v166_v49, %v137_v47 }
  0xa4   :  { %v172_v51 = vadd.f32 %v167_v50, %v110_v48 }
  0xa6   :  { %177 = vst.msk [vmem:[%s354_s2 + $0x18] sm:$0xff] %vm51_vm1, %v172_v51 }

// kernel: wct_core.5
= control target key start
LH: loop header
LB: loop body
LE: loop exit
PB: predicated region body
PF: predicated region fallthrough
CT: control target
= control target key end

     0   :  { %v187_v7 = vmov 0   ;;  %s256_s0 = inlined_call_operand.vmem [shape: bf16[32,32], index: 0, kind: input, shape index: {}]   ;;  %s257_s1 = inlined_call_operand.vmem [shape: f32[32,1], index: 1, kind: input, shape index: {}]   ;;  %s258_s2 = inlined_call_operand.vmem [shape: f32[32,256], index: 2, kind: input, shape index: {}]   ;;  %s259_s3 = inlined_call_operand.hbm [shape: f32[32,256], index: 3, kind: output, shape index: {}]  }
   0x1   :  { %v20_v0 = vld [vmem:[%s258_s2 + $0x20] sm:$0xff]  ;;  %v22_v1 = vld [vmem:[%s258_s2 + $0x30] sm:$0xff]  ;;  %v21_v2 = vld [vmem:[%s258_s2 + $0x28] sm:$0xff]  ;;  %160 = vset.pattern.permute.xlu1 %v187_v7  ;;  %159 = vset.pattern.permute.xlu0 %v187_v7 }
   0x2   :  { %v26_v3 = vpack.c.bf16 %v22_v1, %v20_v0  ;;  %v23_v4 = vld [vmem:[%s258_s2 + $0x38] sm:$0xff]  ;;  %v16_v5 = vld [vmem:[%s258_s2] sm:$0xff]  ;;  %v18_v6 = vld [vmem:[%s258_s2 + $0x10] sm:$0xff] }
   0x3   :  { %v27_v8 = vpack.c.bf16 %v23_v4, %v21_v2  ;;  %v17_v9 = vld [vmem:[%s258_s2 + $0x8] sm:$0xff]  ;;  %v19_v10 = vld [vmem:[%s258_s2 + $0x18] sm:$0xff]  ;;  %v24_v11 = vpack.c.bf16 %v18_v6, %v16_v5  ;;  %v34_v12 = vld [vmem:[%s257_s1 + $0x10] sm:$0xff] }
   0x4   :  { %79 = vmatpush.bf16.msra.mxu0 %v26_v3  ;;  %151 = vmatpush.bf16.msra.mxu2 %v26_v3  ;;  %v32_v13 = vld [vmem:[%s257_s1] sm:$0xff]  ;;  %v25_v14 = vpack.c.bf16 %v19_v10, %v17_v9 }
   0x5   :  { %98 = vmatpush.bf16.msra.mxu1 %v27_v8  ;;  %153 = vmatpush.bf16.msra.mxu3 %v27_v8 }
   0x6   :  { %8 = vsyncpa [#allocation3], 0  ;;  %48 = vperm.xlu1 %160, %v34_v12   ;;  %38 = vperm.xlu0 %159, %v32_v13   ;;  %v149_v15 = vld [vmem:[%s256_s0] sm:$0xff]  ;;  %v150_v16 = vld [vmem:[%s256_s0 + $0x8] sm:$0xff]  ;;  %vm66_vm0 = vcmask 261120   ;;  %s188_s0 = smov [#allocation2]  }
   0x7   :  { %v35_v17 = vld [vmem:[%s257_s1 + $0x18] sm:$0xff]  ;;  %v33_v18 = vld [vmem:[%s257_s1 + $0x8] sm:$0xff]  ;;  %s123_s1 = sshll.u32 %s188_s0, 4  ;;  %s125_s14 = sshll.u32 %s259_s3, 4  ;;  %s124_s1 = int_to_ptr.vmem [resolvable:$true] %s123_s1  ;;  %s126_s14 = int_to_ptr.hbm [resolvable:$true] %s125_s14 }
   0x8   :  { %80 = vmatpush.bf16.msra.mxu0 %v24_v11  ;;  %152 = vmatpush.bf16.msra.mxu2 %v24_v11  ;;  %s189_s15 = smov 256   ;;  %s190_s16 = smov 16  }
   0x9   :  { %99 = vmatpush.bf16.msra.mxu1 %v25_v14  ;;  %154 = vmatpush.bf16.msra.mxu3 %v25_v14 }
   0xb   :  { %145 = vmatmul.msk.bf16.vlgmr.msra.gmra.mxu0 %vm66_vm0, %v149_v15  ;;  %146 = vmatmul.msk.bf16.vlgmr.msra.gmra.mxu2 %vm66_vm0, %v150_v16 }
   0xc   :  { %147 = vmatmul.msk.bf16.vlgmr.msra.gmra.mxu1 %vm66_vm0, %v149_v15  ;;  %148 = vmatmul.msk.bf16.vlgmr.msra.gmra.mxu3 %vm66_vm0, %v150_v16 }
   0xe   :  { %53 = vperm.xlu1 %160, %v35_v17   ;;  %43 = vperm.xlu0 %159, %v33_v18  }
  0x78   :  { %v39_v19 = vpop.permute.xlu0 %38  ;;  %v49_v24 = vpop.permute.xlu1 %48 }
  0x80   :  { %v44_v28 = vpop.permute.xlu0 %43  ;;  %v54_v34 = vpop.permute.xlu1 %53 }
  0x88   :  { %v82_v20 = vpop.f32.mrf.mxu0 }
  0x89   :  { %v83_v21 = vadd.f32 %v82_v20, %v39_v19  ;;  %v101_v22 = vpop.f32.mrf.mxu1 }
  0x8a   :  { %v102_v23 = vadd.f32 %v101_v22, %v39_v19 }
  0x8b   :  { %111 = vst [vmem:[#allocation2] sm:$0xff] %v83_v21 }
  0x8c   :  { %112 = vst [vmem:[#allocation2 + $0x8] sm:$0xff] %v102_v23 }
  0x8e   :  { %v87_v25 = vpop.f32.mrf.mxu2 }
  0x8f   :  { %v88_v26 = vadd.f32 %v87_v25, %v49_v24  ;;  %v106_v27 = vpop.f32.mrf.mxu3 }
  0x90   :  { %v107_v29 = vadd.f32 %v106_v27, %v49_v24  ;;  %v84_v30 = vpop.f32.mrf.mxu0 }
  0x91   :  { %115 = vst [vmem:[#allocation2 + $0x20] sm:$0xff] %v88_v26  ;;  %v85_v31 = vadd.f32 %v84_v30, %v44_v28  ;;  %v103_v32 = vpop.f32.mrf.mxu1 }
  0x92   :  { %116 = vst [vmem:[#allocation2 + $0x28] sm:$0xff] %v107_v29  ;;  %v104_v33 = vadd.f32 %v103_v32, %v44_v28 }
  0x93   :  { %113 = vst [vmem:[#allocation2 + $0x10] sm:$0xff] %v85_v31 }
  0x94   :  { %114 = vst [vmem:[#allocation2 + $0x18] sm:$0xff] %v104_v33 }
  0x96   :  { %v89_v35 = vpop.f32.mrf.mxu2 }
  0x97   :  { %v90_v36 = vadd.f32 %v89_v35, %v54_v34  ;;  %v108_v37 = vpop.f32.mrf.mxu3 }
  0x98   :  { %v109_v38 = vadd.f32 %v108_v37, %v54_v34 }
  0x99   :  { %117 = vst [vmem:[#allocation2 + $0x30] sm:$0xff] %v90_v36 }
  0x9a   :  { %118 = vst [vmem:[#allocation2 + $0x38] sm:$0xff] %v109_v38 }
  0x9b   :  { %131 = dma.vmem_to_hbm [thread:$0]  %s124_s1, 1024, %s126_s14, [#allocation3], %s189_s15, %s189_s15, %s190_s16  }
  0x9c   :  { %185 = dma.done.wait [#allocation3], 1024  }
  0x9d   :  { %186 = vsyncadd [#allocation3], 4294966272 }
  0x9e   :  { %136 = vsyncpa [#allocation3], 1 }

</bundles_post_ra>
